<compile_context>
chip_gen: v6e
topology: v6e:2x2x1
jax: 0.10.0
libtpu: 0.0.40
codegen_flags: <defaults>
</compile_context>

<pallas_src>
import math

import jax
import jax.numpy as jnp
from jax.experimental import pallas as pl
from jax.experimental.pallas import tpu as pltpu

# ---- sizes (module defaults are hidden=128 / layers=8; small synthetic sizes) ----
BATCH = 256          # test batch; wrapper pads any batch to a multiple of BLOCK_B
INPUT_DIM = 8
COND_DIM = 16
HIDDEN_DIM = 32
NUM_LAYERS = 4

BLOCK_B = 128        # batch tile: >=128 rows so MXU systolic rows are filled (256 on v6e/v7x)
ENC_CHUNK = ((2 * HIDDEN_DIM + 127) // 128) * 128   # lane-aligned per-layer enc chunk
OUT_W = 128          # lane-dense merged output slab width
_BIAS_ROWS = 3 + 4 * NUM_LAYERS
BIAS_ROWS = ((_BIAS_ROWS + 7) // 8) * 8             # sublane-pad the bias slab


def _leaky(v):
    # nn.LeakyReLU(0.2)
    return jnp.where(v >= 0, v, 0.2 * v)


# --------------------------------- kernel ---------------------------------
def realnvp_kernel(x_ref, cond_ref, enc_w_ref, w1c_ref, w_in_ref, w_mid_ref,
                   bias_ref, out_ref):
    f32 = jnp.float32
    bf16 = jnp.bfloat16
    D, C, H, L = INPUT_DIM, COND_DIM, HIDDEN_DIM, NUM_LAYERS
    two_h = 2 * H

    def dot(a, b):
        # bf16 operands (weights already stored bf16), f32 accumulation on the MXU.
        return jnp.dot(a.astype(bf16), b, preferred_element_type=f32)

    def bias(row, width):
        return bias_ref[row:row + 1, :width]          # (1, width) f32, broadcast over batch

    # ---- condition encoder: (Linear -> LeakyReLU) x 3 ----
    h = _leaky(dot(cond_ref[...], enc_w_ref[0:C, :]) + bias(0, H))
    h = _leaky(dot(h, enc_w_ref[C:C + H, :]) + bias(1, H))
    enc = _leaky(dot(h, enc_w_ref[C + H:C + 2 * H, :]) + bias(2, H))        # (Bt, H)

    # ---- hoisted enc projection for ALL layers / both sub-nets (lane-aligned) ----
    enc_all = dot(enc, w1c_ref[...])                                        # (Bt, L*ENC_CHUNK)

    x = x_ref[...]                                                          # (Bt, D) f32
    bt = x.shape[0]

    # Masks built once (TPU needs >=2D iota; JAX does not CSE iota/broadcast).
    idx = jax.lax.broadcasted_iota(jnp.int32, (1, D), 1)
    m_even = (idx % 2 == 0).astype(f32)          # 1 at even feature indices
    m_odd = 1.0 - m_even                         # 1 at odd feature indices

    s_acc = jnp.zeros((bt, D), f32)              # deferred log-det accumulator

    for l in range(L):
        # even layer: mask = ones with mask[::2]=0 -> 1 at odd indices
        # odd  layer: mask = zeros with mask[::2]=1 -> 1 at even indices
        mask, inv = (m_odd, m_even) if l % 2 == 0 else (m_even, m_odd)
        mx = x * mask                                                       # masked_x

        enc_chunk = enc_all[:, l * ENC_CHUNK:l * ENC_CHUNK + two_h]         # vreg-aligned start
        # Fused scale|shift chain (first layer fused along fan_out, middle/head
        # block-diagonal so the two sub-nets stay decoupled).
        h = _leaky(dot(mx, w_in_ref[l]) + enc_chunk + bias(3 + l, two_h))
        h = _leaky(dot(h, w_mid_ref[l, 0:two_h, :]) + bias(3 + L + l, two_h))
        h = _leaky(dot(h, w_mid_ref[l, two_h:2 * two_h, :]) + bias(3 + 2 * L + l, two_h))
        out = dot(h, w_mid_ref[l, 2 * two_h:3 * two_h, :]) + bias(3 + 3 * L + l, two_h)

        s = jnp.tanh(out[:, :D]) * inv            # scale (tanh head), masked
        t = out[:, D:2 * D] * inv                 # shift, masked
        x = mx + inv * (x * jnp.exp(s) + t)
        s_acc = s_acc + s                         # s already masked by inv

    logdet = jnp.sum(s_acc, axis=1, keepdims=True)                          # (Bt, 1)
    # Merged lane-dense output slab: lanes [0:D] = z, lanes [D:] = log_det (broadcast).
    out_ref[...] = jnp.concatenate(
        [x, jnp.broadcast_to(logdet, (bt, OUT_W - D))], axis=1)


# -------------- parameter construction (PyTorch-style init) --------------
def _init_linear(key, fan_in, fan_out):
    kw, kb = jax.random.split(key)
    bound = 1.0 / math.sqrt(fan_in)
    w = jax.random.uniform(kw, (fan_in, fan_out), jnp.float32, -bound, bound)
    b = jax.random.uniform(kb, (1, fan_out), jnp.float32, -bound, bound)
    return w, b


def init_raw_params(key):
    """Raw parameters mirroring the PyTorch module structure."""
    D, C, H, L = INPUT_DIM, COND_DIM, HIDDEN_DIM, NUM_LAYERS
    keys = jax.random.split(key, 3 + L * 2 * 4)
    ki = iter(keys)

    ce = [_init_linear(next(ki), C, H),
          _init_linear(next(ki), H, H),
          _init_linear(next(ki), H, H)]

    layers = []
    for _ in range(L):
        nets = []
        for _ in range(2):                      # k=0: scale_net, k=1: shift_net
            wa, ba = _init_linear(next(ki), D + H, H)
            wb, bb = _init_linear(next(ki), H, H)
            wc, bc = _init_linear(next(ki), H, H)
            wd, bd = _init_linear(next(ki), H, D)
            nets.append((wa, ba, wb, bb, wc, bc, wd, bd))
        layers.append(nets)
    return ce, layers


def _block_diag(a, b):
    ra, ca = a.shape
    rb, cb = b.shape
    top = jnp.concatenate([a, jnp.zeros((ra, cb), a.dtype)], axis=1)
    bot = jnp.concatenate([jnp.zeros((rb, ca), b.dtype), b], axis=1)
    return jnp.concatenate([top, bot], axis=0)


def _pad_lanes(v, width):
    return jnp.pad(v, ((0, 0), (0, width - v.shape[1])))


def pack_params(ce, layers):
    """Host-side repack into the fused, lane-dense, bf16-weight kernel layout."""
    D, H, L = INPUT_DIM, HIDDEN_DIM, NUM_LAYERS
    two_h = 2 * H
    bf16 = jnp.bfloat16
    (ce_w0, ce_b0), (ce_w1, ce_b1), (ce_w2, ce_b2) = ce

    # Encoder weights -> one row-concatenated slab (C + 2H, H).
    enc_w = jnp.concatenate([ce_w0, ce_w1, ce_w2], axis=0).astype(bf16)

    w1c_cols, w_in_l, w_mid_l = [], [], []
    bias_rows = [None] * _BIAS_ROWS
    bias_rows[0] = _pad_lanes(ce_b0, OUT_W)
    bias_rows[1] = _pad_lanes(ce_b1, OUT_W)
    bias_rows[2] = _pad_lanes(ce_b2, OUT_W)

    for l, nets in enumerate(layers):
        wa_s, ba_s, wb_s, bb_s, wc_s, bc_s, wd_s, bd_s = nets[0]   # scale_net
        wa_t, ba_t, wb_t, bb_t, wc_t, bc_t, wd_t, bd_t = nets[1]   # shift_net

        # First linear: split the concatenated [masked_x | enc] weights; fuse
        # scale|shift along fan_out.  enc part is hoisted, lane-padded per layer.
        w_in_l.append(jnp.concatenate([wa_s[:D], wa_t[:D]], axis=1))          # (D, 2H)
        w1c = jnp.concatenate([wa_s[D:], wa_t[D:]], axis=1)                   # (H, 2H)
        w1c_cols.append(_pad_lanes(w1c, ENC_CHUNK))                           # (H, ENC_CHUNK)

        # Middle / head weights block-diagonal (scale|shift stay decoupled).
        # NOTE(v5e, hidden=128): split wb/wc back into 2x(H,H) there.
        w2 = _block_diag(wb_s, wb_t)                                          # (2H, 2H)
        w3 = _block_diag(wc_s, wc_t)                                          # (2H, 2H)
        w4 = _pad_lanes(_block_diag(wd_s, wd_t), two_h)                       # (2H, 2H); cols 2D.. are 0
        w_mid_l.append(jnp.concatenate([w2, w3, w4], axis=0))                 # (6H, 2H)

        bias_rows[3 + l] = _pad_lanes(jnp.concatenate([ba_s, ba_t], axis=1), OUT_W)
        bias_rows[3 + L + l] = _pad_lanes(jnp.concatenate([bb_s, bb_t], axis=1), OUT_W)
        bias_rows[3 + 2 * L + l] = _pad_lanes(jnp.concatenate([bc_s, bc_t], axis=1), OUT_W)
        bias_rows[3 + 3 * L + l] = _pad_lanes(jnp.concatenate([bd_s, bd_t], axis=1), OUT_W)

    w1c_all = jnp.concatenate(w1c_cols, axis=1).astype(bf16)        # (H, L*ENC_CHUNK)
    w_in = jnp.stack(w_in_l).astype(bf16)                           # (L, D, 2H)
    w_mid = jnp.stack(w_mid_l).astype(bf16)                         # (L, 6H, 2H)
    bias = jnp.concatenate(bias_rows, axis=0)                       # (3+4L, 128) f32
    bias = jnp.pad(bias, ((0, BIAS_ROWS - _BIAS_ROWS), (0, 0)))     # sublane pad

    return enc_w, w1c_all, w_in, w_mid, bias


# -------------------------------- wrapper --------------------------------
def conditional_realnvp_forward(x, condition, packed, *, block_batch=BLOCK_B):
    D, C = INPUT_DIM, COND_DIM
    enc_w, w1c_all, w_in, w_mid, bias = packed

    B = x.shape[0]
    nb = pl.cdiv(B, block_batch)
    Bp = nb * block_batch
    if Bp != B:                                   # pad batch to a multiple of the tile
        x = jnp.pad(x, ((0, Bp - B), (0, 0)))
        condition = jnp.pad(condition, ((0, Bp - B), (0, 0)))

    out = pl.pallas_call(
        realnvp_kernel,
        out_shape=jax.ShapeDtypeStruct((Bp, OUT_W), jnp.float32),
        grid=(nb,),
        in_specs=[
            pl.BlockSpec((block_batch, D), lambda i: (i, 0)),       # x: tiled along batch
            pl.BlockSpec((block_batch, C), lambda i: (i, 0)),       # condition: tiled along batch
            pl.BlockSpec(enc_w.shape, lambda i: (0, 0)),            # weights: VMEM-resident
            pl.BlockSpec(w1c_all.shape, lambda i: (0, 0)),
            pl.BlockSpec(w_in.shape, lambda i: (0, 0, 0)),
            pl.BlockSpec(w_mid.shape, lambda i: (0, 0, 0)),
            pl.BlockSpec(bias.shape, lambda i: (0, 0)),
        ],
        out_specs=pl.BlockSpec((block_batch, OUT_W), lambda i: (i, 0)),
        compiler_params=pltpu.CompilerParams(
            dimension_semantics=("parallel",),          # v7x: 2 TCs split the batch grid
            vmem_limit_bytes=32 * 1024 * 1024,          # explicit cap, fits v7x's 64 MiB VMEM
        ),
    )(x, condition, enc_w, w1c_all, w_in, w_mid, bias)

    z = out[:B, :D]
    log_det = out[:B, D]                          # (batch,), matching PyTorch log_det_sum
    return z, log_det


# --------------- pure-JAX reference (mirrors the PyTorch forward) ---------------
def _bf16_round(w):
    # The kernel stores its weight stacks in bfloat16 (MXU-native operands); round
    # the reference weights the same way so the comparison isolates kernel math
    # from the intentional weight quantization.
    return w.astype(jnp.bfloat16).astype(jnp.float32)


def ref_forward(x, condition, ce, layers, round_weights=True):
    rw = _bf16_round if round_weights else (lambda w: w)
    (ce_w0, ce_b0), (ce_w1, ce_b1), (ce_w2, ce_b2) = ce
    h = _leaky(condition @ rw(ce_w0) + ce_b0)
    h = _leaky(h @ rw(ce_w1) + ce_b1)
    enc = _leaky(h @ rw(ce_w2) + ce_b2)

    D = x.shape[1]
    base = jnp.arange(D) % 2
    logdet = jnp.zeros((x.shape[0],), jnp.float32)
    for l, nets in enumerate(layers):
        mask = (base == 1).astype(jnp.float32) if l % 2 == 0 else (base == 0).astype(jnp.float32)
        inv = 1.0 - mask
        mx = x * mask
        ci = jnp.concatenate([mx, enc], axis=1)
        outs = []
        for k in range(2):
            wa, ba, wb, bb, wc, bc, wd, bd = nets[k]
            hh = _leaky(ci @ rw(wa) + ba)
            hh = _leaky(hh @ rw(wb) + bb)
            hh = _leaky(hh @ rw(wc) + bc)
            outs.append(hh @ rw(wd) + bd)
        s = jnp.tanh(outs[0]) * inv
        t = outs[1] * inv
        x = mx + inv * (x * jnp.exp(s) + t)
        logdet = logdet + jnp.sum(s * inv, axis=1)
    return x, logdet


if __name__ == "__main__":
    key = jax.random.PRNGKey(0)
    k_x, k_c, k_p = jax.random.split(key, 3)
    x = jax.random.normal(k_x, (BATCH, INPUT_DIM), jnp.float32)
    condition = jax.random.normal(k_c, (BATCH, COND_DIM), jnp.float32)

    ce, layers = init_raw_params(k_p)
    packed = pack_params(ce, layers)

    z, log_det = conditional_realnvp_forward(x, condition, packed)
    jax.block_until_ready((z, log_det))

    z_ref, ld_ref = ref_forward(x, condition, ce, layers)
    assert z.shape == (BATCH, INPUT_DIM) and log_det.shape == (BATCH,)
    assert jnp.allclose(z, z_ref, rtol=1e-2, atol=1e-2), "z mismatch vs reference"
    assert jnp.allclose(log_det, ld_ref, rtol=1e-2, atol=1e-2), "log_det mismatch vs reference"

    print("KERNEL_OK")
</pallas_src>

<mosaic_0001>
module attributes {stable_mosaic.version = 11 : i64} {
  func.func @realnvp_kernel(%arg0: i32, %arg1: memref<128x8xf32, #tpu.memory_space<vmem>>, %arg2: memref<128x16xf32, #tpu.memory_space<vmem>>, %arg3: memref<80x32xbf16, #tpu.memory_space<vmem>>, %arg4: memref<32x512xbf16, #tpu.memory_space<vmem>>, %arg5: memref<4x8x64xbf16, #tpu.memory_space<vmem>>, %arg6: memref<4x192x64xbf16, #tpu.memory_space<vmem>>, %arg7: memref<24x128xf32, #tpu.memory_space<vmem>>, %arg8: memref<128x128xf32, #tpu.memory_space<vmem>>) attributes {dimension_semantics = [#tpu.dimension_semantics<parallel>], iteration_bounds = array<i64: 2>, scalar_prefetch = 0 : i64, scratch_operands = 0 : i64, tpu.core_type = #tpu.core_type<tc>, window_params = [{transform_indices = @transform_0, window_bounds = array<i64: 128, 8>}, {transform_indices = @transform_1, window_bounds = array<i64: 128, 16>}, {pipeline_mode = #tpu.pipeline_mode<synchronous>, transform_indices = @transform_2, window_bounds = array<i64: 80, 32>}, {pipeline_mode = #tpu.pipeline_mode<synchronous>, transform_indices = @transform_3, window_bounds = array<i64: 32, 512>}, {pipeline_mode = #tpu.pipeline_mode<synchronous>, transform_indices = @transform_4, window_bounds = array<i64: 4, 8, 64>}, {pipeline_mode = #tpu.pipeline_mode<synchronous>, transform_indices = @transform_5, window_bounds = array<i64: 4, 192, 64>}, {pipeline_mode = #tpu.pipeline_mode<synchronous>, transform_indices = @transform_6, window_bounds = array<i64: 24, 128>}, {transform_indices = @transform_7, window_bounds = array<i64: 128, 128>}]} {
    %c0 = arith.constant 0 : index
    %c0_0 = arith.constant 0 : index
    %0 = vector.load %arg2[%c0, %c0_0] : memref<128x16xf32, #tpu.memory_space<vmem>>, vector<128x16xf32>
    %c0_1 = arith.constant 0 : index
    %c0_2 = arith.constant 0 : index
    %1 = vector.load %arg3[%c0_1, %c0_2] : memref<80x32xbf16, #tpu.memory_space<vmem>>, vector<16x32xbf16>
    %2 = arith.truncf %0 : vector<128x16xf32> to vector<128x16xbf16>
    %cst = arith.constant dense<0.000000e+00> : vector<128x32xf32>
    %3 = tpu.matmul %2, %1, %cst {dimension_numbers = #tpu.dot_dimension_numbers<[1], [0], [0], [1], [0, 0, 1, 1], [], []>} : vector<128x16xbf16>, vector<16x32xbf16>, vector<128x32xf32> -> vector<128x32xf32>
    %c0_3 = arith.constant 0 : index
    %c0_4 = arith.constant 0 : index
    %4 = vector.load %arg7[%c0_3, %c0_4] : memref<24x128xf32, #tpu.memory_space<vmem>>, vector<1x32xf32>
    %5 = vector.broadcast %4 : vector<1x32xf32> to vector<128x32xf32>
    %6 = arith.addf %3, %5 : vector<128x32xf32>
    %cst_5 = arith.constant 0.000000e+00 : f32
    %7 = vector.broadcast %cst_5 : f32 to vector<128x32xf32>
    %8 = arith.cmpf oge, %6, %7 : vector<128x32xf32>
    %cst_6 = arith.constant 2.000000e-01 : f32
    %9 = vector.broadcast %cst_6 : f32 to vector<128x32xf32>
    %10 = arith.mulf %9, %6 : vector<128x32xf32>
    %11 = arith.select %8, %6, %10 : vector<128x32xi1>, vector<128x32xf32>
    %c16 = arith.constant 16 : index
    %c0_7 = arith.constant 0 : index
    %12 = vector.load %arg3[%c16, %c0_7] : memref<80x32xbf16, #tpu.memory_space<vmem>>, vector<32x32xbf16>
    %13 = arith.truncf %11 : vector<128x32xf32> to vector<128x32xbf16>
    %cst_8 = arith.constant dense<0.000000e+00> : vector<128x32xf32>
    %14 = tpu.matmul %13, %12, %cst_8 {dimension_numbers = #tpu.dot_dimension_numbers<[1], [0], [0], [1], [0, 0, 1, 1], [], []>} : vector<128x32xbf16>, vector<32x32xbf16>, vector<128x32xf32> -> vector<128x32xf32>
    %c1 = arith.constant 1 : index
    %c0_9 = arith.constant 0 : index
    %15 = vector.load %arg7[%c1, %c0_9] : memref<24x128xf32, #tpu.memory_space<vmem>>, vector<1x32xf32>
    %16 = vector.broadcast %15 : vector<1x32xf32> to vector<128x32xf32>
    %17 = arith.addf %14, %16 : vector<128x32xf32>
    %cst_10 = arith.constant 0.000000e+00 : f32
    %18 = vector.broadcast %cst_10 : f32 to vector<128x32xf32>
    %19 = arith.cmpf oge, %17, %18 : vector<128x32xf32>
    %cst_11 = arith.constant 2.000000e-01 : f32
    %20 = vector.broadcast %cst_11 : f32 to vector<128x32xf32>
    %21 = arith.mulf %20, %17 : vector<128x32xf32>
    %22 = arith.select %19, %17, %21 : vector<128x32xi1>, vector<128x32xf32>
    %c48 = arith.constant 48 : index
    %c0_12 = arith.constant 0 : index
    %23 = vector.load %arg3[%c48, %c0_12] : memref<80x32xbf16, #tpu.memory_space<vmem>>, vector<32x32xbf16>
    %24 = arith.truncf %22 : vector<128x32xf32> to vector<128x32xbf16>
    %cst_13 = arith.constant dense<0.000000e+00> : vector<128x32xf32>
    %25 = tpu.matmul %24, %23, %cst_13 {dimension_numbers = #tpu.dot_dimension_numbers<[1], [0], [0], [1], [0, 0, 1, 1], [], []>} : vector<128x32xbf16>, vector<32x32xbf16>, vector<128x32xf32> -> vector<128x32xf32>
    %c2 = arith.constant 2 : index
    %c0_14 = arith.constant 0 : index
    %26 = vector.load %arg7[%c2, %c0_14] : memref<24x128xf32, #tpu.memory_space<vmem>>, vector<1x32xf32>
    %27 = vector.broadcast %26 : vector<1x32xf32> to vector<128x32xf32>
    %28 = arith.addf %25, %27 : vector<128x32xf32>
    %cst_15 = arith.constant 0.000000e+00 : f32
    %29 = vector.broadcast %cst_15 : f32 to vector<128x32xf32>
    %30 = arith.cmpf oge, %28, %29 : vector<128x32xf32>
    %cst_16 = arith.constant 2.000000e-01 : f32
    %31 = vector.broadcast %cst_16 : f32 to vector<128x32xf32>
    %32 = arith.mulf %31, %28 : vector<128x32xf32>
    %33 = arith.select %30, %28, %32 : vector<128x32xi1>, vector<128x32xf32>
    %c0_17 = arith.constant 0 : index
    %c0_18 = arith.constant 0 : index
    %34 = vector.load %arg4[%c0_17, %c0_18] : memref<32x512xbf16, #tpu.memory_space<vmem>>, vector<32x512xbf16>
    %35 = arith.truncf %33 : vector<128x32xf32> to vector<128x32xbf16>
    %cst_19 = arith.constant dense<0.000000e+00> : vector<128x512xf32>
    %36 = tpu.matmul %35, %34, %cst_19 {dimension_numbers = #tpu.dot_dimension_numbers<[1], [0], [0], [1], [0, 0, 1, 1], [], []>} : vector<128x32xbf16>, vector<32x512xbf16>, vector<128x512xf32> -> vector<128x512xf32>
    %c0_20 = arith.constant 0 : index
    %c0_21 = arith.constant 0 : index
    %37 = vector.load %arg1[%c0_20, %c0_21] : memref<128x8xf32, #tpu.memory_space<vmem>>, vector<128x8xf32>
    %38 = tpu.iota {dimensions = array<i32: 1>} : vector<1x8xi32>
    %c2_i32 = arith.constant 2 : i32
    %c0_i32 = arith.constant 0 : i32
    %39 = arith.cmpi eq, %c2_i32, %c0_i32 : i32
    %c1_i32 = arith.constant 1 : i32
    %40 = arith.select %39, %c1_i32, %c2_i32 : i32
    %41 = vector.broadcast %40 : i32 to vector<1x8xi32>
    %42 = arith.remsi %38, %41 : vector<1x8xi32>
    %c0_i32_22 = arith.constant 0 : i32
    %43 = vector.broadcast %c0_i32_22 : i32 to vector<1x8xi32>
    %44 = arith.cmpi ne, %42, %43 : vector<1x8xi32>
    %c0_i32_23 = arith.constant 0 : i32
    %45 = vector.broadcast %c0_i32_23 : i32 to vector<1x8xi32>
    %46 = arith.cmpi slt, %42, %45 : vector<1x8xi32>
    %c0_i32_24 = arith.constant 0 : i32
    %47 = arith.cmpi slt, %40, %c0_i32_24 : i32
    %48 = vector.broadcast %47 : i1 to vector<1x8xi1>
    %49 = vector.broadcast %48 : vector<1x8xi1> to vector<1x8xi1>
    %50 = arith.xori %46, %49 : vector<1x8xi1>
    %51 = arith.andi %50, %44 : vector<1x8xi1>
    %52 = vector.broadcast %40 : i32 to vector<1x8xi32>
    %53 = arith.addi %42, %52 : vector<1x8xi32>
    %54 = arith.select %51, %53, %42 : vector<1x8xi1>, vector<1x8xi32>
    %c0_i32_25 = arith.constant 0 : i32
    %55 = vector.broadcast %c0_i32_25 : i32 to vector<1x8xi32>
    %56 = arith.cmpi eq, %54, %55 : vector<1x8xi32>
    %57 = arith.extui %56 : vector<1x8xi1> to vector<1x8xi32>
    %58 = arith.sitofp %57 : vector<1x8xi32> to vector<1x8xf32>
    %cst_26 = arith.constant 1.000000e+00 : f32
    %59 = vector.broadcast %cst_26 : f32 to vector<1x8xf32>
    %60 = arith.subf %59, %58 : vector<1x8xf32>
    %cst_27 = arith.constant 0.000000e+00 : f32
    %61 = vector.broadcast %cst_27 : f32 to vector<128x8xf32>
    %62 = vector.broadcast %60 : vector<1x8xf32> to vector<128x8xf32>
    %63 = arith.mulf %37, %62 : vector<128x8xf32>
    %64 = vector.extract_strided_slice %36 {offsets = [0, 0], sizes = [128, 64], strides = [1, 1]} : vector<128x512xf32> to vector<128x64xf32>
    %c0_28 = arith.constant 0 : index
    %c0_29 = arith.constant 0 : index
    %c0_30 = arith.constant 0 : index
    %65 = vector.load %arg5[%c0_28, %c0_29, %c0_30] : memref<4x8x64xbf16, #tpu.memory_space<vmem>>, vector<1x8x64xbf16>
    %66 = vector.shape_cast %65 : vector<1x8x64xbf16> to vector<8x64xbf16>
    %67 = arith.truncf %63 : vector<128x8xf32> to vector<128x8xbf16>
    %cst_31 = arith.constant dense<0.000000e+00> : vector<128x64xf32>
    %68 = tpu.matmul %67, %66, %cst_31 {dimension_numbers = #tpu.dot_dimension_numbers<[1], [0], [0], [1], [0, 0, 1, 1], [], []>} : vector<128x8xbf16>, vector<8x64xbf16>, vector<128x64xf32> -> vector<128x64xf32>
    %69 = arith.addf %68, %64 : vector<128x64xf32>
    %c3 = arith.constant 3 : index
    %c0_32 = arith.constant 0 : index
    %70 = vector.load %arg7[%c3, %c0_32] : memref<24x128xf32, #tpu.memory_space<vmem>>, vector<1x64xf32>
    %71 = vector.broadcast %70 : vector<1x64xf32> to vector<128x64xf32>
    %72 = arith.addf %69, %71 : vector<128x64xf32>
    %cst_33 = arith.constant 0.000000e+00 : f32
    %73 = vector.broadcast %cst_33 : f32 to vector<128x64xf32>
    %74 = arith.cmpf oge, %72, %73 : vector<128x64xf32>
    %cst_34 = arith.constant 2.000000e-01 : f32
    %75 = vector.broadcast %cst_34 : f32 to vector<128x64xf32>
    %76 = arith.mulf %75, %72 : vector<128x64xf32>
    %77 = arith.select %74, %72, %76 : vector<128x64xi1>, vector<128x64xf32>
    %c0_35 = arith.constant 0 : index
    %c0_36 = arith.constant 0 : index
    %c0_37 = arith.constant 0 : index
    %78 = vector.load %arg6[%c0_35, %c0_36, %c0_37] : memref<4x192x64xbf16, #tpu.memory_space<vmem>>, vector<1x64x64xbf16>
    %79 = vector.shape_cast %78 : vector<1x64x64xbf16> to vector<64x64xbf16>
    %80 = arith.truncf %77 : vector<128x64xf32> to vector<128x64xbf16>
    %cst_38 = arith.constant dense<0.000000e+00> : vector<128x64xf32>
    %81 = tpu.matmul %80, %79, %cst_38 {dimension_numbers = #tpu.dot_dimension_numbers<[1], [0], [0], [1], [0, 0, 1, 1], [], []>} : vector<128x64xbf16>, vector<64x64xbf16>, vector<128x64xf32> -> vector<128x64xf32>
    %c7 = arith.constant 7 : index
    %c0_39 = arith.constant 0 : index
    %82 = vector.load %arg7[%c7, %c0_39] : memref<24x128xf32, #tpu.memory_space<vmem>>, vector<1x64xf32>
    %83 = vector.broadcast %82 : vector<1x64xf32> to vector<128x64xf32>
    %84 = arith.addf %81, %83 : vector<128x64xf32>
    %cst_40 = arith.constant 0.000000e+00 : f32
    %85 = vector.broadcast %cst_40 : f32 to vector<128x64xf32>
    %86 = arith.cmpf oge, %84, %85 : vector<128x64xf32>
    %cst_41 = arith.constant 2.000000e-01 : f32
    %87 = vector.broadcast %cst_41 : f32 to vector<128x64xf32>
    %88 = arith.mulf %87, %84 : vector<128x64xf32>
    %89 = arith.select %86, %84, %88 : vector<128x64xi1>, vector<128x64xf32>
    %c0_42 = arith.constant 0 : index
    %c64 = arith.constant 64 : index
    %c0_43 = arith.constant 0 : index
    %90 = vector.load %arg6[%c0_42, %c64, %c0_43] : memref<4x192x64xbf16, #tpu.memory_space<vmem>>, vector<1x64x64xbf16>
    %91 = vector.shape_cast %90 : vector<1x64x64xbf16> to vector<64x64xbf16>
    %92 = arith.truncf %89 : vector<128x64xf32> to vector<128x64xbf16>
    %cst_44 = arith.constant dense<0.000000e+00> : vector<128x64xf32>
    %93 = tpu.matmul %92, %91, %cst_44 {dimension_numbers = #tpu.dot_dimension_numbers<[1], [0], [0], [1], [0, 0, 1, 1], [], []>} : vector<128x64xbf16>, vector<64x64xbf16>, vector<128x64xf32> -> vector<128x64xf32>
    %c11 = arith.constant 11 : index
    %c0_45 = arith.constant 0 : index
    %94 = vector.load %arg7[%c11, %c0_45] : memref<24x128xf32, #tpu.memory_space<vmem>>, vector<1x64xf32>
    %95 = vector.broadcast %94 : vector<1x64xf32> to vector<128x64xf32>
    %96 = arith.addf %93, %95 : vector<128x64xf32>
    %cst_46 = arith.constant 0.000000e+00 : f32
    %97 = vector.broadcast %cst_46 : f32 to vector<128x64xf32>
    %98 = arith.cmpf oge, %96, %97 : vector<128x64xf32>
    %cst_47 = arith.constant 2.000000e-01 : f32
    %99 = vector.broadcast %cst_47 : f32 to vector<128x64xf32>
    %100 = arith.mulf %99, %96 : vector<128x64xf32>
    %101 = arith.select %98, %96, %100 : vector<128x64xi1>, vector<128x64xf32>
    %c0_48 = arith.constant 0 : index
    %c128 = arith.constant 128 : index
    %c0_49 = arith.constant 0 : index
    %102 = vector.load %arg6[%c0_48, %c128, %c0_49] : memref<4x192x64xbf16, #tpu.memory_space<vmem>>, vector<1x64x64xbf16>
    %103 = vector.shape_cast %102 : vector<1x64x64xbf16> to vector<64x64xbf16>
    %104 = arith.truncf %101 : vector<128x64xf32> to vector<128x64xbf16>
    %cst_50 = arith.constant dense<0.000000e+00> : vector<128x64xf32>
    %105 = tpu.matmul %104, %103, %cst_50 {dimension_numbers = #tpu.dot_dimension_numbers<[1], [0], [0], [1], [0, 0, 1, 1], [], []>} : vector<128x64xbf16>, vector<64x64xbf16>, vector<128x64xf32> -> vector<128x64xf32>
    %c15 = arith.constant 15 : index
    %c0_51 = arith.constant 0 : index
    %106 = vector.load %arg7[%c15, %c0_51] : memref<24x128xf32, #tpu.memory_space<vmem>>, vector<1x64xf32>
    %107 = vector.broadcast %106 : vector<1x64xf32> to vector<128x64xf32>
    %108 = arith.addf %105, %107 : vector<128x64xf32>
    %109 = vector.extract_strided_slice %108 {offsets = [0, 0], sizes = [128, 8], strides = [1, 1]} : vector<128x64xf32> to vector<128x8xf32>
    %110 = math.tanh %109 : vector<128x8xf32>
    %111 = vector.broadcast %58 : vector<1x8xf32> to vector<128x8xf32>
    %112 = arith.mulf %110, %111 : vector<128x8xf32>
    %113 = vector.extract_strided_slice %108 {offsets = [0, 8], sizes = [128, 8], strides = [1, 1]} : vector<128x64xf32> to vector<128x8xf32>
    %114 = vector.broadcast %58 : vector<1x8xf32> to vector<128x8xf32>
    %115 = arith.mulf %113, %114 : vector<128x8xf32>
    %116 = math.exp %112 : vector<128x8xf32>
    %117 = arith.mulf %37, %116 : vector<128x8xf32>
    %118 = arith.addf %117, %115 : vector<128x8xf32>
    %119 = vector.broadcast %58 : vector<1x8xf32> to vector<128x8xf32>
    %120 = arith.mulf %119, %118 : vector<128x8xf32>
    %121 = arith.addf %63, %120 : vector<128x8xf32>
    %122 = arith.addf %61, %112 : vector<128x8xf32>
    %123 = vector.broadcast %58 : vector<1x8xf32> to vector<128x8xf32>
    %124 = arith.mulf %121, %123 : vector<128x8xf32>
    %125 = vector.extract_strided_slice %36 {offsets = [0, 128], sizes = [128, 64], strides = [1, 1]} : vector<128x512xf32> to vector<128x64xf32>
    %c1_52 = arith.constant 1 : index
    %c0_53 = arith.constant 0 : index
    %c0_54 = arith.constant 0 : index
    %126 = vector.load %arg5[%c1_52, %c0_53, %c0_54] : memref<4x8x64xbf16, #tpu.memory_space<vmem>>, vector<1x8x64xbf16>
    %127 = vector.shape_cast %126 : vector<1x8x64xbf16> to vector<8x64xbf16>
    %128 = arith.truncf %124 : vector<128x8xf32> to vector<128x8xbf16>
    %cst_55 = arith.constant dense<0.000000e+00> : vector<128x64xf32>
    %129 = tpu.matmul %128, %127, %cst_55 {dimension_numbers = #tpu.dot_dimension_numbers<[1], [0], [0], [1], [0, 0, 1, 1], [], []>} : vector<128x8xbf16>, vector<8x64xbf16>, vector<128x64xf32> -> vector<128x64xf32>
    %130 = arith.addf %129, %125 : vector<128x64xf32>
    %c4 = arith.constant 4 : index
    %c0_56 = arith.constant 0 : index
    %131 = vector.load %arg7[%c4, %c0_56] : memref<24x128xf32, #tpu.memory_space<vmem>>, vector<1x64xf32>
    %132 = vector.broadcast %131 : vector<1x64xf32> to vector<128x64xf32>
    %133 = arith.addf %130, %132 : vector<128x64xf32>
    %cst_57 = arith.constant 0.000000e+00 : f32
    %134 = vector.broadcast %cst_57 : f32 to vector<128x64xf32>
    %135 = arith.cmpf oge, %133, %134 : vector<128x64xf32>
    %cst_58 = arith.constant 2.000000e-01 : f32
    %136 = vector.broadcast %cst_58 : f32 to vector<128x64xf32>
    %137 = arith.mulf %136, %133 : vector<128x64xf32>
    %138 = arith.select %135, %133, %137 : vector<128x64xi1>, vector<128x64xf32>
    %c1_59 = arith.constant 1 : index
    %c0_60 = arith.constant 0 : index
    %c0_61 = arith.constant 0 : index
    %139 = vector.load %arg6[%c1_59, %c0_60, %c0_61] : memref<4x192x64xbf16, #tpu.memory_space<vmem>>, vector<1x64x64xbf16>
    %140 = vector.shape_cast %139 : vector<1x64x64xbf16> to vector<64x64xbf16>
    %141 = arith.truncf %138 : vector<128x64xf32> to vector<128x64xbf16>
    %cst_62 = arith.constant dense<0.000000e+00> : vector<128x64xf32>
    %142 = tpu.matmul %141, %140, %cst_62 {dimension_numbers = #tpu.dot_dimension_numbers<[1], [0], [0], [1], [0, 0, 1, 1], [], []>} : vector<128x64xbf16>, vector<64x64xbf16>, vector<128x64xf32> -> vector<128x64xf32>
    %c8 = arith.constant 8 : index
    %c0_63 = arith.constant 0 : index
    %143 = vector.load %arg7[%c8, %c0_63] : memref<24x128xf32, #tpu.memory_space<vmem>>, vector<1x64xf32>
    %144 = vector.broadcast %143 : vector<1x64xf32> to vector<128x64xf32>
    %145 = arith.addf %142, %144 : vector<128x64xf32>
    %cst_64 = arith.constant 0.000000e+00 : f32
    %146 = vector.broadcast %cst_64 : f32 to vector<128x64xf32>
    %147 = arith.cmpf oge, %145, %146 : vector<128x64xf32>
    %cst_65 = arith.constant 2.000000e-01 : f32
    %148 = vector.broadcast %cst_65 : f32 to vector<128x64xf32>
    %149 = arith.mulf %148, %145 : vector<128x64xf32>
    %150 = arith.select %147, %145, %149 : vector<128x64xi1>, vector<128x64xf32>
    %c1_66 = arith.constant 1 : index
    %c64_67 = arith.constant 64 : index
    %c0_68 = arith.constant 0 : index
    %151 = vector.load %arg6[%c1_66, %c64_67, %c0_68] : memref<4x192x64xbf16, #tpu.memory_space<vmem>>, vector<1x64x64xbf16>
    %152 = vector.shape_cast %151 : vector<1x64x64xbf16> to vector<64x64xbf16>
    %153 = arith.truncf %150 : vector<128x64xf32> to vector<128x64xbf16>
    %cst_69 = arith.constant dense<0.000000e+00> : vector<128x64xf32>
    %154 = tpu.matmul %153, %152, %cst_69 {dimension_numbers = #tpu.dot_dimension_numbers<[1], [0], [0], [1], [0, 0, 1, 1], [], []>} : vector<128x64xbf16>, vector<64x64xbf16>, vector<128x64xf32> -> vector<128x64xf32>
    %c12 = arith.constant 12 : index
    %c0_70 = arith.constant 0 : index
    %155 = vector.load %arg7[%c12, %c0_70] : memref<24x128xf32, #tpu.memory_space<vmem>>, vector<1x64xf32>
    %156 = vector.broadcast %155 : vector<1x64xf32> to vector<128x64xf32>
    %157 = arith.addf %154, %156 : vector<128x64xf32>
    %cst_71 = arith.constant 0.000000e+00 : f32
    %158 = vector.broadcast %cst_71 : f32 to vector<128x64xf32>
    %159 = arith.cmpf oge, %157, %158 : vector<128x64xf32>
    %cst_72 = arith.constant 2.000000e-01 : f32
    %160 = vector.broadcast %cst_72 : f32 to vector<128x64xf32>
    %161 = arith.mulf %160, %157 : vector<128x64xf32>
    %162 = arith.select %159, %157, %161 : vector<128x64xi1>, vector<128x64xf32>
    %c1_73 = arith.constant 1 : index
    %c128_74 = arith.constant 128 : index
    %c0_75 = arith.constant 0 : index
    %163 = vector.load %arg6[%c1_73, %c128_74, %c0_75] : memref<4x192x64xbf16, #tpu.memory_space<vmem>>, vector<1x64x64xbf16>
    %164 = vector.shape_cast %163 : vector<1x64x64xbf16> to vector<64x64xbf16>
    %165 = arith.truncf %162 : vector<128x64xf32> to vector<128x64xbf16>
    %cst_76 = arith.constant dense<0.000000e+00> : vector<128x64xf32>
    %166 = tpu.matmul %165, %164, %cst_76 {dimension_numbers = #tpu.dot_dimension_numbers<[1], [0], [0], [1], [0, 0, 1, 1], [], []>} : vector<128x64xbf16>, vector<64x64xbf16>, vector<128x64xf32> -> vector<128x64xf32>
    %c16_77 = arith.constant 16 : index
    %c0_78 = arith.constant 0 : index
    %167 = vector.load %arg7[%c16_77, %c0_78] : memref<24x128xf32, #tpu.memory_space<vmem>>, vector<1x64xf32>
    %168 = vector.broadcast %167 : vector<1x64xf32> to vector<128x64xf32>
    %169 = arith.addf %166, %168 : vector<128x64xf32>
    %170 = vector.extract_strided_slice %169 {offsets = [0, 0], sizes = [128, 8], strides = [1, 1]} : vector<128x64xf32> to vector<128x8xf32>
    %171 = math.tanh %170 : vector<128x8xf32>
    %172 = vector.broadcast %60 : vector<1x8xf32> to vector<128x8xf32>
    %173 = arith.mulf %171, %172 : vector<128x8xf32>
    %174 = vector.extract_strided_slice %169 {offsets = [0, 8], sizes = [128, 8], strides = [1, 1]} : vector<128x64xf32> to vector<128x8xf32>
    %175 = vector.broadcast %60 : vector<1x8xf32> to vector<128x8xf32>
    %176 = arith.mulf %174, %175 : vector<128x8xf32>
    %177 = math.exp %173 : vector<128x8xf32>
    %178 = arith.mulf %121, %177 : vector<128x8xf32>
    %179 = arith.addf %178, %176 : vector<128x8xf32>
    %180 = vector.broadcast %60 : vector<1x8xf32> to vector<128x8xf32>
    %181 = arith.mulf %180, %179 : vector<128x8xf32>
    %182 = arith.addf %124, %181 : vector<128x8xf32>
    %183 = arith.addf %122, %173 : vector<128x8xf32>
    %184 = vector.broadcast %60 : vector<1x8xf32> to vector<128x8xf32>
    %185 = arith.mulf %182, %184 : vector<128x8xf32>
    %186 = vector.extract_strided_slice %36 {offsets = [0, 256], sizes = [128, 64], strides = [1, 1]} : vector<128x512xf32> to vector<128x64xf32>
    %c2_79 = arith.constant 2 : index
    %c0_80 = arith.constant 0 : index
    %c0_81 = arith.constant 0 : index
    %187 = vector.load %arg5[%c2_79, %c0_80, %c0_81] : memref<4x8x64xbf16, #tpu.memory_space<vmem>>, vector<1x8x64xbf16>
    %188 = vector.shape_cast %187 : vector<1x8x64xbf16> to vector<8x64xbf16>
    %189 = arith.truncf %185 : vector<128x8xf32> to vector<128x8xbf16>
    %cst_82 = arith.constant dense<0.000000e+00> : vector<128x64xf32>
    %190 = tpu.matmul %189, %188, %cst_82 {dimension_numbers = #tpu.dot_dimension_numbers<[1], [0], [0], [1], [0, 0, 1, 1], [], []>} : vector<128x8xbf16>, vector<8x64xbf16>, vector<128x64xf32> -> vector<128x64xf32>
    %191 = arith.addf %190, %186 : vector<128x64xf32>
    %c5 = arith.constant 5 : index
    %c0_83 = arith.constant 0 : index
    %192 = vector.load %arg7[%c5, %c0_83] : memref<24x128xf32, #tpu.memory_space<vmem>>, vector<1x64xf32>
    %193 = vector.broadcast %192 : vector<1x64xf32> to vector<128x64xf32>
    %194 = arith.addf %191, %193 : vector<128x64xf32>
    %cst_84 = arith.constant 0.000000e+00 : f32
    %195 = vector.broadcast %cst_84 : f32 to vector<128x64xf32>
    %196 = arith.cmpf oge, %194, %195 : vector<128x64xf32>
    %cst_85 = arith.constant 2.000000e-01 : f32
    %197 = vector.broadcast %cst_85 : f32 to vector<128x64xf32>
    %198 = arith.mulf %197, %194 : vector<128x64xf32>
    %199 = arith.select %196, %194, %198 : vector<128x64xi1>, vector<128x64xf32>
    %c2_86 = arith.constant 2 : index
    %c0_87 = arith.constant 0 : index
    %c0_88 = arith.constant 0 : index
    %200 = vector.load %arg6[%c2_86, %c0_87, %c0_88] : memref<4x192x64xbf16, #tpu.memory_space<vmem>>, vector<1x64x64xbf16>
    %201 = vector.shape_cast %200 : vector<1x64x64xbf16> to vector<64x64xbf16>
    %202 = arith.truncf %199 : vector<128x64xf32> to vector<128x64xbf16>
    %cst_89 = arith.constant dense<0.000000e+00> : vector<128x64xf32>
    %203 = tpu.matmul %202, %201, %cst_89 {dimension_numbers = #tpu.dot_dimension_numbers<[1], [0], [0], [1], [0, 0, 1, 1], [], []>} : vector<128x64xbf16>, vector<64x64xbf16>, vector<128x64xf32> -> vector<128x64xf32>
    %c9 = arith.constant 9 : index
    %c0_90 = arith.constant 0 : index
    %204 = vector.load %arg7[%c9, %c0_90] : memref<24x128xf32, #tpu.memory_space<vmem>>, vector<1x64xf32>
    %205 = vector.broadcast %204 : vector<1x64xf32> to vector<128x64xf32>
    %206 = arith.addf %203, %205 : vector<128x64xf32>
    %cst_91 = arith.constant 0.000000e+00 : f32
    %207 = vector.broadcast %cst_91 : f32 to vector<128x64xf32>
    %208 = arith.cmpf oge, %206, %207 : vector<128x64xf32>
    %cst_92 = arith.constant 2.000000e-01 : f32
    %209 = vector.broadcast %cst_92 : f32 to vector<128x64xf32>
    %210 = arith.mulf %209, %206 : vector<128x64xf32>
    %211 = arith.select %208, %206, %210 : vector<128x64xi1>, vector<128x64xf32>
    %c2_93 = arith.constant 2 : index
    %c64_94 = arith.constant 64 : index
    %c0_95 = arith.constant 0 : index
    %212 = vector.load %arg6[%c2_93, %c64_94, %c0_95] : memref<4x192x64xbf16, #tpu.memory_space<vmem>>, vector<1x64x64xbf16>
    %213 = vector.shape_cast %212 : vector<1x64x64xbf16> to vector<64x64xbf16>
    %214 = arith.truncf %211 : vector<128x64xf32> to vector<128x64xbf16>
    %cst_96 = arith.constant dense<0.000000e+00> : vector<128x64xf32>
    %215 = tpu.matmul %214, %213, %cst_96 {dimension_numbers = #tpu.dot_dimension_numbers<[1], [0], [0], [1], [0, 0, 1, 1], [], []>} : vector<128x64xbf16>, vector<64x64xbf16>, vector<128x64xf32> -> vector<128x64xf32>
    %c13 = arith.constant 13 : index
    %c0_97 = arith.constant 0 : index
    %216 = vector.load %arg7[%c13, %c0_97] : memref<24x128xf32, #tpu.memory_space<vmem>>, vector<1x64xf32>
    %217 = vector.broadcast %216 : vector<1x64xf32> to vector<128x64xf32>
    %218 = arith.addf %215, %217 : vector<128x64xf32>
    %cst_98 = arith.constant 0.000000e+00 : f32
    %219 = vector.broadcast %cst_98 : f32 to vector<128x64xf32>
    %220 = arith.cmpf oge, %218, %219 : vector<128x64xf32>
    %cst_99 = arith.constant 2.000000e-01 : f32
    %221 = vector.broadcast %cst_99 : f32 to vector<128x64xf32>
    %222 = arith.mulf %221, %218 : vector<128x64xf32>
    %223 = arith.select %220, %218, %222 : vector<128x64xi1>, vector<128x64xf32>
    %c2_100 = arith.constant 2 : index
    %c128_101 = arith.constant 128 : index
    %c0_102 = arith.constant 0 : index
    %224 = vector.load %arg6[%c2_100, %c128_101, %c0_102] : memref<4x192x64xbf16, #tpu.memory_space<vmem>>, vector<1x64x64xbf16>
    %225 = vector.shape_cast %224 : vector<1x64x64xbf16> to vector<64x64xbf16>
    %226 = arith.truncf %223 : vector<128x64xf32> to vector<128x64xbf16>
    %cst_103 = arith.constant dense<0.000000e+00> : vector<128x64xf32>
    %227 = tpu.matmul %226, %225, %cst_103 {dimension_numbers = #tpu.dot_dimension_numbers<[1], [0], [0], [1], [0, 0, 1, 1], [], []>} : vector<128x64xbf16>, vector<64x64xbf16>, vector<128x64xf32> -> vector<128x64xf32>
    %c17 = arith.constant 17 : index
    %c0_104 = arith.constant 0 : index
    %228 = vector.load %arg7[%c17, %c0_104] : memref<24x128xf32, #tpu.memory_space<vmem>>, vector<1x64xf32>
    %229 = vector.broadcast %228 : vector<1x64xf32> to vector<128x64xf32>
    %230 = arith.addf %227, %229 : vector<128x64xf32>
    %231 = vector.extract_strided_slice %230 {offsets = [0, 0], sizes = [128, 8], strides = [1, 1]} : vector<128x64xf32> to vector<128x8xf32>
    %232 = math.tanh %231 : vector<128x8xf32>
    %233 = vector.broadcast %58 : vector<1x8xf32> to vector<128x8xf32>
    %234 = arith.mulf %232, %233 : vector<128x8xf32>
    %235 = vector.extract_strided_slice %230 {offsets = [0, 8], sizes = [128, 8], strides = [1, 1]} : vector<128x64xf32> to vector<128x8xf32>
    %236 = vector.broadcast %58 : vector<1x8xf32> to vector<128x8xf32>
    %237 = arith.mulf %235, %236 : vector<128x8xf32>
    %238 = math.exp %234 : vector<128x8xf32>
    %239 = arith.mulf %182, %238 : vector<128x8xf32>
    %240 = arith.addf %239, %237 : vector<128x8xf32>
    %241 = vector.broadcast %58 : vector<1x8xf32> to vector<128x8xf32>
    %242 = arith.mulf %241, %240 : vector<128x8xf32>
    %243 = arith.addf %185, %242 : vector<128x8xf32>
    %244 = arith.addf %183, %234 : vector<128x8xf32>
    %245 = vector.broadcast %58 : vector<1x8xf32> to vector<128x8xf32>
    %246 = arith.mulf %243, %245 : vector<128x8xf32>
    %247 = vector.extract_strided_slice %36 {offsets = [0, 384], sizes = [128, 64], strides = [1, 1]} : vector<128x512xf32> to vector<128x64xf32>
    %c3_105 = arith.constant 3 : index
    %c0_106 = arith.constant 0 : index
    %c0_107 = arith.constant 0 : index
    %248 = vector.load %arg5[%c3_105, %c0_106, %c0_107] : memref<4x8x64xbf16, #tpu.memory_space<vmem>>, vector<1x8x64xbf16>
    %249 = vector.shape_cast %248 : vector<1x8x64xbf16> to vector<8x64xbf16>
    %250 = arith.truncf %246 : vector<128x8xf32> to vector<128x8xbf16>
    %cst_108 = arith.constant dense<0.000000e+00> : vector<128x64xf32>
    %251 = tpu.matmul %250, %249, %cst_108 {dimension_numbers = #tpu.dot_dimension_numbers<[1], [0], [0], [1], [0, 0, 1, 1], [], []>} : vector<128x8xbf16>, vector<8x64xbf16>, vector<128x64xf32> -> vector<128x64xf32>
    %252 = arith.addf %251, %247 : vector<128x64xf32>
    %c6 = arith.constant 6 : index
    %c0_109 = arith.constant 0 : index
    %253 = vector.load %arg7[%c6, %c0_109] : memref<24x128xf32, #tpu.memory_space<vmem>>, vector<1x64xf32>
    %254 = vector.broadcast %253 : vector<1x64xf32> to vector<128x64xf32>
    %255 = arith.addf %252, %254 : vector<128x64xf32>
    %cst_110 = arith.constant 0.000000e+00 : f32
    %256 = vector.broadcast %cst_110 : f32 to vector<128x64xf32>
    %257 = arith.cmpf oge, %255, %256 : vector<128x64xf32>
    %cst_111 = arith.constant 2.000000e-01 : f32
    %258 = vector.broadcast %cst_111 : f32 to vector<128x64xf32>
    %259 = arith.mulf %258, %255 : vector<128x64xf32>
    %260 = arith.select %257, %255, %259 : vector<128x64xi1>, vector<128x64xf32>
    %c3_112 = arith.constant 3 : index
    %c0_113 = arith.constant 0 : index
    %c0_114 = arith.constant 0 : index
    %261 = vector.load %arg6[%c3_112, %c0_113, %c0_114] : memref<4x192x64xbf16, #tpu.memory_space<vmem>>, vector<1x64x64xbf16>
    %262 = vector.shape_cast %261 : vector<1x64x64xbf16> to vector<64x64xbf16>
    %263 = arith.truncf %260 : vector<128x64xf32> to vector<128x64xbf16>
    %cst_115 = arith.constant dense<0.000000e+00> : vector<128x64xf32>
    %264 = tpu.matmul %263, %262, %cst_115 {dimension_numbers = #tpu.dot_dimension_numbers<[1], [0], [0], [1], [0, 0, 1, 1], [], []>} : vector<128x64xbf16>, vector<64x64xbf16>, vector<128x64xf32> -> vector<128x64xf32>
    %c10 = arith.constant 10 : index
    %c0_116 = arith.constant 0 : index
    %265 = vector.load %arg7[%c10, %c0_116] : memref<24x128xf32, #tpu.memory_space<vmem>>, vector<1x64xf32>
    %266 = vector.broadcast %265 : vector<1x64xf32> to vector<128x64xf32>
    %267 = arith.addf %264, %266 : vector<128x64xf32>
    %cst_117 = arith.constant 0.000000e+00 : f32
    %268 = vector.broadcast %cst_117 : f32 to vector<128x64xf32>
    %269 = arith.cmpf oge, %267, %268 : vector<128x64xf32>
    %cst_118 = arith.constant 2.000000e-01 : f32
    %270 = vector.broadcast %cst_118 : f32 to vector<128x64xf32>
    %271 = arith.mulf %270, %267 : vector<128x64xf32>
    %272 = arith.select %269, %267, %271 : vector<128x64xi1>, vector<128x64xf32>
    %c3_119 = arith.constant 3 : index
    %c64_120 = arith.constant 64 : index
    %c0_121 = arith.constant 0 : index
    %273 = vector.load %arg6[%c3_119, %c64_120, %c0_121] : memref<4x192x64xbf16, #tpu.memory_space<vmem>>, vector<1x64x64xbf16>
    %274 = vector.shape_cast %273 : vector<1x64x64xbf16> to vector<64x64xbf16>
    %275 = arith.truncf %272 : vector<128x64xf32> to vector<128x64xbf16>
    %cst_122 = arith.constant dense<0.000000e+00> : vector<128x64xf32>
    %276 = tpu.matmul %275, %274, %cst_122 {dimension_numbers = #tpu.dot_dimension_numbers<[1], [0], [0], [1], [0, 0, 1, 1], [], []>} : vector<128x64xbf16>, vector<64x64xbf16>, vector<128x64xf32> -> vector<128x64xf32>
    %c14 = arith.constant 14 : index
    %c0_123 = arith.constant 0 : index
    %277 = vector.load %arg7[%c14, %c0_123] : memref<24x128xf32, #tpu.memory_space<vmem>>, vector<1x64xf32>
    %278 = vector.broadcast %277 : vector<1x64xf32> to vector<128x64xf32>
    %279 = arith.addf %276, %278 : vector<128x64xf32>
    %cst_124 = arith.constant 0.000000e+00 : f32
    %280 = vector.broadcast %cst_124 : f32 to vector<128x64xf32>
    %281 = arith.cmpf oge, %279, %280 : vector<128x64xf32>
    %cst_125 = arith.constant 2.000000e-01 : f32
    %282 = vector.broadcast %cst_125 : f32 to vector<128x64xf32>
    %283 = arith.mulf %282, %279 : vector<128x64xf32>
    %284 = arith.select %281, %279, %283 : vector<128x64xi1>, vector<128x64xf32>
    %c3_126 = arith.constant 3 : index
    %c128_127 = arith.constant 128 : index
    %c0_128 = arith.constant 0 : index
    %285 = vector.load %arg6[%c3_126, %c128_127, %c0_128] : memref<4x192x64xbf16, #tpu.memory_space<vmem>>, vector<1x64x64xbf16>
    %286 = vector.shape_cast %285 : vector<1x64x64xbf16> to vector<64x64xbf16>
    %287 = arith.truncf %284 : vector<128x64xf32> to vector<128x64xbf16>
    %cst_129 = arith.constant dense<0.000000e+00> : vector<128x64xf32>
    %288 = tpu.matmul %287, %286, %cst_129 {dimension_numbers = #tpu.dot_dimension_numbers<[1], [0], [0], [1], [0, 0, 1, 1], [], []>} : vector<128x64xbf16>, vector<64x64xbf16>, vector<128x64xf32> -> vector<128x64xf32>
    %c18 = arith.constant 18 : index
    %c0_130 = arith.constant 0 : index
    %289 = vector.load %arg7[%c18, %c0_130] : memref<24x128xf32, #tpu.memory_space<vmem>>, vector<1x64xf32>
    %290 = vector.broadcast %289 : vector<1x64xf32> to vector<128x64xf32>
    %291 = arith.addf %288, %290 : vector<128x64xf32>
    %292 = vector.extract_strided_slice %291 {offsets = [0, 0], sizes = [128, 8], strides = [1, 1]} : vector<128x64xf32> to vector<128x8xf32>
    %293 = math.tanh %292 : vector<128x8xf32>
    %294 = vector.broadcast %60 : vector<1x8xf32> to vector<128x8xf32>
    %295 = arith.mulf %293, %294 : vector<128x8xf32>
    %296 = vector.extract_strided_slice %291 {offsets = [0, 8], sizes = [128, 8], strides = [1, 1]} : vector<128x64xf32> to vector<128x8xf32>
    %297 = vector.broadcast %60 : vector<1x8xf32> to vector<128x8xf32>
    %298 = arith.mulf %296, %297 : vector<128x8xf32>
    %299 = math.exp %295 : vector<128x8xf32>
    %300 = arith.mulf %243, %299 : vector<128x8xf32>
    %301 = arith.addf %300, %298 : vector<128x8xf32>
    %302 = vector.broadcast %60 : vector<1x8xf32> to vector<128x8xf32>
    %303 = arith.mulf %302, %301 : vector<128x8xf32>
    %304 = arith.addf %246, %303 : vector<128x8xf32>
    %305 = arith.addf %244, %295 : vector<128x8xf32>
    %cst_131 = arith.constant dense<0.000000e+00> : vector<128xf32>
    %306 = vector.multi_reduction <add>, %305, %cst_131 [1] : vector<128x8xf32> to vector<128xf32>
    %307 = vector.shape_cast %306 : vector<128xf32> to vector<128x1xf32>
    %308 = vector.shape_cast %307 : vector<128x1xf32> to vector<128x1xf32>
    %309 = vector.broadcast %308 : vector<128x1xf32> to vector<128x120xf32>
    %310 = tpu.concatenate %304, %309 in 1 : vector<128x8xf32>, vector<128x120xf32> -> vector<128x128xf32>
    %c0_132 = arith.constant 0 : index
    %c0_133 = arith.constant 0 : index
    %311 = vector.load %arg8[%c0_132, %c0_133] : memref<128x128xf32, #tpu.memory_space<vmem>>, vector<128x128xf32>
    tpu.vector_store %arg8[%c0_132, %c0_133], %310 {strides = array<i32>} : memref<128x128xf32, #tpu.memory_space<vmem>>, vector<128x128xf32>,
    return
  }
  func.func @transform_0(%arg0: i32) -> (i32, i32) {
    %c0_i32 = arith.constant 0 : i32
    %c0_i32_0 = arith.constant 0 : i32
    return %arg0, %c0_i32 : i32, i32
  }
  func.func @transform_1(%arg0: i32) -> (i32, i32) {
    %c0_i32 = arith.constant 0 : i32
    %c0_i32_0 = arith.constant 0 : i32
    return %arg0, %c0_i32 : i32, i32
  }
  func.func @transform_2(%arg0: i32) -> (i32, i32) {
    %c0_i32 = arith.constant 0 : i32
    %c0_i32_0 = arith.constant 0 : i32
    %c0_i32_1 = arith.constant 0 : i32
    return %c0_i32, %c0_i32_0 : i32, i32
  }
  func.func @transform_3(%arg0: i32) -> (i32, i32) {
    %c0_i32 = arith.constant 0 : i32
    %c0_i32_0 = arith.constant 0 : i32
    %c0_i32_1 = arith.constant 0 : i32
    return %c0_i32, %c0_i32_0 : i32, i32
  }
  func.func @transform_4(%arg0: i32) -> (i32, i32, i32) {
    %c0_i32 = arith.constant 0 : i32
    %c0_i32_0 = arith.constant 0 : i32
    %c0_i32_1 = arith.constant 0 : i32
    %c0_i32_2 = arith.constant 0 : i32
    return %c0_i32, %c0_i32_0, %c0_i32_1 : i32, i32, i32
  }
  func.func @transform_5(%arg0: i32) -> (i32, i32, i32) {
    %c0_i32 = arith.constant 0 : i32
    %c0_i32_0 = arith.constant 0 : i32
    %c0_i32_1 = arith.constant 0 : i32
    %c0_i32_2 = arith.constant 0 : i32
    return %c0_i32, %c0_i32_0, %c0_i32_1 : i32, i32, i32
  }
  func.func @transform_6(%arg0: i32) -> (i32, i32) {
    %c0_i32 = arith.constant 0 : i32
    %c0_i32_0 = arith.constant 0 : i32
    %c0_i32_1 = arith.constant 0 : i32
    return %c0_i32, %c0_i32_0 : i32, i32
  }
  func.func @transform_7(%arg0: i32) -> (i32, i32) {
    %c0_i32 = arith.constant 0 : i32
    %c0_i32_0 = arith.constant 0 : i32
    return %arg0, %c0_i32 : i32, i32
  }
}

</mosaic_0001>

<bundles_post_ra>
// kernel: tpu_custom_call.1
= control target key start
LH: loop header
LB: loop body
LE: loop exit
PB: predicated region body
PF: predicated region fallthrough
CT: control target
= control target key end

     0   :  { %12 = vsyncpa [#allocation3], 0  ;;  %s9310_s0 = inlined_call_operand.vmem [shape: f32[256,8], index: 0, kind: input, shape index: {}]   ;;  %s9311_s1 = inlined_call_operand.vmem [shape: f32[256,16], index: 1, kind: input, shape index: {}]   ;;  %s9312_s2 = inlined_call_operand.vmem [shape: bf16[80,32], index: 2, kind: input, shape index: {}]   ;;  %s9313_s3 = inlined_call_operand.vmem [shape: bf16[32,512], index: 3, kind: input, shape index: {}]   ;;  %s9314_s4 = inlined_call_operand.vmem [shape: bf16[4,8,64], index: 4, kind: input, shape index: {}]   ;;  %s9315_s5 = inlined_call_operand.vmem [shape: bf16[4,192,64], index: 5, kind: input, shape index: {}]   ;;  %s9316_s6 = inlined_call_operand.vmem [shape: f32[24,128], index: 6, kind: input, shape index: {}]   ;;  %s9317_s7 = inlined_call_operand.hbm [shape: f32[256,128], index: 7, kind: output, shape index: {}]  }
   0x1   :  { %14 = vsyncpa [#allocation3 + $0x1], 0  ;;  %s7037_s24 = smov 0   ;;  %s7039_s25 = smov 0  }
   0x2   :  { %s7041_s26 = smov 0   ;;  %s7043_s27 = smov 0  }
   0x3 LB: > { %s7058_s28 = sadd.s32 4294967295, %s6989_s27   ;;  %s5576_s29 = sadd.s32 4294967294, %s6989_s27   ;;  %s6989_s27 = sphi %s7043_s27, %s9554_s27   ;;  %s6985_s26 = sphi %s7041_s26, %s9553_s26   ;;  %s6981_s25 = sphi %s7039_s25, %s9552_s25   ;;  %s6977_s24 = sphi %s7037_s24, %s9551_s24  }
   0x4   : > { %s7062_s30 = sadd.s32 1, %s6989_s27   ;;  %s184_s8 = sadd.s32 1, %s6985_s26 }
   0x5   : > { %s181_s9 = ssub.s32 %s6989_s27, %s7062_s30  ;;  %p194_p0 = scmp.ne.s32.totalorder %s6985_s26, %s6981_s25 }
   0x6   : > { %p182_p1 = scmp.eq.s32.totalorder %s181_s9, 0  ;;  %p195_p2 = scmp.eq.s32.totalorder %s7058_s28, 1 }
   0x7   : > { %p200_p3 = scmp.ne.s32.totalorder %s6981_s25, %s6977_s24  ;;  %p201_p4 = scmp.eq.s32.totalorder %s5576_s29, 1 }
   0x8   : > { %s7073_s10 = scalar_select %p182_p1, %s6985_s26, %s184_s8  }
   0x9   : > { %p7075_p5 = por %p195_p2, %p194_p0  ;;  %p7079_p6 = por %p201_p4, %p200_p3 }
   0xa   : > { %p5579_p7 = scmp.ge.s32.totalorder %s6989_s27, 1  ;;  %p252_p8 = scmp.lt.s32.totalorder %s6989_s27, 3 }
   0xc   : > { %p253_p9 = pnand %p5579_p7, %p252_p8 }
   0xe   : > { %256 = sbr.rel (%p253_p9) target bundleno = 4791 (0x12b7), region = 48 }
  0x13   : > { %v6592_v0 = vld [vmem:[%s9312_s2] sm:$0xff]   ;;  %s5581_s15 = sshll.u32 %s7058_s28, 4  ;;  %v6593_v1 = vld [vmem:[%s9312_s2 + $0x10] sm:$0xff]   ;;  %vm340_vm0 = vcmask 130048   ;;  %v6594_v26 = vld [vmem:[%s9312_s2 + $0x8] sm:$0xff]   ;;  %vm539_vm5 = vcmask 261120  }
  0x14   : > { %p290_p10 = scmp.lt.s32.totalorder %s5581_s15, 31  ;;  %6124 = vmatprep.subr.bf16.mxu0 %v6592_v0  ;;  %6542 = vmatprep.subr.bf16.mxu1 %v6592_v0  ;;  %v6595_v27 = vld [vmem:[%s9312_s2 + $0x20] sm:$0xff]   ;;  %s6993_s19 = smov 8  }
  0x15   : > { %6125 = vmatpush3.bf16.msra.mxu0 %v6592_v0  ;;  %6543 = vmatpush3.bf16.msra.mxu1 %v6592_v0  ;;  %v7117_v28 = vld [vmem:[%s9316_s6] ss:$0 sm:$0xff]  ;;  %s6994_s9 = smov 120   ;;  %s6995_s13 = smov [#allocation2]  }
  0x16   : > { %s9556_s15 = smov (!%p290_p10, %s5581_s15), 31  ;;  %6142 = vmatprep.subr.bf16.mxu1 %v6593_v1  ;;  %6162 = vmatprep.subr.bf16.mxu0 %v6595_v27  ;;  %s6933_s14 = sshll.u32 %s6995_s13, 4  ;;  %s6934_s14 = int_to_ptr.vmem [resolvable:$false] %s6933_s14 }
  0x17   : > { %s5582_s18 = sshll.u32 %s9556_s15, 3  ;;  %s6935_s16 = scalar_lea.vmem %s6934_s14, 4096 }
  0x18   : > { %s299_s21 = scalar_lea.vmem %s9311_s1, %s5582_s18  ;;  %s7260_s17 = scalar_lea.vmem %s9310_s0, %s5582_s18 }
  0x19   : > { %v303_v2 = vld [vmem:[%s299_s21] sm:$0xff]  ;;  %v304_v3 = vld [vmem:[%s299_s21 + $0x8] sm:$0xff]  ;;  %v305_v4 = vld [vmem:[%s299_s21 + $0x10] sm:$0xff] }
  0x1a   : > { %v321_v5 = vpack.c.bf16 %v304_v3, %v303_v2  ;;  %v306_v6 = vld [vmem:[%s299_s21 + $0x18] sm:$0xff]  ;;  %v307_v7 = vld [vmem:[%s299_s21 + $0x20] sm:$0xff]  ;;  %v308_v8 = vld [vmem:[%s299_s21 + $0x28] sm:$0xff] }
  0x1b   : > { %v322_v9 = vpack.c.bf16 %v306_v6, %v305_v4  ;;  %v323_v10 = vpack.c.bf16 %v308_v8, %v307_v7  ;;  %v311_v11 = vld [vmem:[%s299_s21 + $0x40] sm:$0xff]  ;;  %v312_v12 = vld [vmem:[%s299_s21 + $0x48] sm:$0xff]  ;;  %v313_v13 = vld [vmem:[%s299_s21 + $0x50] sm:$0xff] }
  0x1c   : > { %6126 = vmatprep.mubr.msk.bf16.mxu0 %vm340_vm0, %v321_v5  ;;  %v314_v14 = vld [vmem:[%s299_s21 + $0x58] sm:$0xff]  ;;  %v309_v15 = vld [vmem:[%s299_s21 + $0x30] sm:$0xff]  ;;  %v325_v16 = vpack.c.bf16 %v312_v12, %v311_v11  ;;  %v315_v18 = vld [vmem:[%s299_s21 + $0x60] sm:$0xff] }
  0x1d   : > { %6127 = vmatmul.mubr.msk.bf16.vlgmr.msra.gmra.mxu0 %vm340_vm0, %v322_v9  ;;  %v326_v17 = vpack.c.bf16 %v314_v14, %v313_v13  ;;  %v316_v19 = vld [vmem:[%s299_s21 + $0x68] sm:$0xff]  ;;  %v310_v20 = vld [vmem:[%s299_s21 + $0x38] sm:$0xff]  ;;  %v317_v22 = vld [vmem:[%s299_s21 + $0x70] sm:$0xff] }
  0x1e   : > { %6130 = vmatprep.mubr.msk.bf16.mxu0 %vm340_vm0, %v323_v10  ;;  %v327_v21 = vpack.c.bf16 %v316_v19, %v315_v18  ;;  %6134 = vmatprep.mubr.msk.bf16.mxu1 %vm340_vm0, %v325_v16  ;;  %v318_v23 = vld [vmem:[%s299_s21 + $0x78] sm:$0xff]  ;;  %v324_v24 = vpack.c.bf16 %v310_v20, %v309_v15 }
  0x1f   : > { %6135 = vmatmul.mubr.msk.bf16.vlgmr.msra.gmra.mxu1 %vm340_vm0, %v326_v17  ;;  %v328_v25 = vpack.c.bf16 %v318_v23, %v317_v22  ;;  %6163 = vmatpush3.bf16.msra.mxu0 %v6595_v27 }
  0x20   : > { %6138 = vmatprep.mubr.msk.bf16.mxu1 %vm340_vm0, %v327_v21  ;;  %6143 = vmatpush3.bf16.msra.mxu1 %v6593_v1 }
  0x21   : > { %6144 = vmatprep.subr.bf16.mxu1 %v6594_v26 }
  0x24   : > { %6145 = vmatpush3.bf16.msra.mxu1 %v6594_v26 }
  0x25   : > { %6131 = vmatmul.mubr.msk.bf16.gmra.mxu0 %vm340_vm0, %v324_v24 }
  0x27   : > { %6139 = vmatmul.mubr.msk.bf16.gmra.mxu1 %vm340_vm0, %v328_v25 }
  0xdd   : > { %v6128_v29 = vpop.f32.mrf.mxu0 }
  0xde   : > { %v408_v30 = vadd.f32 %v6128_v29, %v7117_v28 }
  0xdf   : > { %v399_v31 = vpop.f32.mrf.mxu0  ;;  %v6136_v33 = vpop.f32.mrf.mxu1 }
  0xe0   : > { %v400_v32 = vadd.f32 %v7117_v28, %v399_v31  ;;  %vm464_vm1 = vcmp.ge.f32.partialorder %v408_v30, 0.0  ;;  %v480_v37 = vmul.f32 0.2, %v408_v30  ;;  %v440_v1 = vadd.f32 %v6136_v33, %v7117_v28 }
  0xe1   : > { %v6129_v34 = vpop.f32.mrf.mxu0  ;;  %v431_v36 = vpop.f32.mrf.mxu1 }
  0xe2   : > { %v411_v35 = vadd.f32 %v6129_v34, %v7117_v28  ;;  %vm462_vm2 = vcmp.ge.f32.partialorder %v400_v32, 0.0  ;;  %v478_v38 = vmul.f32 0.2, %v400_v32  ;;  %v432_v42 = vadd.f32 %v7117_v28, %v431_v36 }
  0xe3   : > { %v402_v39 = vpop.f32.mrf.mxu0  ;;  %v6137_v43 = vpop.f32.mrf.mxu1  ;;  %v496_v49 = vsel %vm464_vm1, %v408_v30, %v480_v37  ;;  %v488_v19 = vmul.f32 0.2, %v440_v1  ;;  %vm472_vm12 = vcmp.ge.f32.partialorder %v440_v1, 0.0 }
  0xe4   : > { %vm465_vm3 = vcmp.ge.f32.partialorder %v411_v35, 0.0  ;;  %v481_v40 = vmul.f32 0.2, %v411_v35  ;;  %v403_v41 = vadd.f32 %v7117_v28, %v402_v39  ;;  %v494_v50 = vsel %vm462_vm2, %v400_v32, %v478_v38  ;;  %v6597_v38 = vld [vmem:[%s9313_s3 + $0x20] ss:$16 sps:$4 sm:$0xff]  }
  0xe5   : > { %v6132_v44 = vpop.f32.mrf.mxu0  ;;  %v434_v48 = vpop.f32.mrf.mxu1  ;;  %vm470_vm6 = vcmp.ge.f32.partialorder %v432_v42, 0.0  ;;  %v486_v54 = vmul.f32 0.2, %v432_v42  ;;  %v443_v5 = vadd.f32 %v6137_v43, %v7117_v28  ;;  %v504_v24 = vsel %vm472_vm12, %v440_v1, %v488_v19  ;;  %v6599_v39 = vld [vmem:[%s9313_s3 + $0x24] ss:$16 sps:$4 sm:$0xff]  }
  0xe6   : > { %v497_v45 = vsel %vm465_vm3, %v411_v35, %v481_v40  ;;  %vm463_vm4 = vcmp.ge.f32.partialorder %v403_v41, 0.0  ;;  %v479_v46 = vmul.f32 0.2, %v403_v41  ;;  %v424_v47 = vadd.f32 %v6132_v44, %v7117_v28  ;;  %v6602_v40 = vld [vmem:[%s9313_s3 + $0x4] ss:$16 sps:$4 sm:$0xff]   ;;  %999 = vmatprep.subr.bf16.mxu1 %v6599_v39 }
  0xe7   : > { %v415_v51 = vpop.f32.mrf.mxu0  ;;  %v6140_v55 = vpop.f32.mrf.mxu1  ;;  %v515_v56 = vpack.c.bf16 %v497_v45, %v496_v49  ;;  %v435_v60 = vadd.f32 %v7117_v28, %v434_v48  ;;  %v502_v9 = vsel %vm470_vm6, %v432_v42, %v486_v54  ;;  %v489_v20 = vmul.f32 0.2, %v443_v5  ;;  %v7165_v43 = vld [vmem:[%s9316_s6 + $0x1] ss:$0 sm:$0xff] }
  0xe8   : > { %v495_v52 = vsel %vm463_vm4, %v403_v41, %v479_v46  ;;  %v416_v53 = vadd.f32 %v7117_v28, %v415_v51  ;;  %v484_v58 = vmul.f32 0.2, %v424_v47  ;;  %vm468_vm7 = vcmp.ge.f32.partialorder %v424_v47, 0.0  ;;  %v6600_v41 = vld [vmem:[%s9313_s3] ss:$16 sps:$4 sm:$0xff]  }
  0xe9   : > { %v514_v57 = vpack.c.bf16 %v495_v52, %v494_v50  ;;  %v6133_v59 = vpop.f32.mrf.mxu0  ;;  %v447_v63 = vpop.f32.mrf.mxu1  ;;  %vm471_vm9 = vcmp.ge.f32.partialorder %v435_v60, 0.0  ;;  %v487_v2 = vmul.f32 0.2, %v435_v60  ;;  %vm473_vm13 = vcmp.ge.f32.partialorder %v443_v5, 0.0 }
  0xea   : > { %vm466_vm8 = vcmp.ge.f32.partialorder %v416_v53, 0.0  ;;  %v482_v61 = vmul.f32 0.2, %v416_v53  ;;  %v427_v62 = vadd.f32 %v6133_v59, %v7117_v28  ;;  %v500_v7 = vsel %vm468_vm7, %v424_v47, %v484_v58 }
  0xeb   : > { %v418_v0 = vpop.f32.mrf.mxu0  ;;  %6146 = vmatprep.mubr.msk.bf16.mxu1 %vm539_vm5, %v514_v57  ;;  %v6141_v6 = vpop.f32.mrf.mxu1  ;;  %v503_v10 = vsel %vm471_vm9, %v435_v60, %v487_v2  ;;  %v448_v13 = vadd.f32 %v7117_v28, %v447_v63  ;;  %v505_v25 = vsel %vm473_vm13, %v443_v5, %v489_v20  ;;  %v456_v26 = vadd.f32 %v6140_v55, %v7117_v28 }
  0xec   : > { %vm469_vm10 = vcmp.ge.f32.partialorder %v427_v62, 0.0  ;;  %v485_v3 = vmul.f32 0.2, %v427_v62  ;;  %v419_v4 = vadd.f32 %v7117_v28, %v418_v0  ;;  %6147 = vmatmul.mubr.msk.bf16.vlgmr.msra.gmra.mxu1 %vm539_vm5, %v515_v56  ;;  %v498_v8 = vsel %vm466_vm8, %v416_v53, %v482_v61 }
  0xed   : > { %v450_v14 = vpop.f32.mrf.mxu1  ;;  %v518_v21 = vpack.c.bf16 %v503_v10, %v502_v9  ;;  %v490_v22 = vmul.f32 0.2, %v448_v13  ;;  %vm474_vm14 = vcmp.ge.f32.partialorder %v448_v13, 0.0  ;;  %v459_v27 = vadd.f32 %v6141_v6, %v7117_v28  ;;  %1000 = vmatpush1.bf16.msra.mxu1 %v6597_v38 }
  0xee   : > { %v501_v11 = vsel %vm469_vm10, %v427_v62, %v485_v3  ;;  %vm467_vm11 = vcmp.ge.f32.partialorder %v419_v4, 0.0  ;;  %v483_v12 = vmul.f32 0.2, %v419_v4  ;;  %v451_v17 = vadd.f32 %v7117_v28, %v450_v14  ;;  %v6596_v28 = vld [vmem:[%s9312_s2 + $0x18] sm:$0xff]   ;;  %1001 = vmatprep.subr.bf16.mxu1 %v6602_v40 }
  0xef   : > { %v517_v15 = vpack.c.bf16 %v501_v11, %v500_v7  ;;  %v506_v29 = vsel %vm474_vm14, %v448_v13, %v490_v22  ;;  %v519_v31 = vpack.c.bf16 %v505_v25, %v504_v24  ;;  %v492_v32 = vmul.f32 0.2, %v456_v26  ;;  %6164 = vmatprep.subr.bf16.mxu0 %v6596_v28 }
  0xf0   : > { %v499_v16 = vsel %vm467_vm11, %v419_v4, %v483_v12  ;;  %v491_v23 = vmul.f32 0.2, %v451_v17  ;;  %vm475_vm15 = vcmp.ge.f32.partialorder %v451_v17, 0.0  ;;  %v493_v33 = vmul.f32 0.2, %v459_v27  ;;  %6165 = vmatpush3.bf16.msra.mxu0 %v6596_v28 }
  0xf1   : > { %v516_v18 = vpack.c.bf16 %v499_v16, %v498_v8  ;;  %vm476_vm0 = vcmp.ge.f32.partialorder %v456_v26, 0.0  ;;  %vm477_vm1 = vcmp.ge.f32.partialorder %v459_v27, 0.0  ;;  %1002 = vmatpush1.bf16.msra.mxu1 %v6600_v41 }
  0xf2   : > { %v507_v30 = vsel %vm475_vm15, %v451_v17, %v491_v23  ;;  %v508_v35 = vsel %vm476_vm0, %v456_v26, %v492_v32  ;;  %v509_v36 = vsel %vm477_vm1, %v459_v27, %v493_v33 }
  0xf3   : > { %6150 = vmatprep.mubr.msk.bf16.mxu1 %vm539_vm5, %v516_v18  ;;  %v520_v34 = vpack.c.bf16 %v507_v30, %v506_v29  ;;  %v521_v37 = vpack.c.bf16 %v509_v36, %v508_v35 }
  0xf4   : > { %6151 = vmatmul.mubr.msk.bf16.gmra.mxu1 %vm539_vm5, %v517_v15 }
  0xf5   : > { %6154 = vmatprep.mubr.msk.bf16.mxu1 %vm539_vm5, %v518_v21 }
  0xfc   : > { %6155 = vmatmul.mubr.msk.bf16.gmra.mxu1 %vm539_vm5, %v519_v31 }
  0xfd   : > { %6158 = vmatprep.mubr.msk.bf16.mxu1 %vm539_vm5, %v520_v34 }
 0x104   : > { %6159 = vmatmul.mubr.msk.bf16.gmra.mxu1 %vm539_vm5, %v521_v37 }
 0x1ac   : > { %v6148_v42 = vpop.f32.mrf.mxu1 }
 0x1ad   : > { %v607_v46 = vadd.f32 %v6148_v42, %v7165_v43 }
 0x1ae   : > { %v598_v44 = vpop.f32.mrf.mxu1 }
 0x1af   : > { %v599_v45 = vadd.f32 %v7165_v43, %v598_v44  ;;  %v679_v53 = vmul.f32 0.2, %v607_v46  ;;  %vm663_vm4 = vcmp.ge.f32.partialorder %v607_v46, 0.0 }
 0x1b0   : > { %v6149_v47 = vpop.f32.mrf.mxu1 }
 0x1b1   : > { %v610_v48 = vadd.f32 %v6149_v47, %v7165_v43  ;;  %v677_v50 = vmul.f32 0.2, %v599_v45  ;;  %vm661_vm3 = vcmp.ge.f32.partialorder %v599_v45, 0.0  ;;  %v695_v61 = vsel %vm663_vm4, %v607_v46, %v679_v53  ;;  %v6608_v53 = vld [vmem:[%s9313_s3 + $0xc] ss:$16 sps:$4 sm:$0xff]  }
 0x1b2   : > { %v601_v49 = vpop.f32.mrf.mxu1 }
 0x1b3   : > { %vm664_vm2 = vcmp.ge.f32.partialorder %v610_v48, 0.0  ;;  %v680_v51 = vmul.f32 0.2, %v610_v48  ;;  %v602_v52 = vadd.f32 %v7165_v43, %v601_v49  ;;  %v693_v58 = vsel %vm661_vm3, %v599_v45, %v677_v50 }
 0x1b4   : > { %v6152_v54 = vpop.f32.mrf.mxu1  ;;  %vm1297_vm3 = vcmask 1043456  }
 0x1b5   : > { %vm662_vm6 = vcmp.ge.f32.partialorder %v602_v52, 0.0  ;;  %v678_v55 = vmul.f32 0.2, %v602_v52  ;;  %v696_v56 = vsel %vm664_vm2, %v610_v48, %v680_v51  ;;  %v623_v63 = vadd.f32 %v6152_v54, %v7165_v43  ;;  %v6606_v54 = vld [vmem:[%s9313_s3 + $0x8] ss:$16 sps:$4 sm:$0xff]  }
 0x1b6   : > { %v614_v57 = vpop.f32.mrf.mxu1  ;;  %v714_v1 = vpack.c.bf16 %v696_v56, %v695_v61  ;;  %v1263_v56 = vld [vmem:[%s9314_s4] sm:$0xf] }
 0x1b7   : > { %v694_v59 = vsel %vm662_vm6, %v602_v52, %v678_v55  ;;  %v615_v60 = vadd.f32 %v7165_v43, %v614_v57  ;;  %v683_v7 = vmul.f32 0.2, %v623_v63  ;;  %vm667_vm9 = vcmp.ge.f32.partialorder %v623_v63, 0.0  ;;  %v6605_v52 = vld [vmem:[%s9313_s3 + $0x2c] ss:$16 sps:$4 sm:$0xff]   ;;  %6544 = vmatprep.subr.msk.bf16.mxu1 %vm1297_vm3, %v1263_v56 }
 0x1b8   : > { %v713_v62 = vpack.c.bf16 %v694_v59, %v693_v58  ;;  %v6153_v0 = vpop.f32.mrf.mxu1  ;;  %1112 = vmatprep.subr.bf16.mxu0 %v6605_v52  ;;  %v6991_v55 = vmov 0   ;;  %v7212_v58 = vld [vmem:[%s9316_s6 + $0x2] ss:$0 sm:$0xff] }
 0x1b9   : > { %v626_v2 = vadd.f32 %v6153_v0, %v7165_v43  ;;  %v681_v4 = vmul.f32 0.2, %v615_v60  ;;  %vm665_vm8 = vcmp.ge.f32.partialorder %v615_v60, 0.0  ;;  %v699_v16 = vsel %vm667_vm9, %v623_v63, %v683_v7  ;;  %1019 = vmatprep.mubr.bf16.mxu1 %v6991_v55 }
 0x1ba   : > { %v617_v3 = vpop.f32.mrf.mxu1  ;;  %6166 = vmatprep.mubr.msk.bf16.mxu0 %vm539_vm5, %v713_v62 }
 0x1bb   : > { %vm668_vm7 = vcmp.ge.f32.partialorder %v626_v2, 0.0  ;;  %v684_v5 = vmul.f32 0.2, %v626_v2  ;;  %v618_v6 = vadd.f32 %v7165_v43, %v617_v3  ;;  %6167 = vmatmul.mubr.msk.bf16.vlgmr.msra.gmra.mxu0 %vm539_vm5, %v714_v1  ;;  %v697_v13 = vsel %vm665_vm8, %v615_v60, %v681_v4 }
 0x1bc   : > { %v6156_v8 = vpop.f32.mrf.mxu1 }
 0x1bd   : > { %vm666_vm10 = vcmp.ge.f32.partialorder %v618_v6, 0.0  ;;  %v682_v9 = vmul.f32 0.2, %v618_v6  ;;  %v700_v10 = vsel %vm668_vm7, %v626_v2, %v684_v5  ;;  %v639_v11 = vadd.f32 %v6156_v8, %v7165_v43 }
 0x1be   : > { %v630_v12 = vpop.f32.mrf.mxu1  ;;  %v716_v19 = vpack.c.bf16 %v700_v10, %v699_v16  ;;  %v1299_v10 = vsel %vm1297_vm3, %v1263_v56, 0 }
 0x1bf   : > { %v698_v14 = vsel %vm666_vm10, %v618_v6, %v682_v9  ;;  %v631_v15 = vadd.f32 %v7165_v43, %v630_v12  ;;  %v687_v22 = vmul.f32 0.2, %v639_v11  ;;  %vm671_vm12 = vcmp.ge.f32.partialorder %v639_v11, 0.0 }
 0x1c0   : > { %v715_v17 = vpack.c.bf16 %v698_v14, %v697_v13  ;;  %v6157_v18 = vpop.f32.mrf.mxu1 }
 0x1c1   : > { %v685_v20 = vmul.f32 0.2, %v631_v15  ;;  %v642_v21 = vadd.f32 %v6157_v18, %v7165_v43  ;;  %vm669_vm11 = vcmp.ge.f32.partialorder %v631_v15, 0.0  ;;  %v703_v31 = vsel %vm671_vm12, %v639_v11, %v687_v22 }
 0x1c2   : > { %v633_v23 = vpop.f32.mrf.mxu1  ;;  %6170 = vmatprep.mubr.msk.bf16.mxu0 %vm539_vm5, %v715_v17 }
 0x1c3   : > { %vm672_vm13 = vcmp.ge.f32.partialorder %v642_v21, 0.0  ;;  %v688_v24 = vmul.f32 0.2, %v642_v21  ;;  %v634_v25 = vadd.f32 %v7165_v43, %v633_v23  ;;  %6171 = vmatmul.mubr.msk.bf16.gmra.mxu0 %vm539_vm5, %v716_v19  ;;  %v701_v27 = vsel %vm669_vm11, %v631_v15, %v685_v20 }
 0x1c4   : > { %v6160_v26 = vpop.f32.mrf.mxu1 }
 0x1c5   : > { %vm670_vm14 = vcmp.ge.f32.partialorder %v634_v25, 0.0  ;;  %v686_v29 = vmul.f32 0.2, %v634_v25  ;;  %v655_v30 = vadd.f32 %v6160_v26, %v7165_v43  ;;  %v704_v32 = vsel %vm672_vm13, %v642_v21, %v688_v24 }
 0x1c6   : > { %v646_v33 = vpop.f32.mrf.mxu1  ;;  %v718_v38 = vpack.c.bf16 %v704_v32, %v703_v31 }
 0x1c7   : > { %v702_v34 = vsel %vm670_vm14, %v634_v25, %v686_v29  ;;  %v647_v35 = vadd.f32 %v7165_v43, %v646_v33  ;;  %v691_v37 = vmul.f32 0.2, %v655_v30  ;;  %vm675_vm15 = vcmp.ge.f32.partialorder %v655_v30, 0.0 }
 0x1c8   : > { %v717_v36 = vpack.c.bf16 %v702_v34, %v701_v27  ;;  %v6161_v28 = vpop.f32.mrf.mxu1 }
 0x1c9   : > { %v689_v39 = vmul.f32 0.2, %v647_v35  ;;  %v658_v40 = vadd.f32 %v6161_v28, %v7165_v43  ;;  %vm673_vm0 = vcmp.ge.f32.partialorder %v647_v35, 0.0  ;;  %v707_v45 = vsel %vm675_vm15, %v655_v30, %v691_v37 }
 0x1ca   : > { %v649_v41 = vpop.f32.mrf.mxu1  ;;  %6174 = vmatprep.mubr.msk.bf16.mxu0 %vm539_vm5, %v717_v36 }
 0x1cb   : > { %vm676_vm1 = vcmp.ge.f32.partialorder %v658_v40, 0.0  ;;  %v692_v42 = vmul.f32 0.2, %v658_v40  ;;  %v650_v44 = vadd.f32 %v7165_v43, %v649_v41  ;;  %6175 = vmatmul.mubr.msk.bf16.gmra.mxu0 %vm539_vm5, %v718_v38  ;;  %v705_v46 = vsel %vm673_vm0, %v647_v35, %v689_v39  ;;  %v6603_v43 = vld [vmem:[%s9313_s3 + $0x28] ss:$16 sps:$4 sm:$0xff]  }
 0x1cc   : > { %1113 = vmatpush1.bf16.msra.mxu0 %v6603_v43 }
 0x1cd   : > { %v708_v47 = vsel %vm676_vm1, %v658_v40, %v692_v42  ;;  %vm674_vm2 = vcmp.ge.f32.partialorder %v650_v44, 0.0  ;;  %v690_v48 = vmul.f32 0.2, %v650_v44  ;;  %1114 = vmatprep.subr.bf16.mxu0 %v6608_v53 }
 0x1ce   : > { %v720_v49 = vpack.c.bf16 %v708_v47, %v707_v45 }
 0x1cf   : > { %v706_v50 = vsel %vm674_vm2, %v650_v44, %v690_v48  ;;  %v1229_v44 = vlaneseq }
 0x1d0   : > { %v719_v51 = vpack.c.bf16 %v706_v50, %v705_v46  ;;  %1115 = vmatpush1.bf16.msra.mxu0 %v6606_v54 }
 0x1d1   : > { %v1230_v50 = vand.u32 127, %v1229_v44 }
 0x1d2   : > { %6178 = vmatprep.mubr.msk.bf16.mxu0 %vm539_vm5, %v719_v51 }
 0x1d3   : > { %6179 = vmatmul.mubr.msk.bf16.gmra.mxu0 %vm539_vm5, %v720_v49  ;;  %v1235_v54 = vand.u32 1, %v1230_v50 }
 0x1d4   : > { %1132 = vmatprep.mubr.bf16.mxu0 %v6991_v55 }
 0x1d5   : > { %vm1243_vm1 = vcmp.eq.s32.totalorder %v1235_v54, 0  ;;  %v6614_v54 = vld [vmem:[%s9315_s5 + $0x30] sm:$0xff]  }
 0x27b   : > { %v6168_v57 = vpop.f32.mrf.mxu0 }
 0x27c   : > { %v805_v5 = vadd.f32 %v6168_v57, %v7212_v58 }
 0x27d   : > { %v796_v59 = vpop.f32.mrf.mxu0 }
 0x27e   : > { %v797_v60 = vadd.f32 %v7212_v58, %v796_v59  ;;  %v877_v13 = vmul.f32 0.2, %v805_v5  ;;  %vm861_vm8 = vcmp.ge.f32.partialorder %v805_v5, 0.0 }
 0x27f   : > { %v6169_v61 = vpop.f32.mrf.mxu0 }
 0x280   : > { %v875_v63 = vmul.f32 0.2, %v797_v60  ;;  %vm859_vm4 = vcmp.ge.f32.partialorder %v797_v60, 0.0  ;;  %v808_v2 = vadd.f32 %v6169_v61, %v7212_v58  ;;  %v893_v17 = vsel %vm861_vm8, %v805_v5, %v877_v13 }
 0x281   : > { %v799_v62 = vpop.f32.mrf.mxu0  ;;  %vm1272_vm8 = vcmask 64512  }
 0x282   : > { %v800_v0 = vadd.f32 %v7212_v58, %v799_v62  ;;  %v891_v6 = vsel %vm859_vm4, %v797_v60, %v875_v63  ;;  %v878_v11 = vmul.f32 0.2, %v808_v2  ;;  %vm862_vm7 = vcmp.ge.f32.partialorder %v808_v2, 0.0 }
 0x283   : > { %v6172_v1 = vpop.f32.mrf.mxu0  ;;  %v6992_v62 = vmov 0.0  }
 0x284   : > { %vm860_vm6 = vcmp.ge.f32.partialorder %v800_v0, 0.0  ;;  %v876_v3 = vmul.f32 0.2, %v800_v0  ;;  %v894_v14 = vsel %vm862_vm7, %v808_v2, %v878_v11  ;;  %v821_v26 = vadd.f32 %v6172_v1, %v7212_v58 }
 0x285   : > { %v812_v4 = vpop.f32.mrf.mxu0  ;;  %v916_v19 = vpack.c.bf16 %v894_v14, %v893_v17  ;;  %v7253_v63 = vsel %vm1243_vm1, 1.0, %v6992_v62  ;;  %v1215_v14 = vld [vmem:[%s7260_s17 + $0x10] sm:$0xff]  ;;  %v1218_v17 = vld [vmem:[%s7260_s17 + $0x28] sm:$0xff] }
 0x286   : > { %v892_v7 = vsel %vm860_vm6, %v800_v0, %v876_v3  ;;  %v813_v18 = vadd.f32 %v7212_v58, %v812_v4  ;;  %v881_v32 = vmul.f32 0.2, %v821_v26  ;;  %vm865_vm12 = vcmp.ge.f32.partialorder %v821_v26, 0.0  ;;  %9373 = vst [vmem:[#allocation5_spill] sm:$0xff] %v7253_v63  ;;  %2095 = vrot.lane.b32.xlu0 %v7253_v63, %s6993_s19 }
 0x287   : > { %v915_v8 = vpack.c.bf16 %v892_v7, %v891_v6  ;;  %v6173_v9 = vpop.f32.mrf.mxu0  ;;  %v7265_v4 = vsub.f32 1.0, %v7253_v63  ;;  %v1213_v6 = vld [vmem:[%s7260_s17] sm:$0xff]  ;;  %v1214_v7 = vld [vmem:[%s7260_s17 + $0x8] sm:$0xff] }
 0x288   : > { %v879_v22 = vmul.f32 0.2, %v813_v18  ;;  %vm863_vm10 = vcmp.ge.f32.partialorder %v813_v18, 0.0  ;;  %v824_v23 = vadd.f32 %v6173_v9, %v7212_v58  ;;  %v897_v36 = vsel %vm865_vm12, %v821_v26, %v881_v32  ;;  %v1221_v26 = vld [vmem:[%s7260_s17 + $0x40] sm:$0xff] }
 0x289   : > { %v815_v12 = vpop.f32.mrf.mxu0  ;;  %5625 = vmatmul.mubr.msk.bf16.vlgmr.msra.gmra.mxu1 %vm539_vm5, %v915_v8  ;;  %5633 = vmatmul.mubr.msk.bf16.vlgmr.msra.gmra.mxu0 %vm539_vm5, %v915_v8  ;;  %9374 = vst [vmem:[#allocation6_spill] sm:$0xff] %v7265_v4  ;;  %vm1512_vm12 = vcmask 523264  }
 0x28a   : > { %6183 = vmatpush3.bf16.msra.mxu1 %v1299_v10  ;;  %1029 = vmatprep.mubr.bf16.mxu1 %v6991_v55  ;;  %v816_v15 = vadd.f32 %v7212_v58, %v815_v12  ;;  %v895_v27 = vsel %vm863_vm10, %v813_v18, %v879_v22  ;;  %v882_v30 = vmul.f32 0.2, %v824_v23  ;;  %vm866_vm11 = vcmp.ge.f32.partialorder %v824_v23, 0.0 }
 0x28b   : > { %1142 = vmatprep.mubr.bf16.mxu0 %v6991_v55  ;;  %v6176_v16 = vpop.f32.mrf.mxu0  ;;  %v7277_v10 = vmul.f32 %v7265_v4, %v1214_v7  ;;  %v7288_v18 = vmul.f32 %v7265_v4, %v1215_v14 }
 0x28c   : > { %v880_v20 = vmul.f32 0.2, %v816_v15  ;;  %vm864_vm9 = vcmp.ge.f32.partialorder %v816_v15, 0.0  ;;  %v898_v33 = vsel %vm866_vm11, %v824_v23, %v882_v30  ;;  %v837_v46 = vadd.f32 %v6176_v16, %v7212_v58 }
 0x28d   : > { %v828_v21 = vpop.f32.mrf.mxu0  ;;  %v918_v28 = vpack.c.bf16 %v898_v33, %v897_v36  ;;  %v1224_v36 = vld [vmem:[%s7260_s17 + $0x58] sm:$0xff] }
 0x28e   : > { %v896_v24 = vsel %vm864_vm9, %v816_v15, %v880_v20  ;;  %v829_v37 = vadd.f32 %v7212_v58, %v828_v21  ;;  %v885_v52 = vmul.f32 0.2, %v837_v46  ;;  %vm869_vm0 = vcmp.ge.f32.partialorder %v837_v46, 0.0  ;;  %v1216_v15 = vld [vmem:[%s7260_s17 + $0x18] sm:$0xff] }
 0x28f   : > { %v6177_v25 = vpop.f32.mrf.mxu0  ;;  %v917_v29 = vpack.c.bf16 %v896_v24, %v895_v27  ;;  %v7298_v21 = vmul.f32 %v7265_v4, %v1218_v17  ;;  %v1219_v24 = vld [vmem:[%s7260_s17 + $0x30] sm:$0xff]  ;;  %v1222_v27 = vld [vmem:[%s7260_s17 + $0x48] sm:$0xff] }
 0x290   : > { %v883_v40 = vmul.f32 0.2, %v829_v37  ;;  %vm867_vm14 = vcmp.ge.f32.partialorder %v829_v37, 0.0  ;;  %v840_v41 = vadd.f32 %v6177_v25, %v7212_v58  ;;  %v901_v56 = vsel %vm869_vm0, %v837_v46, %v885_v52  ;;  %v1220_v25 = vld [vmem:[%s7260_s17 + $0x38] sm:$0xff]  ;;  %v6611_v52 = vld [vmem:[%s9315_s5 + $0x8] sm:$0xff]  }
 0x291   : > { %5626 = vmatmul.mubr.msk.bf16.gmra.mxu1 %vm539_vm5, %v916_v19  ;;  %5634 = vmatmul.mubr.msk.bf16.gmra.mxu0 %vm539_vm5, %v916_v19  ;;  %v831_v31 = vpop.f32.mrf.mxu0  ;;  %v7291_v19 = vmul.f32 %v7265_v4, %v1216_v15  ;;  %v7313_v30 = vmul.f32 %v7265_v4, %v1220_v25  ;;  %v7320_v32 = vmul.f32 %v7265_v4, %v1222_v27  ;;  %v1228_v46 = vld [vmem:[%s7260_s17 + $0x78] sm:$0xff] }
 0x292   : > { %1039 = vmatprep.mubr.bf16.mxu1 %v6991_v55  ;;  %1152 = vmatprep.mubr.bf16.mxu0 %v6991_v55  ;;  %v832_v34 = vadd.f32 %v7212_v58, %v831_v31  ;;  %v899_v47 = vsel %vm867_vm14, %v829_v37, %v883_v40  ;;  %v886_v49 = vmul.f32 0.2, %v840_v41  ;;  %vm870_vm15 = vcmp.ge.f32.partialorder %v840_v41, 0.0  ;;  %v1225_v37 = vld [vmem:[%s7260_s17 + $0x60] sm:$0xff] }
 0x293   : > { %v6180_v35 = vpop.f32.mrf.mxu0  ;;  %v1265_v22 = vpack.c.bf16 %v7291_v19, %v7288_v18  ;;  %v7317_v31 = vmul.f32 %v7265_v4, %v1221_v26  ;;  %v7339_v40 = vmul.f32 %v7265_v4, %v1225_v37 }
 0x294   : > { %v884_v38 = vmul.f32 0.2, %v832_v34  ;;  %vm868_vm13 = vcmp.ge.f32.partialorder %v832_v34, 0.0  ;;  %v902_v43 = vsel %vm870_vm15, %v840_v41, %v886_v49  ;;  %v853_v0 = vadd.f32 %v6180_v35, %v7212_v58  ;;  %v1223_v35 = vld [vmem:[%s7260_s17 + $0x50] sm:$0xff]  ;;  %v6609_v49 = vld [vmem:[%s9315_s5 + $0x18] sm:$0xff]  }
 0x295   : > { %v844_v39 = vpop.f32.mrf.mxu0  ;;  %v920_v59 = vpack.c.bf16 %v902_v43, %v901_v56  ;;  %6200 = vmatprep.subr.bf16.mxu0 %v6609_v49  ;;  %v6612_v43 = vld [vmem:[%s9315_s5] sm:$0xff]   ;;  %v6615_v56 = vld [vmem:[%s9315_s5 + $0x28] sm:$0xff]  }
 0x296   : > { %v900_v42 = vsel %vm868_vm13, %v832_v34, %v884_v38  ;;  %v845_v57 = vadd.f32 %v7212_v58, %v844_v39  ;;  %v889_v8 = vmul.f32 0.2, %v853_v0  ;;  %vm873_vm6 = vcmp.ge.f32.partialorder %v853_v0, 0.0  ;;  %6201 = vmatpush3.bf16.msra.mxu0 %v6609_v49 }
 0x297   : > { %v6181_v45 = vpop.f32.mrf.mxu0  ;;  %v919_v48 = vpack.c.bf16 %v900_v42, %v899_v47  ;;  %v1268_v34 = vpack.c.bf16 %v7320_v32, %v7317_v31  ;;  %v7332_v38 = vmul.f32 %v7265_v4, %v1223_v35  ;;  %v7335_v39 = vmul.f32 %v7265_v4, %v1224_v36 }
 0x298   : > { %v887_v61 = vmul.f32 0.2, %v845_v57  ;;  %vm871_vm4 = vcmp.ge.f32.partialorder %v845_v57, 0.0  ;;  %v856_v1 = vadd.f32 %v6181_v45, %v7212_v58  ;;  %v905_v11 = vsel %vm873_vm6, %v853_v0, %v889_v8  ;;  %v1227_v45 = vld [vmem:[%s7260_s17 + $0x70] sm:$0xff] }
 0x299   : > { %5627 = vmatmul.mubr.msk.bf16.gmra.mxu1 %vm539_vm5, %v917_v29  ;;  %5635 = vmatmul.mubr.msk.bf16.gmra.mxu0 %vm539_vm5, %v917_v29  ;;  %v847_v51 = vpop.f32.mrf.mxu0  ;;  %v7310_v29 = vmul.f32 %v7265_v4, %v1219_v24  ;;  %v1269_v42 = vpack.c.bf16 %v7335_v39, %v7332_v38  ;;  %v7352_v47 = vmul.f32 %v7265_v4, %v1227_v45  ;;  %v7431_v45 = vld [vmem:[%s9316_s6 + $0x3] ss:$0 sm:$0xff] }
 0x29a   : > { %1049 = vmatprep.mubr.bf16.mxu1 %v6991_v55  ;;  %1162 = vmatprep.mubr.bf16.mxu0 %v6991_v55  ;;  %v848_v53 = vadd.f32 %v7212_v58, %v847_v51  ;;  %v903_v3 = vsel %vm871_vm4, %v845_v57, %v887_v61  ;;  %v890_v9 = vmul.f32 0.2, %v856_v1  ;;  %vm874_vm7 = vcmp.ge.f32.partialorder %v856_v1, 0.0  ;;  %v6610_v51 = vld [vmem:[%s9315_s5 + $0x10] sm:$0xff]  }
 0x29b   : > { %v7274_v58 = vmul.f32 %v7265_v4, %v1213_v6  ;;  %v1267_v33 = vpack.c.bf16 %v7313_v30, %v7310_v29  ;;  %6202 = vmatprep.subr.bf16.mxu0 %v6610_v51 }
 0x29c   : > { %v888_v60 = vmul.f32 0.2, %v848_v53  ;;  %vm872_vm2 = vcmp.ge.f32.partialorder %v848_v53, 0.0  ;;  %v906_v12 = vsel %vm874_vm7, %v856_v1, %v890_v9  ;;  %6203 = vmatpush3.bf16.msra.mxu0 %v6610_v51 }
 0x29d   : > { %v1264_v13 = vpack.c.bf16 %v7277_v10, %v7274_v58  ;;  %v922_v16 = vpack.c.bf16 %v906_v12, %v905_v11  ;;  %6204 = vmatprep.subr.bf16.mxu0 %v6611_v52 }
 0x29e   : > { %v904_v2 = vsel %vm872_vm2, %v848_v53, %v888_v60  ;;  %v6613_v53 = vld [vmem:[%s9315_s5 + $0x38] sm:$0xff]  }
 0x29f   : > { %v921_v5 = vpack.c.bf16 %v904_v2, %v903_v3  ;;  %6224 = vmatprep.subr.bf16.mxu1 %v6613_v53 }
 0x2a0   : > { %6205 = vmatpush3.bf16.msra.mxu0 %v6611_v52 }
 0x2a1   : > { %5628 = vmatmul.mubr.msk.bf16.gmra.mxu1 %vm539_vm5, %v918_v28  ;;  %5636 = vmatmul.mubr.msk.bf16.gmra.mxu0 %vm539_vm5, %v918_v28  ;;  %v1226_v28 = vld [vmem:[%s7260_s17 + $0x68] sm:$0xff] }
 0x2a2   : > { %1059 = vmatprep.mubr.bf16.mxu1 %v6991_v55  ;;  %1172 = vmatprep.mubr.bf16.mxu0 %v6991_v55  ;;  %v7342_v41 = vmul.f32 %v7265_v4, %v1226_v28 }
 0x2a3   : > { %6206 = vmatprep.subr.bf16.mxu0 %v6612_v43 }
 0x2a4   : > { %v1270_v44 = vpack.c.bf16 %v7342_v41, %v7339_v40  ;;  %6207 = vmatpush3.bf16.msra.mxu0 %v6612_v43 }
 0x2a9   : > { %5629 = vmatmul.mubr.msk.bf16.gmra.mxu1 %vm539_vm5, %v919_v48  ;;  %5637 = vmatmul.mubr.msk.bf16.gmra.mxu0 %vm539_vm5, %v919_v48  ;;  %v7355_v48 = vmul.f32 %v7265_v4, %v1228_v46 }
 0x2aa   : > { %1069 = vmatprep.mubr.bf16.mxu1 %v6991_v55  ;;  %1182 = vmatprep.mubr.bf16.mxu0 %v6991_v55 }
 0x2ab   : > { %v1271_v50 = vpack.c.bf16 %v7355_v48, %v7352_v47 }
 0x2b1   : > { %5630 = vmatmul.mubr.msk.bf16.gmra.mxu1 %vm539_vm5, %v920_v59  ;;  %5638 = vmatmul.mubr.msk.bf16.gmra.mxu0 %vm539_vm5, %v920_v59 }
 0x2b2   : > { %1079 = vmatprep.mubr.bf16.mxu1 %v6991_v55  ;;  %1192 = vmatprep.mubr.bf16.mxu0 %v6991_v55 }
 0x2b9   : > { %5631 = vmatmul.mubr.msk.bf16.gmra.mxu1 %vm539_vm5, %v921_v5  ;;  %5639 = vmatmul.mubr.msk.bf16.gmra.mxu0 %vm539_vm5, %v921_v5 }
 0x2ba   : > { %1089 = vmatprep.mubr.bf16.mxu1 %v6991_v55  ;;  %1202 = vmatprep.mubr.bf16.mxu0 %v6991_v55  ;;  %v1217_v55 = vld [vmem:[%s7260_s17 + $0x20] sm:$0xff] }
 0x2bb   : > { %v7295_v20 = vmul.f32 %v7265_v4, %v1217_v55 }
 0x2bd   : > { %v1266_v23 = vpack.c.bf16 %v7298_v21, %v7295_v20 }
 0x2c1   : > { %5632 = vmatmul.mubr.msk.bf16.gmra.mxu1 %vm539_vm5, %v922_v16  ;;  %5640 = vmatmul.mubr.msk.bf16.gmra.mxu0 %vm539_vm5, %v922_v16 }
 0x2c2   : > { %6184 = vmatprep.mubr.msk.bf16.mxu1 %vm1272_vm8, %v1264_v13 }
 0x2c9   : > { %6185 = vmatmul.mubr.msk.bf16.vlgmr.msra.gmra.mxu1 %vm1272_vm8, %v1265_v22 }
 0x2ca   : > { %6188 = vmatprep.mubr.msk.bf16.mxu1 %vm1272_vm8, %v1266_v23  ;;  %6225 = vmatpush3.bf16.msra.mxu1 %v6613_v53 }
 0x2cb   : > { %6226 = vmatprep.subr.bf16.mxu1 %v6614_v54 }
 0x2ce   : > { %6227 = vmatpush3.bf16.msra.mxu1 %v6614_v54 }
 0x2cf   : > { %6228 = vmatprep.subr.bf16.mxu1 %v6615_v56 }
 0x2d1   : > { %6189 = vmatmul.mubr.msk.bf16.gmra.mxu1 %vm1272_vm8, %v1267_v33 }
 0x2d2   : > { %6192 = vmatprep.mubr.msk.bf16.mxu1 %vm1272_vm8, %v1268_v34  ;;  %6229 = vmatpush3.bf16.msra.mxu1 %v6615_v56 }
 0x2d9   : > { %6193 = vmatmul.mubr.msk.bf16.gmra.mxu1 %vm1272_vm8, %v1269_v42 }
 0x2da   : > { %6196 = vmatprep.mubr.msk.bf16.mxu1 %vm1272_vm8, %v1270_v44 }
 0x2e1   : > { %6197 = vmatmul.mubr.msk.bf16.gmra.mxu1 %vm1272_vm8, %v1271_v50 }
 0x349   : > { %v1021_v57 = vpop.f32.mrf.mxu1 }
 0x34b   : > { %v7382_v59 = vpop.f32.mrf.mxu1 }
 0x34d   : > { %v1025_v60 = vpop.f32.mrf.mxu1 }
 0x34f   : > { %v7384_v61 = vpop.f32.mrf.mxu1 }
 0x351   : > { %v1031_v62 = vpop.f32.mrf.mxu1 }
 0x353   : > { %v7386_v0 = vpop.f32.mrf.mxu1 }
 0x355   : > { %v1035_v1 = vpop.f32.mrf.mxu1 }
 0x357   : > { %v7388_v2 = vpop.f32.mrf.mxu1 }
 0x359   : > { %v1041_v3 = vpop.f32.mrf.mxu1 }
 0x35b   : > { %v7390_v5 = vpop.f32.mrf.mxu1 }
 0x35d   : > { %v1045_v6 = vpop.f32.mrf.mxu1 }
 0x35f   : > { %v7392_v7 = vpop.f32.mrf.mxu1 }
 0x361   : > { %v1051_v8 = vpop.f32.mrf.mxu1 }
 0x363   : > { %v7394_v9 = vpop.f32.mrf.mxu1 }
 0x365   : > { %v1055_v11 = vpop.f32.mrf.mxu1 }
 0x367   : > { %v7396_v12 = vpop.f32.mrf.mxu1 }
 0x369   : > { %v7398_v13 = vpop.f32.mrf.mxu1 }
 0x36b   : > { %v7400_v14 = vpop.f32.mrf.mxu1 }
 0x36c   : > { %9375 = vst [vmem:[#allocation7_spill] sm:$0xff] %v7400_v14 }
 0x36d   : > { %v7402_v15 = vpop.f32.mrf.mxu1 }
 0x36f   : > { %v7404_v16 = vpop.f32.mrf.mxu1 }
 0x370   : > { %9376 = vst [vmem:[#allocation8_spill] sm:$0xff] %v7404_v16 }
 0x371   : > { %v1071_v55 = vpop.f32.mrf.mxu1 }
 0x373   : > { %v7406_v17 = vpop.f32.mrf.mxu1 }
 0x375   : > { %v7408_v22 = vpop.f32.mrf.mxu1 }
 0x377   : > { %v7410_v23 = vpop.f32.mrf.mxu1 }
 0x378   : > { %9377 = vst [vmem:[#allocation9_spill] sm:$0xff] %v7410_v23 }
 0x379   : > { %v7412_v24 = vpop.f32.mrf.mxu1 }
 0x37b   : > { %v7414_v25 = vpop.f32.mrf.mxu1 }
 0x37c   : > { %9378 = vst [vmem:[#allocation10_spill] sm:$0xff] %v7414_v25 }
 0x37d   : > { %v7416_v26 = vpop.f32.mrf.mxu1 }
 0x37f   : > { %v7418_v27 = vpop.f32.mrf.mxu1 }
 0x380   : > { %9379 = vst [vmem:[#allocation11_spill] sm:$0xff] %v7418_v27 }
 0x381   : > { %v7420_v33 = vpop.f32.mrf.mxu1 }
 0x383   : > { %v7422_v34 = vpop.f32.mrf.mxu1 }
 0x384   : > { %9380 = vst [vmem:[#allocation12_spill] sm:$0xff] %v7422_v34 }
 0x385   : > { %v7424_v35 = vpop.f32.mrf.mxu1 }
 0x387   : > { %v7426_v36 = vpop.f32.mrf.mxu1 }
 0x388   : > { %9381 = vst [vmem:[#allocation13_spill] sm:$0xff] %v7426_v36 }
 0x389   : > { %v6186_v37 = vpop.f32.mrf.mxu1 }
 0x38a   : > { %v1344_v42 = vadd.f32 %v6186_v37, %v1031_v62 }
 0x38b   : > { %v1335_v28 = vpop.f32.mrf.mxu1 }
 0x38c   : > { %v1336_v44 = vadd.f32 %v1335_v28, %v1021_v57  ;;  %v1405_v51 = vadd.f32 %v7431_v45, %v1344_v42 }
 0x38d   : > { %v6187_v46 = vpop.f32.mrf.mxu1 }
 0x38e   : > { %v1347_v49 = vadd.f32 %v6187_v46, %v1035_v1  ;;  %v1403_v52 = vadd.f32 %v7431_v45, %v1336_v44  ;;  %v1437_v37 = vmul.f32 0.2, %v1405_v51  ;;  %vm1421_vm11 = vcmp.ge.f32.partialorder %v1405_v51, 0.0 }
 0x38f   : > { %v1338_v50 = vpop.f32.mrf.mxu1 }
 0x390   : > { %v1406_v43 = vadd.f32 %v7431_v45, %v1347_v49  ;;  %v1339_v53 = vadd.f32 %v1338_v50, %v1025_v60  ;;  %v1435_v28 = vmul.f32 0.2, %v1403_v52  ;;  %vm1419_vm9 = vcmp.ge.f32.partialorder %v1403_v52, 0.0 }
 0x391   : > { %v6190_v54 = vpop.f32.mrf.mxu1  ;;  %v1453_v34 = vsel %vm1421_vm11, %v1405_v51, %v1437_v37 }
 0x392   : > { %v1438_v56 = vmul.f32 0.2, %v1406_v43  ;;  %v1404_v62 = vadd.f32 %v7431_v45, %v1339_v53  ;;  %vm1422_vm5 = vcmp.ge.f32.partialorder %v1406_v43, 0.0  ;;  %v1360_v46 = vadd.f32 %v6190_v54, %v1051_v8 }
 0x393   : > { %v1351_v57 = vpop.f32.mrf.mxu1  ;;  %v1451_v60 = vsel %vm1419_vm9, %v1403_v52, %v1435_v28 }
 0x394   : > { %v1352_v27 = vadd.f32 %v1351_v57, %v1041_v3  ;;  %vm1420_vm10 = vcmp.ge.f32.partialorder %v1404_v62, 0.0  ;;  %v1436_v1 = vmul.f32 0.2, %v1404_v62  ;;  %v1454_v44 = vsel %vm1422_vm5, %v1406_v43, %v1438_v56 }
 0x395   : > { %v6191_v36 = vpop.f32.mrf.mxu1  ;;  %v1409_v16 = vadd.f32 %v7431_v45, %v1360_v46  ;;  %v1476_v14 = vpack.c.bf16 %v1454_v44, %v1453_v34 }
 0x396   : > { %v1363_v42 = vadd.f32 %v6191_v36, %v1055_v11  ;;  %v1452_v25 = vsel %vm1420_vm10, %v1404_v62, %v1436_v1  ;;  %v1407_v50 = vadd.f32 %v7431_v45, %v1352_v27 }
 0x397   : > { %v1354_v49 = vpop.f32.mrf.mxu1  ;;  %v1475_v23 = vpack.c.bf16 %v1452_v25, %v1451_v60  ;;  %v1441_v51 = vmul.f32 0.2, %v1409_v16  ;;  %vm1425_vm0 = vcmp.ge.f32.partialorder %v1409_v16, 0.0 }
 0x398   : > { %v1410_v53 = vadd.f32 %v7431_v45, %v1363_v42  ;;  %v1355_v3 = vadd.f32 %v1354_v49, %v1045_v6  ;;  %v1439_v36 = vmul.f32 0.2, %v1407_v50  ;;  %vm1423_vm14 = vcmp.ge.f32.partialorder %v1407_v50, 0.0 }
 0x399   : > { %v6194_v57 = vpop.f32.mrf.mxu1  ;;  %6208 = vmatprep.mubr.msk.bf16.mxu0 %vm1512_vm12, %v1475_v23  ;;  %v1457_v28 = vsel %vm1425_vm0, %v1409_v16, %v1441_v51 }
 0x39a   : > { %v1442_v8 = vmul.f32 0.2, %v1410_v53  ;;  %v1408_v54 = vadd.f32 %v7431_v45, %v1355_v3  ;;  %vm1426_vm13 = vcmp.ge.f32.partialorder %v1410_v53, 0.0  ;;  %v1376_v52 = vadd.f32 %v6194_v57, %v1071_v55  ;;  %6209 = vmatmul.mubr.msk.bf16.vlgmr.msra.gmra.mxu0 %vm1512_vm12, %v1476_v14 }
 0x39b   : > { %v1367_v11 = vpop.f32.mrf.mxu1  ;;  %v1455_v23 = vsel %vm1423_vm14, %v1407_v50, %v1439_v36 }
 0x39c   : > { %v1368_v27 = vadd.f32 %v1367_v11, %v7398_v13  ;;  %vm1424_vm15 = vcmp.ge.f32.partialorder %v1408_v54, 0.0  ;;  %v1440_v6 = vmul.f32 0.2, %v1408_v54  ;;  %v1458_v34 = vsel %vm1426_vm13, %v1410_v53, %v1442_v8 }
 0x39d   : > { %v6195_v43 = vpop.f32.mrf.mxu1  ;;  %v1413_v37 = vadd.f32 %v7431_v45, %v1376_v52  ;;  %v1478_v42 = vpack.c.bf16 %v1458_v34, %v1457_v28 }
 0x39e   : > { %v1379_v25 = vadd.f32 %v6195_v43, %v7408_v22  ;;  %v1456_v56 = vsel %vm1424_vm15, %v1408_v54, %v1440_v6  ;;  %v1411_v55 = vadd.f32 %v7431_v45, %v1368_v27 }
 0x39f   : > { %v1370_v62 = vpop.f32.mrf.mxu1  ;;  %v1477_v46 = vpack.c.bf16 %v1456_v56, %v1455_v23  ;;  %v1445_v60 = vmul.f32 0.2, %v1413_v37  ;;  %vm1429_vm6 = vcmp.ge.f32.partialorder %v1413_v37, 0.0 }
 0x3a0   : > { %v1414_v14 = vadd.f32 %v7431_v45, %v1379_v25  ;;  %v1371_v13 = vadd.f32 %v1370_v62, %v7402_v15  ;;  %v1443_v50 = vmul.f32 0.2, %v1411_v55  ;;  %vm1427_vm2 = vcmp.ge.f32.partialorder %v1411_v55, 0.0 }
 0x3a1   : > { %v6198_v1 = vpop.f32.mrf.mxu1  ;;  %6212 = vmatprep.mubr.msk.bf16.mxu0 %vm1512_vm12, %v1477_v46  ;;  %v1461_v51 = vsel %vm1429_vm6, %v1413_v37, %v1445_v60 }
 0x3a2   : > { %v1446_v44 = vmul.f32 0.2, %v1414_v14  ;;  %v1412_v49 = vadd.f32 %v7431_v45, %v1371_v13  ;;  %vm1430_vm1 = vcmp.ge.f32.partialorder %v1414_v14, 0.0  ;;  %6213 = vmatmul.mubr.msk.bf16.gmra.mxu0 %vm1512_vm12, %v1478_v42  ;;  %v1392_v15 = vadd.f32 %v6198_v1, %v7420_v33  ;;  %v6616_v1 = vld [vmem:[%s9315_s5 + $0x20] sm:$0xff]  }
 0x3a3   : > { %v1383_v22 = vpop.f32.mrf.mxu1  ;;  %v1459_v52 = vsel %vm1427_vm2, %v1411_v55, %v1443_v50  ;;  %6230 = vmatprep.subr.bf16.mxu1 %v6616_v1 }
 0x3a4   : > { %v1384_v53 = vadd.f32 %v1383_v22, %v7412_v24  ;;  %vm1428_vm4 = vcmp.ge.f32.partialorder %v1412_v49, 0.0  ;;  %v1444_v16 = vmul.f32 0.2, %v1412_v49  ;;  %v1462_v8 = vsel %vm1430_vm1, %v1414_v14, %v1446_v44  ;;  %6231 = vmatpush3.bf16.msra.mxu1 %v6616_v1  ;;  %v7543_v1 = vld [vmem:[%s9316_s6 + $0x7] ss:$0 sm:$0xff] }
 0x3a5   : > { %v6199_v3 = vpop.f32.mrf.mxu1  ;;  %v1417_v24 = vadd.f32 %v7431_v45, %v1392_v15  ;;  %v1480_v25 = vpack.c.bf16 %v1462_v8, %v1461_v51  ;;  %v6618_v15 = vld [vmem:[%s9315_s5 + $0x50] sm:$0xff]  }
 0x3a6   : > { %v1395_v57 = vadd.f32 %v6199_v3, %v7424_v35  ;;  %v1460_v54 = vsel %vm1428_vm4, %v1412_v49, %v1444_v16  ;;  %v1415_v11 = vadd.f32 %v7431_v45, %v1384_v53  ;;  %v6617_v16 = vld [vmem:[%s9315_s5 + $0x58] sm:$0xff]  }
 0x3a7   : > { %v1386_v36 = vpop.f32.mrf.mxu1  ;;  %v1479_v43 = vpack.c.bf16 %v1460_v54, %v1459_v52  ;;  %v1449_v35 = vmul.f32 0.2, %v1417_v24  ;;  %vm1433_vm10 = vcmp.ge.f32.partialorder %v1417_v24, 0.0  ;;  %6248 = vmatprep.subr.bf16.mxu0 %v6617_v16 }
 0x3a8   : > { %v1418_v27 = vadd.f32 %v7431_v45, %v1395_v57  ;;  %v1387_v6 = vadd.f32 %v1386_v36, %v7416_v26  ;;  %v1447_v33 = vmul.f32 0.2, %v1415_v11  ;;  %vm1431_vm7 = vcmp.ge.f32.partialorder %v1415_v11, 0.0  ;;  %6249 = vmatpush3.bf16.msra.mxu0 %v6617_v16  ;;  %v6619_v57 = vld [vmem:[%s9315_s5 + $0x48] sm:$0xff]  }
 0x3a9   : > { %6216 = vmatprep.mubr.msk.bf16.mxu0 %vm1512_vm12, %v1479_v43  ;;  %v1465_v14 = vsel %vm1433_vm10, %v1417_v24, %v1449_v35  ;;  %6250 = vmatprep.subr.bf16.mxu0 %v6618_v15 }
 0x3aa   : > { %v1450_v34 = vmul.f32 0.2, %v1418_v27  ;;  %v1416_v56 = vadd.f32 %v7431_v45, %v1387_v6  ;;  %vm1434_vm5 = vcmp.ge.f32.partialorder %v1418_v27, 0.0  ;;  %6217 = vmatmul.mubr.msk.bf16.gmra.mxu0 %vm1512_vm12, %v1480_v25  ;;  %v1463_v23 = vsel %vm1431_vm7, %v1415_v11, %v1447_v33  ;;  %v7464_v45 = vpop.f32.mrf.mxu0 }
 0x3ac   : > { %vm1432_vm9 = vcmp.ge.f32.partialorder %v1416_v56, 0.0  ;;  %v1448_v62 = vmul.f32 0.2, %v1416_v56  ;;  %v1466_v37 = vsel %vm1434_vm5, %v1418_v27, %v1450_v34  ;;  %v7466_v13 = vpop.f32.mrf.mxu0  ;;  %6251 = vmatpush3.bf16.msra.mxu0 %v6618_v15 }
 0x3ad   : > { %v1482_v28 = vpack.c.bf16 %v1466_v37, %v1465_v14  ;;  %9382 = vst [vmem:[#allocation14_spill] sm:$0xff] %v7466_v13  ;;  %6252 = vmatprep.subr.bf16.mxu0 %v6619_v57 }
 0x3ae   : > { %v1464_v55 = vsel %vm1432_vm9, %v1416_v56, %v1448_v62  ;;  %v7471_v46 = vpop.f32.mrf.mxu0 }
 0x3af   : > { %v1481_v26 = vpack.c.bf16 %v1464_v55, %v1463_v23  ;;  %9383 = vst [vmem:[#allocation15_spill] sm:$0xff] %v7471_v46 }
 0x3b0   : > { %v7473_v42 = vpop.f32.mrf.mxu0  ;;  %6253 = vmatpush3.bf16.msra.mxu0 %v6619_v57 }
 0x3b1   : > { %6220 = vmatprep.mubr.msk.bf16.mxu0 %vm1512_vm12, %v1481_v26  ;;  %9384 = vst [vmem:[#allocation16_spill] sm:$0xff] %v7473_v42 }
 0x3b2   : > { %6221 = vmatmul.mubr.msk.bf16.gmra.mxu0 %vm1512_vm12, %v1482_v28  ;;  %v7475_v44 = vpop.f32.mrf.mxu0 }
 0x3b4   : > { %v7477_v49 = vpop.f32.mrf.mxu0 }
 0x3b5   : > { %9385 = vst [vmem:[#allocation17_spill] sm:$0xff] %v7477_v49 }
 0x3b6   : > { %v7479_v22 = vpop.f32.mrf.mxu0 }
 0x3b7   : > { %9386 = vst [vmem:[#allocation18_spill] sm:$0xff] %v7479_v22 }
 0x3b8   : > { %v7481_v60 = vpop.f32.mrf.mxu0 }
 0x3b9   : > { %9387 = vst [vmem:[#allocation19_spill] sm:$0xff] %v7481_v60 }
 0x3ba   : > { %v7483_v50 = vpop.f32.mrf.mxu0 }
 0x3bb   : > { %9388 = vst [vmem:[#allocation20_spill] sm:$0xff] %v7483_v50 }
 0x3bc   : > { %v7485_v53 = vpop.f32.mrf.mxu0 }
 0x3bd   : > { %9389 = vst [vmem:[#allocation21_spill] sm:$0xff] %v7485_v53 }
 0x3be   : > { %v7493_v3 = vpop.f32.mrf.mxu0 }
 0x3bf   : > { %9390 = vst [vmem:[#allocation22_spill] sm:$0xff] %v7493_v3 }
 0x3c0   : > { %v7498_v8 = vpop.f32.mrf.mxu0 }
 0x3c1   : > { %9391 = vst [vmem:[#allocation23_spill] sm:$0xff] %v7498_v8 }
 0x3c2   : > { %v7500_v54 = vpop.f32.mrf.mxu0 }
 0x3c3   : > { %9392 = vst [vmem:[#allocation24_spill] sm:$0xff] %v7500_v54 }
 0x3c4   : > { %v7502_v11 = vpop.f32.mrf.mxu0 }
 0x3c5   : > { %9393 = vst [vmem:[#allocation25_spill] sm:$0xff] %v7502_v11 }
 0x3c6   : > { %v7504_v36 = vpop.f32.mrf.mxu0 }
 0x3c7   : > { %9394 = vst [vmem:[#allocation26_spill] sm:$0xff] %v7504_v36 }
 0x3c8   : > { %v7506_v52 = vpop.f32.mrf.mxu0 }
 0x3c9   : > { %9395 = vst [vmem:[#allocation27_spill] sm:$0xff] %v7506_v52 }
 0x3ca   : > { %v7508_v27 = vpop.f32.mrf.mxu0 }
 0x3cb   : > { %9396 = vst [vmem:[#allocation28_spill] sm:$0xff] %v7508_v27 }
 0x3cc   : > { %v7510_v51 = vpop.f32.mrf.mxu0 }
 0x3cd   : > { %9397 = vst [vmem:[#allocation29_spill] sm:$0xff] %v7510_v51 }
 0x3ce   : > { %v7512_v24 = vpop.f32.mrf.mxu0 }
 0x3cf   : > { %9398 = vst [vmem:[#allocation30_spill] sm:$0xff] %v7512_v24 }
 0x3d0   : > { %v7514_v6 = vpop.f32.mrf.mxu0 }
 0x3d1   : > { %9399 = vst [vmem:[#allocation31_spill] sm:$0xff] %v7514_v6 }
 0x3d2   : > { %v7516_v43 = vpop.f32.mrf.mxu0 }
 0x3d3   : > { %9400 = vst [vmem:[#allocation32_spill] sm:$0xff] %v7516_v43 }
 0x3d4   : > { %v7518_v25 = vpop.f32.mrf.mxu0 }
 0x3d5   : > { %9401 = vst [vmem:[#allocation33_spill] sm:$0xff] %v7518_v25 }
 0x3d6   : > { %v7520_v33 = vpop.f32.mrf.mxu0 }
 0x3d7   : > { %9402 = vst [vmem:[#allocation34_spill] sm:$0xff] %v7520_v33 }
 0x3d8   : > { %v7522_v34 = vpop.f32.mrf.mxu0 }
 0x3d9   : > { %9403 = vst [vmem:[#allocation35_spill] sm:$0xff] %v7522_v34 }
 0x3da   : > { %v7524_v56 = vpop.f32.mrf.mxu0 }
 0x3db   : > { %9404 = vst [vmem:[#allocation36_spill] sm:$0xff] %v7524_v56 }
 0x3dc   : > { %v7526_v35 = vpop.f32.mrf.mxu0 }
 0x3dd   : > { %9405 = vst [vmem:[#allocation37_spill] sm:$0xff] %v7526_v35 }
 0x3de   : > { %v7528_v62 = vpop.f32.mrf.mxu0 }
 0x3df   : > { %9406 = vst [vmem:[#allocation38_spill] sm:$0xff] %v7528_v62 }
 0x3e0   : > { %v7530_v23 = vpop.f32.mrf.mxu0 }
 0x3e1   : > { %9407 = vst [vmem:[#allocation39_spill] sm:$0xff] %v7530_v23 }
 0x3e2   : > { %v7532_v37 = vpop.f32.mrf.mxu0 }
 0x3e3   : > { %9408 = vst [vmem:[#allocation40_spill] sm:$0xff] %v7532_v37 }
 0x3e4   : > { %v7534_v55 = vpop.f32.mrf.mxu0 }
 0x3e5   : > { %9409 = vst [vmem:[#allocation41_spill] sm:$0xff] %v7534_v55 }
 0x3e6   : > { %v7536_v26 = vpop.f32.mrf.mxu0 }
 0x3e7   : > { %9410 = vst [vmem:[#allocation42_spill] sm:$0xff] %v7536_v26 }
 0x3e8   : > { %v7538_v14 = vpop.f32.mrf.mxu0 }
 0x3e9   : > { %9411 = vst [vmem:[#allocation43_spill] sm:$0xff] %v7538_v14 }
 0x45a   : > { %v6210_v28 = vpop.f32.mrf.mxu0 }
 0x45b   : > { %v1580_v57 = vadd.f32 %v6210_v28, %v7543_v1 }
 0x45c   : > { %v1571_v16 = vpop.f32.mrf.mxu0 }
 0x45d   : > { %v1572_v15 = vadd.f32 %v7543_v1, %v1571_v16  ;;  %v1652_v51 = vmul.f32 0.2, %v1580_v57  ;;  %vm1636_vm14 = vcmp.ge.f32.partialorder %v1580_v57, 0.0 }
 0x45e   : > { %v6211_v23 = vpop.f32.mrf.mxu0 }
 0x45f   : > { %v1583_v35 = vadd.f32 %v6211_v23, %v7543_v1  ;;  %v1650_v55 = vmul.f32 0.2, %v1572_v15  ;;  %vm1634_vm13 = vcmp.ge.f32.partialorder %v1572_v15, 0.0  ;;  %v1668_v42 = vsel %vm1636_vm14, %v1580_v57, %v1652_v51 }
 0x460   : > { %v1574_v6 = vpop.f32.mrf.mxu0 }
 0x461   : > { %vm1637_vm11 = vcmp.ge.f32.partialorder %v1583_v35, 0.0  ;;  %v1653_v34 = vmul.f32 0.2, %v1583_v35  ;;  %v1575_v14 = vadd.f32 %v7543_v1, %v1574_v6  ;;  %v1666_v16 = vsel %vm1634_vm13, %v1572_v15, %v1650_v55 }
 0x462   : > { %v6214_v25 = vpop.f32.mrf.mxu0 }
 0x463   : > { %vm1635_vm15 = vcmp.ge.f32.partialorder %v1575_v14, 0.0  ;;  %v1651_v8 = vmul.f32 0.2, %v1575_v14  ;;  %v1669_v52 = vsel %vm1637_vm11, %v1583_v35, %v1653_v34  ;;  %v1596_v60 = vadd.f32 %v6214_v25, %v7543_v1 }
 0x464   : > { %v1587_v11 = vpop.f32.mrf.mxu0  ;;  %v1691_v49 = vpack.c.bf16 %v1669_v52, %v1668_v42 }
 0x465   : > { %v1667_v53 = vsel %vm1635_vm15, %v1575_v14, %v1651_v8  ;;  %v1588_v28 = vadd.f32 %v7543_v1, %v1587_v11  ;;  %v1656_v8 = vmul.f32 0.2, %v1596_v60  ;;  %vm1640_vm2 = vcmp.ge.f32.partialorder %v1596_v60, 0.0 }
 0x466   : > { %v1690_v23 = vpack.c.bf16 %v1667_v53, %v1666_v16  ;;  %v6215_v13 = vpop.f32.mrf.mxu0 }
 0x467   : > { %v1599_v6 = vadd.f32 %v6215_v13, %v7543_v1  ;;  %v1654_v26 = vmul.f32 0.2, %v1588_v28  ;;  %vm1638_vm1 = vcmp.ge.f32.partialorder %v1588_v28, 0.0  ;;  %v1672_v35 = vsel %vm1640_vm2, %v1596_v60, %v1656_v8 }
 0x468   : > { %v1590_v62 = vpop.f32.mrf.mxu0  ;;  %6232 = vmatprep.mubr.msk.bf16.mxu1 %vm1512_vm12, %v1690_v23 }
 0x469   : > { %vm1641_vm0 = vcmp.ge.f32.partialorder %v1599_v6, 0.0  ;;  %v1657_v37 = vmul.f32 0.2, %v1599_v6  ;;  %v1591_v34 = vadd.f32 %v7543_v1, %v1590_v62  ;;  %6233 = vmatmul.mubr.msk.bf16.vlgmr.msra.gmra.mxu1 %vm1512_vm12, %v1691_v49  ;;  %v1670_v52 = vsel %vm1638_vm1, %v1588_v28, %v1654_v26 }
 0x46a   : > { %v6218_v11 = vpop.f32.mrf.mxu0 }
 0x46b   : > { %vm1639_vm4 = vcmp.ge.f32.partialorder %v1591_v34, 0.0  ;;  %v1655_v53 = vmul.f32 0.2, %v1591_v34  ;;  %v1673_v51 = vsel %vm1641_vm0, %v1599_v6, %v1657_v37  ;;  %v1612_v14 = vadd.f32 %v6218_v11, %v7543_v1 }
 0x46c   : > { %v1603_v42 = vpop.f32.mrf.mxu0  ;;  %v1693_v62 = vpack.c.bf16 %v1673_v51, %v1672_v35 }
 0x46d   : > { %v1671_v13 = vsel %vm1639_vm4, %v1591_v34, %v1655_v53  ;;  %v1604_v25 = vadd.f32 %v7543_v1, %v1603_v42  ;;  %v1660_v26 = vmul.f32 0.2, %v1612_v14  ;;  %vm1644_vm5 = vcmp.ge.f32.partialorder %v1612_v14, 0.0 }
 0x46e   : > { %v1692_v55 = vpack.c.bf16 %v1671_v13, %v1670_v52  ;;  %v6219_v15 = vpop.f32.mrf.mxu0 }
 0x46f   : > { %v1615_v49 = vadd.f32 %v6219_v15, %v7543_v1  ;;  %v1658_v16 = vmul.f32 0.2, %v1604_v25  ;;  %vm1642_vm7 = vcmp.ge.f32.partialorder %v1604_v25, 0.0  ;;  %v1676_v51 = vsel %vm1644_vm5, %v1612_v14, %v1660_v26 }
 0x470   : > { %v1606_v57 = vpop.f32.mrf.mxu0  ;;  %6236 = vmatprep.mubr.msk.bf16.mxu1 %vm1512_vm12, %v1692_v55 }
 0x471   : > { %vm1645_vm6 = vcmp.ge.f32.partialorder %v1615_v49, 0.0  ;;  %v1661_v23 = vmul.f32 0.2, %v1615_v49  ;;  %v1607_v37 = vadd.f32 %v7543_v1, %v1606_v57  ;;  %6237 = vmatmul.mubr.msk.bf16.gmra.mxu1 %vm1512_vm12, %v1693_v62  ;;  %v1674_v8 = vsel %vm1642_vm7, %v1604_v25, %v1658_v16 }
 0x472   : > { %v6222_v60 = vpop.f32.mrf.mxu0 }
 0x473   : > { %vm1643_vm9 = vcmp.ge.f32.partialorder %v1607_v37, 0.0  ;;  %v1659_v28 = vmul.f32 0.2, %v1607_v37  ;;  %v1677_v6 = vsel %vm1645_vm6, %v1615_v49, %v1661_v23  ;;  %v1628_v52 = vadd.f32 %v6222_v60, %v7543_v1 }
 0x474   : > { %v1619_v34 = vpop.f32.mrf.mxu0  ;;  %v1695_v35 = vpack.c.bf16 %v1677_v6, %v1676_v51 }
 0x475   : > { %v1675_v11 = vsel %vm1643_vm9, %v1607_v37, %v1659_v28  ;;  %v1620_v53 = vadd.f32 %v7543_v1, %v1619_v34  ;;  %v1664_v25 = vmul.f32 0.2, %v1628_v52  ;;  %vm1648_vm13 = vcmp.ge.f32.partialorder %v1628_v52, 0.0  ;;  %v7577_v34 = vld [vmem:[%s9316_s6 + $0xb] ss:$0 sm:$0xff] }
 0x476   : > { %v1694_v42 = vpack.c.bf16 %v1675_v11, %v1674_v8  ;;  %v6223_v13 = vpop.f32.mrf.mxu0 }
 0x477   : > { %v1631_v55 = vadd.f32 %v6223_v13, %v7543_v1  ;;  %v1662_v62 = vmul.f32 0.2, %v1620_v53  ;;  %vm1646_vm11 = vcmp.ge.f32.partialorder %v1620_v53, 0.0  ;;  %v1680_v26 = vsel %vm1648_vm13, %v1628_v52, %v1664_v25 }
 0x478   : > { %v1622_v15 = vpop.f32.mrf.mxu0  ;;  %6240 = vmatprep.mubr.msk.bf16.mxu1 %vm1512_vm12, %v1694_v42 }
 0x479   : > { %vm1649_vm10 = vcmp.ge.f32.partialorder %v1631_v55, 0.0  ;;  %v1665_v57 = vmul.f32 0.2, %v1631_v55  ;;  %v1623_v49 = vadd.f32 %v7543_v1, %v1622_v15  ;;  %6241 = vmatmul.mubr.msk.bf16.gmra.mxu1 %vm1512_vm12, %v1695_v35  ;;  %v1678_v23 = vsel %vm1646_vm11, %v1620_v53, %v1662_v62  ;;  %v6620_v1 = vld [vmem:[%s9315_s5 + $0x40] sm:$0xff]  }
 0x47a   : > { %6254 = vmatprep.subr.bf16.mxu0 %v6620_v1 }
 0x47b   : > { %vm1647_vm14 = vcmp.ge.f32.partialorder %v1623_v49, 0.0  ;;  %v1663_v14 = vmul.f32 0.2, %v1623_v49  ;;  %v1681_v16 = vsel %vm1649_vm10, %v1631_v55, %v1665_v57  ;;  %6255 = vmatpush3.bf16.msra.mxu0 %v6620_v1 }
 0x47c   : > { %v1697_v28 = vpack.c.bf16 %v1681_v16, %v1680_v26 }
 0x47d   : > { %v1679_v37 = vsel %vm1647_vm14, %v1623_v49, %v1663_v14 }
 0x47e   : > { %v1696_v60 = vpack.c.bf16 %v1679_v37, %v1678_v23 }
 0x480   : > { %6244 = vmatprep.mubr.msk.bf16.mxu1 %vm1512_vm12, %v1696_v60 }
 0x481   : > { %6245 = vmatmul.mubr.msk.bf16.gmra.mxu1 %vm1512_vm12, %v1697_v28 }
 0x529   : > { %v6234_v6 = vpop.f32.mrf.mxu1 }
 0x52a   : > { %v1794_v53 = vadd.f32 %v6234_v6, %v7577_v34 }
 0x52b   : > { %v1785_v8 = vpop.f32.mrf.mxu1 }
 0x52c   : > { %v1786_v11 = vadd.f32 %v7577_v34, %v1785_v8  ;;  %v1866_v15 = vmul.f32 0.2, %v1794_v53  ;;  %vm1850_vm1 = vcmp.ge.f32.partialorder %v1794_v53, 0.0 }
 0x52d   : > { %v6235_v51 = vpop.f32.mrf.mxu1 }
 0x52e   : > { %v1797_v42 = vadd.f32 %v6235_v51, %v7577_v34  ;;  %v1864_v13 = vmul.f32 0.2, %v1786_v11  ;;  %vm1848_vm0 = vcmp.ge.f32.partialorder %v1786_v11, 0.0  ;;  %v1882_v37 = vsel %vm1850_vm1, %v1794_v53, %v1866_v15 }
 0x52f   : > { %v1788_v52 = vpop.f32.mrf.mxu1 }
 0x530   : > { %vm1851_vm15 = vcmp.ge.f32.partialorder %v1797_v42, 0.0  ;;  %v1867_v35 = vmul.f32 0.2, %v1797_v42  ;;  %v1789_v55 = vadd.f32 %v7577_v34, %v1788_v52  ;;  %v1880_v14 = vsel %vm1848_vm0, %v1786_v11, %v1864_v13 }
 0x531   : > { %v6238_v62 = vpop.f32.mrf.mxu1 }
 0x532   : > { %vm1849_vm2 = vcmp.ge.f32.partialorder %v1789_v55, 0.0  ;;  %v1865_v57 = vmul.f32 0.2, %v1789_v55  ;;  %v1883_v49 = vsel %vm1851_vm15, %v1797_v42, %v1867_v35  ;;  %v1810_v60 = vadd.f32 %v6238_v62, %v7577_v34 }
 0x533   : > { %v1801_v25 = vpop.f32.mrf.mxu1  ;;  %v1905_v1 = vpack.c.bf16 %v1883_v49, %v1882_v37 }
 0x534   : > { %v1881_v16 = vsel %vm1849_vm2, %v1789_v55, %v1865_v57  ;;  %v1802_v23 = vadd.f32 %v7577_v34, %v1801_v25  ;;  %v1870_v11 = vmul.f32 0.2, %v1810_v60  ;;  %vm1854_vm7 = vcmp.ge.f32.partialorder %v1810_v60, 0.0 }
 0x535   : > { %v1904_v26 = vpack.c.bf16 %v1881_v16, %v1880_v14  ;;  %v6239_v28 = vpop.f32.mrf.mxu1 }
 0x536   : > { %v1813_v6 = vadd.f32 %v6239_v28, %v7577_v34  ;;  %v1868_v51 = vmul.f32 0.2, %v1802_v23  ;;  %vm1852_vm6 = vcmp.ge.f32.partialorder %v1802_v23, 0.0  ;;  %v1886_v49 = vsel %vm1854_vm7, %v1810_v60, %v1870_v11 }
 0x537   : > { %v1804_v8 = vpop.f32.mrf.mxu1  ;;  %6256 = vmatprep.mubr.msk.bf16.mxu0 %vm1512_vm12, %v1904_v26 }
 0x538   : > { %vm1855_vm4 = vcmp.ge.f32.partialorder %v1813_v6, 0.0  ;;  %v1871_v52 = vmul.f32 0.2, %v1813_v6  ;;  %v1805_v42 = vadd.f32 %v7577_v34, %v1804_v8  ;;  %6257 = vmatmul.mubr.msk.bf16.vlgmr.msra.gmra.mxu0 %vm1512_vm12, %v1905_v1  ;;  %v1884_v15 = vsel %vm1852_vm6, %v1802_v23, %v1868_v51 }
 0x539   : > { %v6242_v53 = vpop.f32.mrf.mxu1 }
 0x53a   : > { %vm1853_vm5 = vcmp.ge.f32.partialorder %v1805_v42, 0.0  ;;  %v1869_v13 = vmul.f32 0.2, %v1805_v42  ;;  %v1887_v35 = vsel %vm1855_vm4, %v1813_v6, %v1871_v52  ;;  %v1826_v14 = vadd.f32 %v6242_v53, %v7577_v34 }
 0x53b   : > { %v1817_v55 = vpop.f32.mrf.mxu1  ;;  %v1907_v37 = vpack.c.bf16 %v1887_v35, %v1886_v49 }
 0x53c   : > { %v1885_v62 = vsel %vm1853_vm5, %v1805_v42, %v1869_v13  ;;  %v1818_v57 = vadd.f32 %v7577_v34, %v1817_v55  ;;  %v1874_v23 = vmul.f32 0.2, %v1826_v14  ;;  %vm1858_vm11 = vcmp.ge.f32.partialorder %v1826_v14, 0.0 }
 0x53d   : > { %v1906_v25 = vpack.c.bf16 %v1885_v62, %v1884_v15  ;;  %v6243_v16 = vpop.f32.mrf.mxu1 }
 0x53e   : > { %v1829_v26 = vadd.f32 %v6243_v16, %v7577_v34  ;;  %v1872_v1 = vmul.f32 0.2, %v1818_v57  ;;  %vm1856_vm10 = vcmp.ge.f32.partialorder %v1818_v57, 0.0  ;;  %v1890_v35 = vsel %vm1858_vm11, %v1826_v14, %v1874_v23 }
 0x53f   : > { %v1820_v28 = vpop.f32.mrf.mxu1  ;;  %6260 = vmatprep.mubr.msk.bf16.mxu0 %vm1512_vm12, %v1906_v25 }
 0x540   : > { %vm1859_vm9 = vcmp.ge.f32.partialorder %v1829_v26, 0.0  ;;  %v1875_v8 = vmul.f32 0.2, %v1829_v26  ;;  %v1821_v6 = vadd.f32 %v7577_v34, %v1820_v28  ;;  %6261 = vmatmul.mubr.msk.bf16.gmra.mxu0 %vm1512_vm12, %v1907_v37  ;;  %v1888_v11 = vsel %vm1856_vm10, %v1818_v57, %v1872_v1 }
 0x541   : > { %v6246_v60 = vpop.f32.mrf.mxu1 }
 0x542   : > { %vm1857_vm13 = vcmp.ge.f32.partialorder %v1821_v6, 0.0  ;;  %v1873_v51 = vmul.f32 0.2, %v1821_v6  ;;  %v1891_v52 = vsel %vm1859_vm9, %v1829_v26, %v1875_v8  ;;  %v1842_v15 = vadd.f32 %v6246_v60, %v7577_v34 }
 0x543   : > { %v1833_v42 = vpop.f32.mrf.mxu1  ;;  %v1909_v49 = vpack.c.bf16 %v1891_v52, %v1890_v35  ;;  %v7613_v35 = vpop.permute.xlu0 %2095 }
 0x544   : > { %v1889_v53 = vsel %vm1857_vm13, %v1821_v6, %v1873_v51  ;;  %v1834_v13 = vadd.f32 %v7577_v34, %v1833_v42  ;;  %v1878_v57 = vmul.f32 0.2, %v1842_v15  ;;  %vm1862_vm0 = vcmp.ge.f32.partialorder %v1842_v15, 0.0  ;;  %9412 = vst [vmem:[#allocation44_spill] sm:$0xff] %v7613_v35 }
 0x545   : > { %v1908_v55 = vpack.c.bf16 %v1889_v53, %v1888_v11  ;;  %v6247_v62 = vpop.f32.mrf.mxu1  ;;  %v5677_v11 = vld [vmem:[%s9316_s6 + $0xf] ss:$0 sm:$0xff] }
 0x546   : > { %v1845_v25 = vadd.f32 %v6247_v62, %v7577_v34  ;;  %v1876_v37 = vmul.f32 0.2, %v1834_v13  ;;  %vm1860_vm15 = vcmp.ge.f32.partialorder %v1834_v13, 0.0  ;;  %v1894_v23 = vsel %vm1862_vm0, %v1842_v15, %v1878_v57 }
 0x547   : > { %v1836_v16 = vpop.f32.mrf.mxu1  ;;  %6264 = vmatprep.mubr.msk.bf16.mxu0 %vm1512_vm12, %v1908_v55 }
 0x548   : > { %vm1863_vm14 = vcmp.ge.f32.partialorder %v1845_v25, 0.0  ;;  %v1879_v28 = vmul.f32 0.2, %v1845_v25  ;;  %v1837_v26 = vadd.f32 %v7577_v34, %v1836_v16  ;;  %6265 = vmatmul.mubr.msk.bf16.gmra.mxu0 %vm1512_vm12, %v1909_v49  ;;  %v1892_v8 = vsel %vm1860_vm15, %v1834_v13, %v1876_v37  ;;  %v5690_v34 = vld [vmem:[%s9314_s4 + $0x4] sm:$0xf] }
 0x549   : > { %6545 = vmatprep.subr.msk.bf16.mxu1 %vm1297_vm3, %v5690_v34  ;;  %v2341_v52 = vsel %vm1297_vm3, %v5690_v34, 0 }
 0x54a   : > { %vm1861_vm1 = vcmp.ge.f32.partialorder %v1837_v26, 0.0  ;;  %v1877_v14 = vmul.f32 0.2, %v1837_v26  ;;  %v1895_v1 = vsel %vm1863_vm14, %v1845_v25, %v1879_v28  ;;  %6273 = vmatpush3.bf16.msra.mxu1 %v2341_v52 }
 0x54b   : > { %v1911_v51 = vpack.c.bf16 %v1895_v1, %v1894_v23 }
 0x54c   : > { %v1893_v6 = vsel %vm1861_vm1, %v1837_v26, %v1877_v14 }
 0x54d   : > { %v1910_v60 = vpack.c.bf16 %v1893_v6, %v1892_v8 }
 0x54f   : > { %6268 = vmatprep.mubr.msk.bf16.mxu0 %vm1512_vm12, %v1910_v60 }
 0x550   : > { %6269 = vmatmul.mubr.msk.bf16.gmra.mxu0 %vm1512_vm12, %v1911_v51 }
 0x5f8   : > { %v6258_v42 = vpop.f32.mrf.mxu0 }
 0x5f9   : > { %v7622_v37 = vadd.f32 %v6258_v42, %v5677_v11 }
 0x5fa   : > { %v1999_v53 = vpop.f32.mrf.mxu0 }
 0x5fb   : > { %v7611_v13 = vadd.f32 %v5677_v11, %v1999_v53  ;;  %v2100_v8 = vmul.f32 %v7613_v35, %v7622_v37 }
 0x5fc   : > { %v6259_v55 = vpop.f32.mrf.mxu0 }
 0x5fd   : > { %v2098_v15 = vmul.f32 %v7613_v35, %v7611_v13  ;;  %v7617_v62 = vadd.f32 %v6259_v55, %v5677_v11  ;;  %6657 = vtanh.f32 %v7611_v13 }
 0x5fe   : > { %v2002_v49 = vpop.f32.mrf.mxu0 }
 0x5ff   : > { %v7619_v25 = vadd.f32 %v5677_v11, %v2002_v49  ;;  %2178 = vrot.lane.b32.xlu0 %v2098_v15, %s6994_s9  ;;  %v2101_v28 = vmul.f32 %v7613_v35, %v7617_v62  ;;  %6659 = vtanh.f32 %v7617_v62 }
 0x600   : > { %v6262_v16 = vpop.f32.mrf.mxu0 }
 0x601   : > { %v2099_v26 = vmul.f32 %v7613_v35, %v7619_v25  ;;  %v2024_v51 = vadd.f32 %v6262_v16, %v5677_v11  ;;  %6661 = vtanh.f32 %v7619_v25 }
 0x602   : > { %v2015_v57 = vpop.f32.mrf.mxu0  ;;  %6663 = vtanh.f32 %v7622_v37 }
 0x603   : > { %2180 = vrot.lane.b32.xlu1 %v2099_v26, %s6994_s9  ;;  %2184 = vrot.lane.b32.xlu0 %v2101_v28, %s6994_s9  ;;  %v2016_v1 = vadd.f32 %v5677_v11, %v2015_v57  ;;  %v2104_v15 = vmul.f32 %v7613_v35, %v2024_v51 }
 0x604   : > { %v6263_v14 = vpop.f32.mrf.mxu0 }
 0x605   : > { %v2102_v34 = vmul.f32 %v7613_v35, %v2016_v1  ;;  %v2027_v52 = vadd.f32 %v6263_v14, %v5677_v11  ;;  %6665 = vtanh.f32 %v2016_v1 }
 0x606   : > { %v2018_v6 = vpop.f32.mrf.mxu0 }
 0x607   : > { %v2019_v23 = vadd.f32 %v5677_v11, %v2018_v6  ;;  %2182 = vrot.lane.b32.xlu1 %v2100_v8, %s6994_s9  ;;  %v2105_v49 = vmul.f32 %v7613_v35, %v2027_v52 }
 0x608   : > { %v6266_v60 = vpop.f32.mrf.mxu0 }
 0x609   : > { %v2103_v42 = vmul.f32 %v7613_v35, %v2019_v23  ;;  %v2040_v14 = vadd.f32 %v6266_v60, %v5677_v11  ;;  %6667 = vtanh.f32 %v2019_v23 }
 0x60a   : > { %v2031_v53 = vpop.f32.mrf.mxu0  ;;  %6669 = vtanh.f32 %v2024_v51 }
 0x60b   : > { %2186 = vrot.lane.b32.xlu1 %v2102_v34, %s6994_s9  ;;  %2188 = vrot.lane.b32.xlu0 %v2103_v42, %s6994_s9  ;;  %v2032_v28 = vadd.f32 %v5677_v11, %v2031_v53  ;;  %v2108_v53 = vmul.f32 %v7613_v35, %v2040_v14  ;;  %6671 = vtanh.f32 %v2027_v52 }
 0x60c   : > { %v6267_v55 = vpop.f32.mrf.mxu0 }
 0x60d   : > { %v2106_v8 = vmul.f32 %v7613_v35, %v2032_v28  ;;  %v2043_v6 = vadd.f32 %v6267_v55, %v5677_v11  ;;  %6673 = vtanh.f32 %v2032_v28 }
 0x60e   : > { %v2034_v26 = vpop.f32.mrf.mxu0 }
 0x60f   : > { %v2035_v57 = vadd.f32 %v5677_v11, %v2034_v26  ;;  %2190 = vrot.lane.b32.xlu1 %v2104_v15, %s6994_s9  ;;  %2192 = vrot.lane.b32.xlu0 %v2105_v49, %s6994_s9  ;;  %v2109_v26 = vmul.f32 %v7613_v35, %v2043_v6 }
 0x610   : > { %v6270_v16 = vpop.f32.mrf.mxu0 }
 0x611   : > { %v2107_v34 = vmul.f32 %v7613_v35, %v2035_v57  ;;  %v2056_v60 = vadd.f32 %v6270_v16, %v5677_v11  ;;  %v6622_v16 = vld [vmem:[%s9315_s5 + $0x70] sm:$0xff]   ;;  %6675 = vtanh.f32 %v2035_v57 }
 0x612   : > { %v2047_v42 = vpop.f32.mrf.mxu0  ;;  %6677 = vtanh.f32 %v2040_v14 }
 0x613   : > { %2194 = vrot.lane.b32.xlu1 %v2106_v8, %s6994_s9  ;;  %2196 = vrot.lane.b32.xlu0 %v2107_v34, %s6994_s9  ;;  %v2048_v15 = vadd.f32 %v5677_v11, %v2047_v42  ;;  %v2112_v34 = vmul.f32 %v7613_v35, %v2056_v60  ;;  %6679 = vtanh.f32 %v2043_v6 }
 0x614   : > { %v6271_v56 = vpop.f32.mrf.mxu0 }
 0x615   : > { %v2110_v55 = vmul.f32 %v7613_v35, %v2048_v15  ;;  %v2059_v33 = vadd.f32 %v6271_v56, %v5677_v11  ;;  %v6658_v56 = vpop.eup %6657 }
 0x616   : > { %v2050_v24 = vpop.f32.mrf.mxu0 }
 0x617   : > { %v2051_v49 = vadd.f32 %v5677_v11, %v2050_v24  ;;  %2198 = vrot.lane.b32.xlu1 %v2108_v53, %s6994_s9  ;;  %2200 = vrot.lane.b32.xlu0 %v2109_v26, %s6994_s9  ;;  %v2113_v42 = vmul.f32 %v7613_v35, %v2059_v33  ;;  %v6621_v24 = vld [vmem:[%s9315_s5 + $0x78] sm:$0xff]   ;;  %v6660_v11 = vpop.eup %6659  ;;  %v7670_v53 = vmul.f32 %v6658_v56, %v7253_v63 }
 0x618   : > { %6290 = vmatprep.subr.bf16.mxu0 %v6621_v24  ;;  %v6662_v26 = vpop.eup %6661 }
 0x619   : > { %v2111_v8 = vmul.f32 %v7613_v35, %v2051_v49  ;;  %6291 = vmatpush3.bf16.msra.mxu0 %v6621_v24  ;;  %9413 = vst [vmem:[#allocation45_spill] sm:$0xff] %v7670_v53  ;;  %v6664_v13 = vpop.eup %6663  ;;  %v7676_v62 = vmul.f32 %v6662_v26, %v7253_v63  ;;  %v2114_v25 = vmul.f32 1.442695, %v7670_v53 }
 0x61a   : > { %6292 = vmatprep.subr.bf16.mxu0 %v6622_v16  ;;  %v7681_v1 = vmul.f32 %v6664_v13, %v7253_v63  ;;  %v6666_v23 = vpop.eup %6665 }
 0x61b   : > { %2202 = vrot.lane.b32.xlu1 %v2110_v55, %s6994_s9  ;;  %2204 = vrot.lane.b32.xlu0 %v2111_v8, %s6994_s9  ;;  %v7673_v55 = vmul.f32 %v6660_v11, %v7253_v63  ;;  %9415 = vst [vmem:[#allocation47_spill] sm:$0xff] %v7676_v62  ;;  %v6668_v51 = vpop.eup %6667  ;;  %6681 = vpow2.f32 %v2114_v25  ;;  %v2116_v52 = vmul.f32 1.442695, %v7676_v62  ;;  %v7685_v28 = vmul.f32 %v6666_v23, %v7253_v63 }
 0x61c   : > { %9416 = vst [vmem:[#allocation48_spill] sm:$0xff] %v7681_v1  ;;  %v2118_v57 = vmul.f32 1.442695, %v7681_v1  ;;  %v7689_v8 = vmul.f32 %v6668_v51, %v7253_v63 }
 0x61d   : > { %6293 = vmatpush3.bf16.msra.mxu0 %v6622_v16  ;;  %9414 = vst [vmem:[#allocation46_spill] sm:$0xff] %v7673_v55  ;;  %v2120_v37 = vmul.f32 1.442695, %v7673_v55  ;;  %9417 = vst [vmem:[#allocation49_spill] sm:$0xff] %v7685_v28  ;;  %v2122_v6 = vmul.f32 1.442695, %v7685_v28 }
 0x61e   : > { %9418 = vst [vmem:[#allocation50_spill] sm:$0xff] %v7689_v8  ;;  %v2124_v24 = vmul.f32 1.442695, %v7689_v8  ;;  %v6914_v28 = vld [vmem:[%s7260_s17 + $0x8] sm:$0xff] }
 0x61f   : > { %2206 = vrot.lane.b32.xlu1 %v2112_v34, %s6994_s9  ;;  %2208 = vrot.lane.b32.xlu0 %v2113_v42, %s6994_s9  ;;  %6683 = vpow2.f32 %v2120_v37  ;;  %v6670_v34 = vpop.eup %6669 }
 0x620   : > { %6685 = vtanh.f32 %v2048_v15  ;;  %v6672_v14 = vpop.eup %6671  ;;  %v7693_v42 = vmul.f32 %v6670_v34, %v7253_v63 }
 0x621   : > { %6687 = vtanh.f32 %v2051_v49  ;;  %v6674_v15 = vpop.eup %6673  ;;  %v7697_v56 = vmul.f32 %v6672_v14, %v7253_v63  ;;  %v6913_v14 = vld [vmem:[%s7260_s17] sm:$0xff] }
 0x622   : > { %6689 = vpow2.f32 %v2116_v52  ;;  %9419 = vst [vmem:[#allocation51_spill] sm:$0xff] %v7693_v42  ;;  %v6676_v16 = vpop.eup %6675  ;;  %v2126_v11 = vmul.f32 1.442695, %v7693_v42  ;;  %v6915_v42 = vld [vmem:[%s7260_s17 + $0x18] sm:$0xff] }
 0x623   : > { %3137 = vrot.lane.b32.xlu1 %v7265_v4, %s6993_s19  ;;  %6691 = vtanh.f32 %v2056_v60  ;;  %9420 = vst [vmem:[#allocation52_spill] sm:$0xff] %v7697_v56  ;;  %v6678_v49 = vpop.eup %6677  ;;  %v7700_v60 = vmul.f32 %v6674_v15, %v7253_v63  ;;  %v7704_v13 = vmul.f32 %v6676_v16, %v7253_v63  ;;  %v2128_v25 = vmul.f32 1.442695, %v7697_v56 }
 0x624   : > { %6693 = vpow2.f32 %v2118_v57  ;;  %v6680_v26 = vpop.eup %6679  ;;  %v7708_v51 = vmul.f32 %v6678_v49, %v7253_v63 }
 0x625   : > { %6695 = vtanh.f32 %v2059_v33  ;;  %9421 = vst [vmem:[#allocation53_spill] sm:$0xff] %v7700_v60  ;;  %9422 = vst [vmem:[#allocation54_spill] sm:$0xff] %v7704_v13  ;;  %v7711_v52 = vmul.f32 %v6680_v26, %v7253_v63  ;;  %v2130_v57 = vmul.f32 1.442695, %v7700_v60 }
 0x626   : > { %6697 = vpow2.f32 %v2122_v6  ;;  %9423 = vst [vmem:[#allocation55_spill] sm:$0xff] %v7708_v51  ;;  %v2134_v60 = vmul.f32 1.442695, %v7708_v51 }
 0x627   : > { %6699 = vpow2.f32 %v2124_v24  ;;  %9424 = vst [vmem:[#allocation56_spill] sm:$0xff] %v7711_v52  ;;  %v2132_v24 = vmul.f32 1.442695, %v7704_v13 }
 0x628   : > { %v6682_v33 = vpop.eup %6681  ;;  %6701 = vpow2.f32 %v2126_v11 }
 0x629   : > { %v2146_v6 = vmul.f32 %v6913_v14, %v6682_v33  ;;  %6703 = vpow2.f32 %v2128_v25  ;;  %v2136_v33 = vmul.f32 1.442695, %v7711_v52 }
 0x62a   : > { %6705 = vpow2.f32 %v2130_v57 }
 0x62b   : > { %6707 = vpow2.f32 %v2132_v24 }
 0x62c   : > { %v6684_v37 = vpop.eup %6683  ;;  %6709 = vpow2.f32 %v2134_v60  ;;  %v6917_v60 = vld [vmem:[%s7260_s17 + $0x20] sm:$0xff] }
 0x62d   : > { %v6686_v23 = vpop.eup %6685  ;;  %v2149_v62 = vmul.f32 %v6915_v42, %v6684_v37  ;;  %6711 = vpow2.f32 %v2136_v33 }
 0x62e   : > { %v6688_v34 = vpop.eup %6687  ;;  %v7717_v49 = vmul.f32 %v6686_v23, %v7253_v63 }
 0x62f   : > { %v6690_v15 = vpop.eup %6689  ;;  %v7720_v11 = vmul.f32 %v6688_v34, %v7253_v63 }
 0x630   : > { %v6692_v8 = vpop.eup %6691  ;;  %9425 = vst [vmem:[#allocation57_spill] sm:$0xff] %v7717_v49  ;;  %v2147_v25 = vmul.f32 %v6914_v28, %v6690_v15  ;;  %v2138_v51 = vmul.f32 1.442695, %v7717_v49 }
 0x631   : > { %v6694_v26 = vpop.eup %6693  ;;  %9426 = vst [vmem:[#allocation58_spill] sm:$0xff] %v7720_v11  ;;  %v7728_v23 = vmul.f32 %v6692_v8, %v7253_v63  ;;  %v2140_v42 = vmul.f32 1.442695, %v7720_v11 }
 0x632   : > { %v6696_v14 = vpop.eup %6695  ;;  %6713 = vpow2.f32 %v2138_v51 }
 0x633   : > { %9427 = vst [vmem:[#allocation59_spill] sm:$0xff] %v7728_v23  ;;  %v6698_v55 = vpop.eup %6697  ;;  %v7732_v52 = vmul.f32 %v6696_v14, %v7253_v63  ;;  %6715 = vpow2.f32 %v2140_v42 }
 0x634   : > { %v6700_v37 = vpop.eup %6699 }
 0x635   : > { %9428 = vst [vmem:[#allocation60_spill] sm:$0xff] %v7732_v52 }
 0x671   : > { %v2179_v16 = vpop.permute.xlu0 %2178 }
 0x672   : > { %v2226_v56 = vadd.f32 %v2179_v16, %v2146_v6 }
 0x674   : > { %v2242_v13 = vmul.f32 %v7253_v63, %v2226_v56  ;;  %v6916_v56 = vld [vmem:[%s7260_s17 + $0x10] sm:$0xff] }
 0x675   : > { %v2181_v6 = vpop.permute.xlu1 %2180  ;;  %v2185_v34 = vpop.permute.xlu0 %2184  ;;  %v2148_v28 = vmul.f32 %v6916_v56, %v6694_v26  ;;  %v2150_v26 = vmul.f32 %v6917_v60, %v6698_v55  ;;  %v6919_v60 = vld [vmem:[%s7260_s17 + $0x30] sm:$0xff] }
 0x676   : > { %v2227_v16 = vadd.f32 %v2181_v6, %v2147_v25  ;;  %v2229_v57 = vadd.f32 %v2185_v34, %v2149_v62  ;;  %v7737_v8 = vadd.f32 %v2242_v13, %v7274_v58  ;;  %v2142_v25 = vmul.f32 1.442695, %v7728_v23  ;;  %v6918_v34 = vld [vmem:[%s7260_s17 + $0x28] sm:$0xff]  ;;  %v6702_v13 = vpop.eup %6701 }
 0x677   : > { %v2151_v56 = vmul.f32 %v6918_v34, %v6700_v37  ;;  %v2144_v58 = vmul.f32 1.442695, %v7732_v52  ;;  %v2152_v34 = vmul.f32 %v6919_v60, %v6702_v13 }
 0x678   : > { %v2243_v24 = vmul.f32 %v7253_v63, %v2227_v16  ;;  %v2245_v62 = vmul.f32 %v7253_v63, %v2229_v57  ;;  %v7750_v33 = vmul.f32 %v7253_v63, %v7737_v8  ;;  %6717 = vpow2.f32 %v2142_v25 }
 0x679   : > { %v2183_v15 = vpop.permute.xlu1 %2182  ;;  %6719 = vpow2.f32 %v2144_v58  ;;  %v6920_v58 = vld [vmem:[%s7260_s17 + $0x38] sm:$0xff] }
 0x67a   : > { %v7743_v14 = vadd.f32 %v2243_v24, %v7277_v10  ;;  %v2228_v6 = vadd.f32 %v2183_v15, %v2148_v28  ;;  %v7757_v10 = vadd.f32 %v2245_v62, %v7291_v19  ;;  %v6704_v28 = vpop.eup %6703 }
 0x67b   : > { %v6706_v19 = vpop.eup %6705  ;;  %v2153_v13 = vmul.f32 %v6920_v58, %v6704_v28 }
 0x67c   : > { %v7754_v16 = vmul.f32 %v7253_v63, %v7743_v14  ;;  %v2244_v55 = vmul.f32 %v7253_v63, %v2228_v6  ;;  %v7768_v62 = vmul.f32 %v7253_v63, %v7757_v10 }
 0x67d   : > { %v2187_v51 = vpop.permute.xlu1 %2186  ;;  %v2189_v57 = vpop.permute.xlu0 %2188 }
 0x67e   : > { %v7761_v42 = vadd.f32 %v2244_v55, %v7288_v18  ;;  %v2230_v37 = vadd.f32 %v2187_v51, %v2150_v26  ;;  %v2231_v24 = vadd.f32 %v2189_v57, %v2151_v56  ;;  %v2308_v15 = vpack.c.bf16 %v7754_v16, %v7750_v33  ;;  %v6708_v26 = vpop.eup %6707 }
 0x680   : > { %v7772_v25 = vmul.f32 %v7253_v63, %v7761_v42  ;;  %v2246_v18 = vmul.f32 %v7253_v63, %v2230_v37  ;;  %v2247_v6 = vmul.f32 %v7253_v63, %v2231_v24  ;;  %6274 = vmatprep.mubr.msk.bf16.mxu1 %vm1272_vm8, %v2308_v15  ;;  %v6921_v24 = vld [vmem:[%s7260_s17 + $0x40] sm:$0xff]  ;;  %v6710_v15 = vpop.eup %6709 }
 0x681   : > { %v2191_v56 = vpop.permute.xlu1 %2190  ;;  %v2193_v55 = vpop.permute.xlu0 %2192  ;;  %v2154_v52 = vmul.f32 %v6921_v24, %v6706_v19 }
 0x682   : > { %v2309_v51 = vpack.c.bf16 %v7768_v62, %v7772_v25  ;;  %v7781_v57 = vadd.f32 %v2246_v18, %v7295_v20  ;;  %v7784_v60 = vadd.f32 %v2247_v6, %v7298_v21  ;;  %v2232_v37 = vadd.f32 %v2191_v56, %v2152_v34  ;;  %v6922_v21 = vld [vmem:[%s7260_s17 + $0x48] sm:$0xff]  ;;  %v6712_v34 = vpop.eup %6711 }
 0x683   : > { %v2233_v11 = vadd.f32 %v2193_v55, %v2153_v13  ;;  %v2155_v18 = vmul.f32 %v6922_v21, %v6708_v26  ;;  %v6714_v23 = vpop.eup %6713 }
 0x684   : > { %v7789_v49 = vmul.f32 %v7253_v63, %v7781_v57  ;;  %v7793_v28 = vmul.f32 %v7253_v63, %v7784_v60  ;;  %v2248_v20 = vmul.f32 %v7253_v63, %v2232_v37  ;;  %6275 = vmatmul.mubr.msk.bf16.vlgmr.msra.gmra.mxu1 %vm1272_vm8, %v2309_v51  ;;  %v6923_v51 = vld [vmem:[%s7260_s17 + $0x50] sm:$0xff]  ;;  %v6716_v21 = vpop.eup %6715 }
 0x685   : > { %v2249_v6 = vmul.f32 %v7253_v63, %v2233_v11  ;;  %v2195_v19 = vpop.permute.xlu1 %2194  ;;  %v2197_v56 = vpop.permute.xlu0 %2196  ;;  %v2156_v26 = vmul.f32 %v6923_v51, %v6710_v15 }
 0x686   : > { %v7800_v58 = vadd.f32 %v2248_v20, %v7310_v29  ;;  %v2234_v13 = vadd.f32 %v2195_v19, %v2154_v52  ;;  %v2235_v55 = vadd.f32 %v2197_v56, %v2155_v18  ;;  %v2310_v24 = vpack.c.bf16 %v7793_v28, %v7789_v49  ;;  %v6924_v20 = vld [vmem:[%s7260_s17 + $0x58] sm:$0xff]  ;;  %v6718_v19 = vpop.eup %6717 }
 0x687   : > { %v7805_v37 = vadd.f32 %v2249_v6, %v7313_v30  ;;  %v2157_v18 = vmul.f32 %v6924_v20, %v6712_v34  ;;  %v6926_v20 = vld [vmem:[%s7260_s17 + $0x68] sm:$0xff]  ;;  %v6720_v35 = vpop.eup %6719 }
 0x688   : > { %v7810_v11 = vmul.f32 %v7253_v63, %v7800_v58  ;;  %v2250_v29 = vmul.f32 %v7253_v63, %v2234_v13  ;;  %v2251_v52 = vmul.f32 %v7253_v63, %v2235_v55  ;;  %6278 = vmatprep.mubr.msk.bf16.mxu1 %vm1272_vm8, %v2310_v24  ;;  %v6925_v24 = vld [vmem:[%s7260_s17 + $0x60] sm:$0xff]  ;;  %v2159_v1 = vmul.f32 %v6926_v20, %v6716_v21 }
 0x689   : > { %v7818_v30 = vmul.f32 %v7253_v63, %v7805_v37  ;;  %v2199_v15 = vpop.permute.xlu1 %2198  ;;  %v2201_v6 = vpop.permute.xlu0 %2200  ;;  %v2158_v34 = vmul.f32 %v6925_v24, %v6714_v23  ;;  %v6927_v24 = vld [vmem:[%s7260_s17 + $0x70] sm:$0xff] }
 0x68a   : > { %v7821_v56 = vadd.f32 %v2250_v29, %v7317_v31  ;;  %v7824_v51 = vadd.f32 %v2251_v52, %v7320_v32  ;;  %v2236_v13 = vadd.f32 %v2199_v15, %v2156_v26  ;;  %v2237_v53 = vadd.f32 %v2201_v6, %v2157_v18 }
 0x68b   : > { %v2311_v55 = vpack.c.bf16 %v7818_v30, %v7810_v11  ;;  %v2160_v20 = vmul.f32 %v6927_v24, %v6718_v19 }
 0x68c   : > { %v7832_v27 = vmul.f32 %v7253_v63, %v7821_v56  ;;  %v7836_v31 = vmul.f32 %v7253_v63, %v7824_v51  ;;  %v2252_v32 = vmul.f32 %v7253_v63, %v2236_v13  ;;  %v2253_v26 = vmul.f32 %v7253_v63, %v2237_v53  ;;  %v6928_v13 = vld [vmem:[%s7260_s17 + $0x78] sm:$0xff]  ;;  %s286_s17 = sand.u32 1, %s6981_s25  }
 0x68d   : > { %6279 = vmatmul.mubr.msk.bf16.gmra.mxu1 %vm1272_vm8, %v2311_v55  ;;  %v2203_v23 = vpop.permute.xlu1 %2202  ;;  %v2205_v29 = vpop.permute.xlu0 %2204  ;;  %v2161_v43 = vmul.f32 %v6928_v13, %v6720_v35  ;;  %v6624_v13 = vld [vmem:[%s9315_s5 + $0x60] sm:$0xff]   ;;  %s5580_s18 = sshll.u32 %s286_s17, 7 }
 0x68e   : > { %v7842_v21 = vadd.f32 %v2252_v32, %v7332_v38  ;;  %v7845_v52 = vadd.f32 %v2253_v26, %v7335_v39  ;;  %v2238_v18 = vadd.f32 %v2203_v23, %v2158_v34  ;;  %v2239_v15 = vadd.f32 %v2205_v29, %v2159_v1  ;;  %s9153_s20 = scalar_lea.vmem [#allocation2], %s5580_s18 }
 0x68f   : > { %v2312_v6 = vpack.c.bf16 %v7836_v31, %v7832_v27  ;;  %s5502_s21 = sshll.u32 %s9153_s20, 4  ;;  %s9263_s21 = int_to_ptr.vmem [resolvable:$true] %s5502_s21 }
 0x690   : > { %v7853_v53 = vmul.f32 %v7253_v63, %v7842_v21  ;;  %v7857_v38 = vmul.f32 %v7253_v63, %v7845_v52  ;;  %v2254_v39 = vmul.f32 %v7253_v63, %v2238_v18  ;;  %v2255_v55 = vmul.f32 %v7253_v63, %v2239_v15  ;;  %s6929_s8 = scalar_lea.vmem %s9263_s21, 2048  ;;  %p6936_p0 = scmp.lt.s32.totalorder %s9263_s21, %s6934_s14 }
 0x691   : > { %6282 = vmatprep.mubr.msk.bf16.mxu1 %vm1272_vm8, %v2312_v6  ;;  %v2207_v1 = vpop.permute.xlu1 %2206  ;;  %v2209_v34 = vpop.permute.xlu0 %2208  ;;  %p6930_p11 = scmp.ne.s32.totalorder %s9263_s21, %s6929_s8  ;;  %p6937_p1 = scmp.lt.s32.totalorder %s6935_s16, %s6929_s8 }
 0x692   : > { %v7863_v19 = vadd.f32 %v2254_v39, %v7339_v40  ;;  %v7866_v35 = vadd.f32 %v2255_v55, %v7342_v41  ;;  %v2240_v32 = vadd.f32 %v2207_v1, %v2160_v20  ;;  %v2241_v26 = vadd.f32 %v2209_v34, %v2161_v43  ;;  %v6625_v39 = vld [vmem:[%s9315_s5 + $0x98] sm:$0xff]   ;;  %v6626_v55 = vld [vmem:[%s9315_s5 + $0x90] sm:$0xff]   ;;  %v6627_v1 = vld [vmem:[%s9315_s5 + $0x88] sm:$0xff]  }
 0x693   : > { %v2313_v23 = vpack.c.bf16 %v7857_v38, %v7853_v53  ;;  %6314 = vmatprep.subr.bf16.mxu1 %v6625_v39  ;;  %p6931_p12 = pnand %p6930_p11, %p7075_p5  ;;  %p6938_p2 = por %p6937_p1, %p6936_p0 }
 0x694   : > { %v7872_v29 = vmul.f32 %v7253_v63, %v7863_v19  ;;  %v7876_v18 = vmul.f32 %v7253_v63, %v7866_v35  ;;  %v2256_v15 = vmul.f32 %v7253_v63, %v2240_v32  ;;  %v2257_v40 = vmul.f32 %v7253_v63, %v2241_v26  ;;  %6315 = vmatpush3.bf16.msra.mxu1 %v6625_v39 }
 0x695   : > { %6283 = vmatmul.mubr.msk.bf16.gmra.mxu1 %vm1272_vm8, %v2313_v23  ;;  %6316 = vmatprep.subr.bf16.mxu1 %v6626_v55  ;;  %p6932_p13 = pneg %p6931_p12 }
 0x696   : > { %v7882_v41 = vadd.f32 %v2256_v15, %v7352_v47  ;;  %v7885_v43 = vadd.f32 %v2257_v40, %v7355_v48  ;;  %v2314_v6 = vpack.c.bf16 %v7876_v18, %v7872_v29  ;;  %v6623_v48 = vld [vmem:[%s9315_s5 + $0x68] sm:$0xff]   ;;  %v7921_v15 = vld [vmem:[%s9316_s6 + $0x4] ss:$0 sm:$0xff] }
 0x697   : > { %6294 = vmatprep.subr.bf16.mxu0 %v6623_v48  ;;  %p6939_p3 = pnand %p6938_p2, %p6932_p13 }
 0x698   : > { %v7891_v24 = vmul.f32 %v7253_v63, %v7882_v41  ;;  %v7895_v20 = vmul.f32 %v7253_v63, %v7885_v43  ;;  %6286 = vmatprep.mubr.msk.bf16.mxu1 %vm1272_vm8, %v2314_v6  ;;  %6295 = vmatpush3.bf16.msra.mxu0 %v6623_v48 }
 0x699   : > { %6296 = vmatprep.subr.bf16.mxu0 %v6624_v13  ;;  %6317 = vmatpush3.bf16.msra.mxu1 %v6626_v55 }
 0x69a   : > { %v2315_v47 = vpack.c.bf16 %v7895_v20, %v7891_v24  ;;  %6318 = vmatprep.subr.bf16.mxu1 %v6627_v1 }
 0x69c   : > { %6297 = vmatpush3.bf16.msra.mxu0 %v6624_v13 }
 0x69d   : > { %6287 = vmatmul.mubr.msk.bf16.gmra.mxu1 %vm1272_vm8, %v2315_v47 }
 0x69e   : > { %6319 = vmatpush3.bf16.msra.mxu1 %v6627_v1 }
 0x744   : > { %v6276_v34 = vpop.f32.mrf.mxu1 }
 0x745   : > { %v2386_v26 = vadd.f32 %v6276_v34, %v7386_v0 }
 0x746   : > { %v2377_v32 = vpop.f32.mrf.mxu1 }
 0x747   : > { %v2378_v23 = vadd.f32 %v2377_v32, %v7382_v59  ;;  %v2447_v13 = vadd.f32 %v7921_v15, %v2386_v26 }
 0x748   : > { %v6277_v40 = vpop.f32.mrf.mxu1 }
 0x749   : > { %v2389_v6 = vadd.f32 %v6277_v40, %v7388_v2  ;;  %v2445_v47 = vadd.f32 %v7921_v15, %v2378_v23  ;;  %v2479_v32 = vmul.f32 0.2, %v2447_v13  ;;  %vm2463_vm6 = vcmp.ge.f32.partialorder %v2447_v13, 0.0 }
 0x74a   : > { %v2380_v48 = vpop.f32.mrf.mxu1 }
 0x74b   : > { %v2448_v39 = vadd.f32 %v7921_v15, %v2389_v6  ;;  %v2381_v55 = vadd.f32 %v2380_v48, %v7384_v61  ;;  %v2477_v59 = vmul.f32 0.2, %v2445_v47  ;;  %vm2461_vm4 = vcmp.ge.f32.partialorder %v2445_v47, 0.0 }
 0x74c   : > { %v2495_v36 = vsel %vm2463_vm6, %v2447_v13, %v2479_v32  ;;  %v9430_v32 = vld [vmem:[#allocation9_spill] sm:$0xff] }
 0x74d   : > { %v2480_v0 = vmul.f32 0.2, %v2448_v39  ;;  %v6280_v1 = vpop.f32.mrf.mxu1  ;;  %vm2464_vm2 = vcmp.ge.f32.partialorder %v2448_v39, 0.0  ;;  %v2446_v34 = vadd.f32 %v7921_v15, %v2381_v55  ;;  %v2493_v3 = vsel %vm2461_vm4, %v2445_v47, %v2477_v59 }
 0x74e   : > { %v2402_v63 = vadd.f32 %v6280_v1, %v7394_v9 }
 0x74f   : > { %v2393_v2 = vpop.f32.mrf.mxu1  ;;  %vm2462_vm7 = vcmp.ge.f32.partialorder %v2446_v34, 0.0  ;;  %v2478_v23 = vmul.f32 0.2, %v2446_v34  ;;  %v2496_v40 = vsel %vm2464_vm2, %v2448_v39, %v2480_v0 }
 0x750   : > { %v2394_v26 = vadd.f32 %v2393_v2, %v7390_v5  ;;  %v2451_v54 = vadd.f32 %v7921_v15, %v2402_v63  ;;  %v2519_v9 = vpack.c.bf16 %v2496_v40, %v2495_v36 }
 0x751   : > { %v6281_v6 = vpop.f32.mrf.mxu1  ;;  %v2494_v61 = vsel %vm2462_vm7, %v2446_v34, %v2478_v23 }
 0x752   : > { %v2405_v48 = vadd.f32 %v6281_v6, %v7396_v12  ;;  %v2449_v55 = vadd.f32 %v7921_v15, %v2394_v26  ;;  %v2518_v46 = vpack.c.bf16 %v2494_v61, %v2493_v3  ;;  %v2483_v63 = vmul.f32 0.2, %v2451_v54  ;;  %v9431_v61 = vld [vmem:[#allocation8_spill] sm:$0xff] }
 0x753   : > { %v2396_v50 = vpop.f32.mrf.mxu1  ;;  %vm2467_vm10 = vcmp.ge.f32.partialorder %v2451_v54, 0.0 }
 0x754   : > { %v2452_v1 = vadd.f32 %v7921_v15, %v2405_v48  ;;  %v2397_v22 = vadd.f32 %v2396_v50, %v7392_v7  ;;  %6298 = vmatprep.mubr.msk.bf16.mxu0 %vm1512_vm12, %v2518_v46  ;;  %v2481_v5 = vmul.f32 0.2, %v2449_v55  ;;  %vm2465_vm9 = vcmp.ge.f32.partialorder %v2449_v55, 0.0  ;;  %v9429_v7 = vld [vmem:[#allocation7_spill] sm:$0xff] }
 0x755   : > { %v6284_v39 = vpop.f32.mrf.mxu1  ;;  %6299 = vmatmul.mubr.msk.bf16.vlgmr.msra.gmra.mxu0 %vm1512_vm12, %v2519_v9  ;;  %v2499_v23 = vsel %vm2467_vm10, %v2451_v54, %v2483_v63 }
 0x756   : > { %vm2468_vm5 = vcmp.ge.f32.partialorder %v2452_v1, 0.0  ;;  %v2484_v47 = vmul.f32 0.2, %v2452_v1  ;;  %v2450_v12 = vadd.f32 %v7921_v15, %v2397_v22  ;;  %v2418_v13 = vadd.f32 %v6284_v39, %v7406_v17 }
 0x757   : > { %v2409_v3 = vpop.f32.mrf.mxu1  ;;  %v2497_v46 = vsel %vm2465_vm9, %v2449_v55, %v2481_v5 }
 0x758   : > { %vm2466_vm11 = vcmp.ge.f32.partialorder %v2450_v12, 0.0  ;;  %v2482_v36 = vmul.f32 0.2, %v2450_v12  ;;  %v2500_v0 = vsel %vm2468_vm5, %v2452_v1, %v2484_v47  ;;  %v2410_v50 = vadd.f32 %v2409_v3, %v9429_v7  ;;  %v9432_v47 = vld [vmem:[#allocation12_spill] sm:$0xff] }
 0x759   : > { %v6285_v59 = vpop.f32.mrf.mxu1  ;;  %v2455_v22 = vadd.f32 %v7921_v15, %v2418_v13  ;;  %v2521_v9 = vpack.c.bf16 %v2500_v0, %v2499_v23 }
 0x75a   : > { %v2498_v34 = vsel %vm2466_vm11, %v2450_v12, %v2482_v36  ;;  %v2421_v2 = vadd.f32 %v6285_v59, %v9430_v32  ;;  %v2453_v40 = vadd.f32 %v7921_v15, %v2410_v50  ;;  %v9433_v36 = vld [vmem:[#allocation10_spill] sm:$0xff] }
 0x75b   : > { %v2412_v26 = vpop.f32.mrf.mxu1  ;;  %v2520_v6 = vpack.c.bf16 %v2498_v34, %v2497_v46  ;;  %v2487_v54 = vmul.f32 0.2, %v2455_v22  ;;  %vm2471_vm15 = vcmp.ge.f32.partialorder %v2455_v22, 0.0  ;;  %v9434_v46 = vld [vmem:[#allocation13_spill] sm:$0xff] }
 0x75c   : > { %v2456_v17 = vadd.f32 %v7921_v15, %v2421_v2  ;;  %v2413_v48 = vadd.f32 %v2412_v26, %v9431_v61  ;;  %v2485_v39 = vmul.f32 0.2, %v2453_v40  ;;  %vm2469_vm14 = vcmp.ge.f32.partialorder %v2453_v40, 0.0 }
 0x75d   : > { %v6288_v1 = vpop.f32.mrf.mxu1  ;;  %6302 = vmatprep.mubr.msk.bf16.mxu0 %vm1512_vm12, %v2520_v6  ;;  %v2503_v32 = vsel %vm2471_vm15, %v2455_v22, %v2487_v54 }
 0x75e   : > { %vm2472_vm13 = vcmp.ge.f32.partialorder %v2456_v17, 0.0  ;;  %v2488_v55 = vmul.f32 0.2, %v2456_v17  ;;  %v2454_v5 = vadd.f32 %v7921_v15, %v2413_v48  ;;  %6303 = vmatmul.mubr.msk.bf16.gmra.mxu0 %vm1512_vm12, %v2521_v9  ;;  %v2434_v12 = vadd.f32 %v6288_v1, %v9432_v47  ;;  %v9435_v48 = vld [vmem:[#allocation11_spill] sm:$0xff] }
 0x75f   : > { %v2425_v63 = vpop.f32.mrf.mxu1  ;;  %v2501_v50 = vsel %vm2469_vm14, %v2453_v40, %v2485_v39 }
 0x760   : > { %vm2470_vm0 = vcmp.ge.f32.partialorder %v2454_v5, 0.0  ;;  %v2486_v13 = vmul.f32 0.2, %v2454_v5  ;;  %v2504_v3 = vsel %vm2472_vm13, %v2456_v17, %v2488_v55  ;;  %v2426_v0 = vadd.f32 %v2425_v63, %v9433_v36  ;;  %v6630_v36 = vld [vmem:[%s9315_s5 + $0xb0] sm:$0xff]  }
 0x761   : > { %v6289_v7 = vpop.f32.mrf.mxu1  ;;  %v2459_v2 = vadd.f32 %v7921_v15, %v2434_v12  ;;  %v2523_v1 = vpack.c.bf16 %v2504_v3, %v2503_v32  ;;  %v6629_v3 = vld [vmem:[%s9315_s5 + $0xb8] sm:$0xff]  }
 0x762   : > { %v2502_v59 = vsel %vm2470_vm0, %v2454_v5, %v2486_v13  ;;  %v2437_v34 = vadd.f32 %v6289_v7, %v9434_v46  ;;  %v2457_v23 = vadd.f32 %v7921_v15, %v2426_v0  ;;  %6338 = vmatprep.subr.bf16.mxu0 %v6629_v3  ;;  %v6631_v0 = vld [vmem:[%s9315_s5 + $0xa8] sm:$0xff]  }
 0x763   : > { %v2428_v26 = vpop.f32.mrf.mxu1  ;;  %v2522_v6 = vpack.c.bf16 %v2502_v59, %v2501_v50  ;;  %v2491_v22 = vmul.f32 0.2, %v2459_v2  ;;  %vm2475_vm4 = vcmp.ge.f32.partialorder %v2459_v2, 0.0  ;;  %6339 = vmatpush3.bf16.msra.mxu0 %v6629_v3  ;;  %v7976_v50 = vld [vmem:[%s9316_s6 + $0x8] ss:$0 sm:$0xff] }
 0x764   : > { %v2460_v61 = vadd.f32 %v7921_v15, %v2437_v34  ;;  %v2429_v9 = vadd.f32 %v2428_v26, %v9435_v48  ;;  %v2489_v17 = vmul.f32 0.2, %v2457_v23  ;;  %vm2473_vm2 = vcmp.ge.f32.partialorder %v2457_v23, 0.0  ;;  %6340 = vmatprep.subr.bf16.mxu0 %v6630_v36 }
 0x765   : > { %6306 = vmatprep.mubr.msk.bf16.mxu0 %vm1512_vm12, %v2522_v6  ;;  %v2507_v12 = vsel %vm2475_vm4, %v2459_v2, %v2491_v22 }
 0x766   : > { %vm2476_vm1 = vcmp.ge.f32.partialorder %v2460_v61, 0.0  ;;  %v2492_v40 = vmul.f32 0.2, %v2460_v61  ;;  %v2458_v39 = vadd.f32 %v7921_v15, %v2429_v9  ;;  %6307 = vmatmul.mubr.msk.bf16.gmra.mxu0 %vm1512_vm12, %v2523_v1  ;;  %v2505_v54 = vsel %vm2473_vm2, %v2457_v23, %v2489_v17  ;;  %v6628_v15 = vld [vmem:[%s9315_s5 + $0x80] sm:$0xff]  }
 0x767   : > { %6320 = vmatprep.subr.bf16.mxu1 %v6628_v15  ;;  %6341 = vmatpush3.bf16.msra.mxu0 %v6630_v36 }
 0x768   : > { %vm2474_vm6 = vcmp.ge.f32.partialorder %v2458_v39, 0.0  ;;  %v2490_v55 = vmul.f32 0.2, %v2458_v39  ;;  %v2508_v5 = vsel %vm2476_vm1, %v2460_v61, %v2492_v40  ;;  %6321 = vmatpush3.bf16.msra.mxu1 %v6628_v15  ;;  %6342 = vmatprep.subr.bf16.mxu0 %v6631_v0 }
 0x769   : > { %v2525_v13 = vpack.c.bf16 %v2508_v5, %v2507_v12 }
 0x76a   : > { %v2506_v47 = vsel %vm2474_vm6, %v2458_v39, %v2490_v55 }
 0x76b   : > { %v2524_v63 = vpack.c.bf16 %v2506_v47, %v2505_v54  ;;  %6343 = vmatpush3.bf16.msra.mxu0 %v6631_v0 }
 0x76d   : > { %6310 = vmatprep.mubr.msk.bf16.mxu0 %vm1512_vm12, %v2524_v63 }
 0x76e   : > { %6311 = vmatmul.mubr.msk.bf16.gmra.mxu0 %vm1512_vm12, %v2525_v13 }
 0x815   : > { %v6300_v7 = vpop.f32.mrf.mxu0 }
 0x816   : > { %v2622_v34 = vadd.f32 %v6300_v7, %v7976_v50 }
 0x817   : > { %v2613_v59 = vpop.f32.mrf.mxu0 }
 0x818   : > { %v2614_v46 = vadd.f32 %v7976_v50, %v2613_v59  ;;  %v2694_v48 = vmul.f32 0.2, %v2622_v34  ;;  %vm2678_vm9 = vcmp.ge.f32.partialorder %v2622_v34, 0.0 }
 0x819   : > { %v6301_v32 = vpop.f32.mrf.mxu0 }
 0x81a   : > { %v2625_v2 = vadd.f32 %v6301_v32, %v7976_v50  ;;  %v2692_v26 = vmul.f32 0.2, %v2614_v46  ;;  %vm2676_vm5 = vcmp.ge.f32.partialorder %v2614_v46, 0.0  ;;  %v2710_v5 = vsel %vm2678_vm9, %v2622_v34, %v2694_v48 }
 0x81b   : > { %v2616_v23 = vpop.f32.mrf.mxu0 }
 0x81c   : > { %vm2679_vm7 = vcmp.ge.f32.partialorder %v2625_v2, 0.0  ;;  %v2695_v6 = vmul.f32 0.2, %v2625_v2  ;;  %v2617_v61 = vadd.f32 %v7976_v50, %v2616_v23  ;;  %v2708_v39 = vsel %vm2676_vm5, %v2614_v46, %v2692_v26 }
 0x81e   : > { %v6304_v9 = vpop.f32.mrf.mxu0  ;;  %vm2677_vm10 = vcmp.ge.f32.partialorder %v2617_v61, 0.0  ;;  %v2693_v1 = vmul.f32 0.2, %v2617_v61  ;;  %v2711_v17 = vsel %vm2679_vm7, %v2625_v2, %v2695_v6 }
 0x81f   : > { %v2638_v47 = vadd.f32 %v6304_v9, %v7976_v50  ;;  %v2733_v63 = vpack.c.bf16 %v2711_v17, %v2710_v5 }
 0x820   : > { %v2629_v40 = vpop.f32.mrf.mxu0  ;;  %v2709_v22 = vsel %vm2677_vm10, %v2617_v61, %v2693_v1 }
 0x821   : > { %v2630_v55 = vadd.f32 %v7976_v50, %v2629_v40  ;;  %v2732_v54 = vpack.c.bf16 %v2709_v22, %v2708_v39  ;;  %v2698_v7 = vmul.f32 0.2, %v2638_v47  ;;  %vm2682_vm14 = vcmp.ge.f32.partialorder %v2638_v47, 0.0 }
 0x822   : > { %v6305_v12 = vpop.f32.mrf.mxu0 }
 0x823   : > { %v2641_v13 = vadd.f32 %v6305_v12, %v7976_v50  ;;  %6322 = vmatprep.mubr.msk.bf16.mxu1 %vm1512_vm12, %v2732_v54  ;;  %v2696_v3 = vmul.f32 0.2, %v2630_v55  ;;  %vm2680_vm13 = vcmp.ge.f32.partialorder %v2630_v55, 0.0  ;;  %v2714_v6 = vsel %vm2682_vm14, %v2638_v47, %v2698_v7 }
 0x824   : > { %v2632_v15 = vpop.f32.mrf.mxu0  ;;  %6323 = vmatmul.mubr.msk.bf16.vlgmr.msra.gmra.mxu1 %vm1512_vm12, %v2733_v63 }
 0x825   : > { %vm2683_vm11 = vcmp.ge.f32.partialorder %v2641_v13, 0.0  ;;  %v2699_v36 = vmul.f32 0.2, %v2641_v13  ;;  %v2633_v0 = vadd.f32 %v7976_v50, %v2632_v15  ;;  %v2712_v2 = vsel %vm2680_vm13, %v2630_v55, %v2696_v3 }
 0x826   : > { %v6308_v59 = vpop.f32.mrf.mxu0 }
 0x827   : > { %vm2681_vm15 = vcmp.ge.f32.partialorder %v2633_v0, 0.0  ;;  %v2697_v46 = vmul.f32 0.2, %v2633_v0  ;;  %v2715_v34 = vsel %vm2683_vm11, %v2641_v13, %v2699_v36  ;;  %v2654_v48 = vadd.f32 %v6308_v59, %v7976_v50 }
 0x828   : > { %v2645_v32 = vpop.f32.mrf.mxu0  ;;  %v2735_v1 = vpack.c.bf16 %v2715_v34, %v2714_v6 }
 0x829   : > { %v2713_v23 = vsel %vm2681_vm15, %v2633_v0, %v2697_v46  ;;  %v2646_v26 = vadd.f32 %v7976_v50, %v2645_v32  ;;  %v2702_v55 = vmul.f32 0.2, %v2654_v48  ;;  %vm2686_vm2 = vcmp.ge.f32.partialorder %v2654_v48, 0.0 }
 0x82a   : > { %v2734_v61 = vpack.c.bf16 %v2713_v23, %v2712_v2  ;;  %v6309_v9 = vpop.f32.mrf.mxu0 }
 0x82b   : > { %v2657_v17 = vadd.f32 %v6309_v9, %v7976_v50  ;;  %v2700_v39 = vmul.f32 0.2, %v2646_v26  ;;  %vm2684_vm1 = vcmp.ge.f32.partialorder %v2646_v26, 0.0  ;;  %v2718_v36 = vsel %vm2686_vm2, %v2654_v48, %v2702_v55 }
 0x82c   : > { %v2648_v40 = vpop.f32.mrf.mxu0  ;;  %6326 = vmatprep.mubr.msk.bf16.mxu1 %vm1512_vm12, %v2734_v61 }
 0x82d   : > { %vm2687_vm0 = vcmp.ge.f32.partialorder %v2657_v17, 0.0  ;;  %v2703_v22 = vmul.f32 0.2, %v2657_v17  ;;  %v2649_v5 = vadd.f32 %v7976_v50, %v2648_v40  ;;  %6327 = vmatmul.mubr.msk.bf16.gmra.mxu1 %vm1512_vm12, %v2735_v1  ;;  %v2716_v13 = vsel %vm2684_vm1, %v2646_v26, %v2700_v39 }
 0x82e   : > { %v6312_v54 = vpop.f32.mrf.mxu0 }
 0x82f   : > { %vm2685_vm4 = vcmp.ge.f32.partialorder %v2649_v5, 0.0  ;;  %v2701_v47 = vmul.f32 0.2, %v2649_v5  ;;  %v2719_v12 = vsel %vm2687_vm0, %v2657_v17, %v2703_v22  ;;  %v2670_v7 = vadd.f32 %v6312_v54, %v7976_v50 }
 0x830   : > { %v2661_v63 = vpop.f32.mrf.mxu0  ;;  %v2737_v46 = vpack.c.bf16 %v2719_v12, %v2718_v36 }
 0x831   : > { %v2717_v15 = vsel %vm2685_vm4, %v2649_v5, %v2701_v47  ;;  %v2662_v3 = vadd.f32 %v7976_v50, %v2661_v63  ;;  %v2706_v26 = vmul.f32 0.2, %v2670_v7  ;;  %vm2690_vm5 = vcmp.ge.f32.partialorder %v2670_v7, 0.0  ;;  %v8008_v5 = vld [vmem:[%s9316_s6 + $0xc] ss:$0 sm:$0xff] }
 0x832   : > { %v2736_v0 = vpack.c.bf16 %v2717_v15, %v2716_v13  ;;  %v6313_v59 = vpop.f32.mrf.mxu0 }
 0x833   : > { %v2673_v34 = vadd.f32 %v6313_v59, %v7976_v50  ;;  %v2704_v2 = vmul.f32 0.2, %v2662_v3  ;;  %vm2688_vm7 = vcmp.ge.f32.partialorder %v2662_v3, 0.0  ;;  %v2722_v17 = vsel %vm2690_vm5, %v2670_v7, %v2706_v26 }
 0x834   : > { %v2664_v32 = vpop.f32.mrf.mxu0  ;;  %6330 = vmatprep.mubr.msk.bf16.mxu1 %vm1512_vm12, %v2736_v0 }
 0x835   : > { %vm2691_vm6 = vcmp.ge.f32.partialorder %v2673_v34, 0.0  ;;  %v2707_v23 = vmul.f32 0.2, %v2673_v34  ;;  %v2665_v6 = vadd.f32 %v7976_v50, %v2664_v32  ;;  %6331 = vmatmul.mubr.msk.bf16.gmra.mxu1 %vm1512_vm12, %v2737_v46  ;;  %v2720_v9 = vsel %vm2688_vm7, %v2662_v3, %v2704_v2  ;;  %v6632_v50 = vld [vmem:[%s9315_s5 + $0xa0] sm:$0xff]  }
 0x836   : > { %6344 = vmatprep.subr.bf16.mxu0 %v6632_v50 }
 0x837   : > { %vm2689_vm9 = vcmp.ge.f32.partialorder %v2665_v6, 0.0  ;;  %v2705_v61 = vmul.f32 0.2, %v2665_v6  ;;  %v2723_v48 = vsel %vm2691_vm6, %v2673_v34, %v2707_v23  ;;  %6345 = vmatpush3.bf16.msra.mxu0 %v6632_v50 }
 0x838   : > { %v2739_v39 = vpack.c.bf16 %v2723_v48, %v2722_v17 }
 0x839   : > { %v2721_v1 = vsel %vm2689_vm9, %v2665_v6, %v2705_v61 }
 0x83a   : > { %v2738_v40 = vpack.c.bf16 %v2721_v1, %v2720_v9 }
 0x83c   : > { %6334 = vmatprep.mubr.msk.bf16.mxu1 %vm1512_vm12, %v2738_v40 }
 0x83d   : > { %6335 = vmatmul.mubr.msk.bf16.gmra.mxu1 %vm1512_vm12, %v2739_v39 }
 0x8e4   : > { %v6324_v22 = vpop.f32.mrf.mxu1 }
 0x8e5   : > { %v2836_v47 = vadd.f32 %v6324_v22, %v8008_v5 }
 0x8e6   : > { %v2827_v55 = vpop.f32.mrf.mxu1 }
 0x8e7   : > { %v2828_v54 = vadd.f32 %v8008_v5, %v2827_v55  ;;  %v2908_v0 = vmul.f32 0.2, %v2836_v47  ;;  %vm2892_vm13 = vcmp.ge.f32.partialorder %v2836_v47, 0.0 }
 0x8e8   : > { %v6325_v12 = vpop.f32.mrf.mxu1 }
 0x8e9   : > { %v2839_v63 = vadd.f32 %v6325_v12, %v8008_v5  ;;  %v2906_v15 = vmul.f32 0.2, %v2828_v54  ;;  %vm2890_vm11 = vcmp.ge.f32.partialorder %v2828_v54, 0.0  ;;  %v2924_v6 = vsel %vm2892_vm13, %v2836_v47, %v2908_v0 }
 0x8ea   : > { %v2830_v13 = vpop.f32.mrf.mxu1 }
 0x8eb   : > { %vm2893_vm10 = vcmp.ge.f32.partialorder %v2839_v63, 0.0  ;;  %v2909_v3 = vmul.f32 0.2, %v2839_v63  ;;  %v2831_v36 = vadd.f32 %v8008_v5, %v2830_v13  ;;  %v2922_v32 = vsel %vm2890_vm11, %v2828_v54, %v2906_v15 }
 0x8ed   : > { %v6328_v7 = vpop.f32.mrf.mxu1  ;;  %vm2891_vm14 = vcmp.ge.f32.partialorder %v2831_v36, 0.0  ;;  %v2907_v59 = vmul.f32 0.2, %v2831_v36  ;;  %v2925_v46 = vsel %vm2893_vm10, %v2839_v63, %v2909_v3 }
 0x8ee   : > { %v2852_v61 = vadd.f32 %v6328_v7, %v8008_v5  ;;  %v2947_v9 = vpack.c.bf16 %v2925_v46, %v2924_v6 }
 0x8ef   : > { %v2843_v34 = vpop.f32.mrf.mxu1  ;;  %v2923_v2 = vsel %vm2891_vm14, %v2831_v36, %v2907_v59 }
 0x8f0   : > { %v2844_v23 = vadd.f32 %v8008_v5, %v2843_v34  ;;  %v2946_v26 = vpack.c.bf16 %v2923_v2, %v2922_v32  ;;  %v2912_v22 = vmul.f32 0.2, %v2852_v61  ;;  %vm2896_vm1 = vcmp.ge.f32.partialorder %v2852_v61, 0.0 }
 0x8f1   : > { %v6329_v48 = vpop.f32.mrf.mxu1 }
 0x8f2   : > { %v2855_v1 = vadd.f32 %v6329_v48, %v8008_v5  ;;  %6346 = vmatprep.mubr.msk.bf16.mxu0 %vm1512_vm12, %v2946_v26  ;;  %v2910_v40 = vmul.f32 0.2, %v2844_v23  ;;  %vm2894_vm0 = vcmp.ge.f32.partialorder %v2844_v23, 0.0  ;;  %v2928_v3 = vsel %vm2896_vm1, %v2852_v61, %v2912_v22 }
 0x8f3   : > { %v2846_v17 = vpop.f32.mrf.mxu1  ;;  %6347 = vmatmul.mubr.msk.bf16.vlgmr.msra.gmra.mxu0 %vm1512_vm12, %v2947_v9 }
 0x8f4   : > { %vm2897_vm15 = vcmp.ge.f32.partialorder %v2855_v1, 0.0  ;;  %v2913_v39 = vmul.f32 0.2, %v2855_v1  ;;  %v2847_v50 = vadd.f32 %v8008_v5, %v2846_v17  ;;  %v2926_v63 = vsel %vm2894_vm0, %v2844_v23, %v2910_v40 }
 0x8f5   : > { %v6332_v55 = vpop.f32.mrf.mxu1 }
 0x8f6   : > { %vm2895_vm2 = vcmp.ge.f32.partialorder %v2847_v50, 0.0  ;;  %v2911_v54 = vmul.f32 0.2, %v2847_v50  ;;  %v2929_v47 = vsel %vm2897_vm15, %v2855_v1, %v2913_v39  ;;  %v2868_v0 = vadd.f32 %v6332_v55, %v8008_v5 }
 0x8f7   : > { %v2859_v12 = vpop.f32.mrf.mxu1  ;;  %v2949_v59 = vpack.c.bf16 %v2929_v47, %v2928_v3 }
 0x8f8   : > { %v2927_v13 = vsel %vm2895_vm2, %v2847_v50, %v2911_v54  ;;  %v2860_v15 = vadd.f32 %v8008_v5, %v2859_v12  ;;  %v2916_v23 = vmul.f32 0.2, %v2868_v0  ;;  %vm2900_vm7 = vcmp.ge.f32.partialorder %v2868_v0, 0.0 }
 0x8f9   : > { %v2948_v36 = vpack.c.bf16 %v2927_v13, %v2926_v63  ;;  %v6333_v7 = vpop.f32.mrf.mxu1 }
 0x8fa   : > { %v2871_v46 = vadd.f32 %v6333_v7, %v8008_v5  ;;  %v2914_v32 = vmul.f32 0.2, %v2860_v15  ;;  %vm2898_vm6 = vcmp.ge.f32.partialorder %v2860_v15, 0.0  ;;  %v2932_v39 = vsel %vm2900_vm7, %v2868_v0, %v2916_v23  ;;  %v5750_v23 = vld [vmem:[%s9316_s6 + $0x10] ss:$0 sm:$0xff] }
 0x8fb   : > { %v2862_v34 = vpop.f32.mrf.mxu1  ;;  %6350 = vmatprep.mubr.msk.bf16.mxu0 %vm1512_vm12, %v2948_v36 }
 0x8fc   : > { %vm2901_vm4 = vcmp.ge.f32.partialorder %v2871_v46, 0.0  ;;  %v2917_v2 = vmul.f32 0.2, %v2871_v46  ;;  %v2863_v6 = vadd.f32 %v8008_v5, %v2862_v34  ;;  %6351 = vmatmul.mubr.msk.bf16.gmra.mxu0 %vm1512_vm12, %v2949_v59  ;;  %v2930_v1 = vsel %vm2898_vm6, %v2860_v15, %v2914_v32 }
 0x8fd   : > { %v6336_v26 = vpop.f32.mrf.mxu1 }
 0x8fe   : > { %vm2899_vm5 = vcmp.ge.f32.partialorder %v2863_v6, 0.0  ;;  %v2915_v61 = vmul.f32 0.2, %v2863_v6  ;;  %v2933_v48 = vsel %vm2901_vm4, %v2871_v46, %v2917_v2  ;;  %v2884_v22 = vadd.f32 %v6336_v26, %v8008_v5 }
 0x8ff   : > { %v2875_v9 = vpop.f32.mrf.mxu1  ;;  %v2951_v54 = vpack.c.bf16 %v2933_v48, %v2932_v39  ;;  %v8044_v48 = vpop.permute.xlu1 %3137 }
 0x900   : > { %v2931_v17 = vsel %vm2899_vm5, %v2863_v6, %v2915_v61  ;;  %v2876_v40 = vadd.f32 %v8008_v5, %v2875_v9  ;;  %v2920_v15 = vmul.f32 0.2, %v2884_v22  ;;  %vm2904_vm11 = vcmp.ge.f32.partialorder %v2884_v22, 0.0  ;;  %9436 = vst [vmem:[#allocation7_spill] sm:$0xff] %v8044_v48 }
 0x901   : > { %v2950_v50 = vpack.c.bf16 %v2931_v17, %v2930_v1  ;;  %v6337_v55 = vpop.f32.mrf.mxu1 }
 0x902   : > { %v2887_v47 = vadd.f32 %v6337_v55, %v8008_v5  ;;  %v2918_v63 = vmul.f32 0.2, %v2876_v40  ;;  %vm2902_vm10 = vcmp.ge.f32.partialorder %v2876_v40, 0.0  ;;  %v2936_v46 = vsel %vm2904_vm11, %v2884_v22, %v2920_v15 }
 0x903   : > { %v2878_v12 = vpop.f32.mrf.mxu1  ;;  %6354 = vmatprep.mubr.msk.bf16.mxu0 %vm1512_vm12, %v2950_v50 }
 0x904   : > { %vm2905_vm9 = vcmp.ge.f32.partialorder %v2887_v47, 0.0  ;;  %v2921_v13 = vmul.f32 0.2, %v2887_v47  ;;  %v2879_v3 = vadd.f32 %v8008_v5, %v2878_v12  ;;  %6355 = vmatmul.mubr.msk.bf16.gmra.mxu0 %vm1512_vm12, %v2951_v54  ;;  %v2934_v7 = vsel %vm2902_vm10, %v2876_v40, %v2918_v63  ;;  %v5763_v5 = vld [vmem:[%s9314_s4 + $0x8] sm:$0xf] }
 0x905   : > { %6546 = vmatprep.subr.msk.bf16.mxu1 %vm1297_vm3, %v5763_v5  ;;  %v3383_v2 = vsel %vm1297_vm3, %v5763_v5, 0 }
 0x906   : > { %vm2903_vm13 = vcmp.ge.f32.partialorder %v2879_v3, 0.0  ;;  %v2919_v36 = vmul.f32 0.2, %v2879_v3  ;;  %v2937_v0 = vsel %vm2905_vm9, %v2887_v47, %v2921_v13  ;;  %6363 = vmatpush3.bf16.msra.mxu1 %v3383_v2 }
 0x907   : > { %v2953_v32 = vpack.c.bf16 %v2937_v0, %v2936_v46 }
 0x908   : > { %v2935_v59 = vsel %vm2903_vm13, %v2879_v3, %v2919_v36 }
 0x909   : > { %v2952_v34 = vpack.c.bf16 %v2935_v59, %v2934_v7 }
 0x90b   : > { %6358 = vmatprep.mubr.msk.bf16.mxu0 %vm1512_vm12, %v2952_v34 }
 0x90c   : > { %6359 = vmatmul.mubr.msk.bf16.gmra.mxu0 %vm1512_vm12, %v2953_v32 }
 0x9b3   : > { %v6348_v6 = vpop.f32.mrf.mxu0 }
 0x9b4   : > { %v8046_v1 = vadd.f32 %v6348_v6, %v5750_v23 }
 0x9b5   : > { %v3041_v26 = vpop.f32.mrf.mxu0 }
 0x9b6   : > { %v8042_v61 = vadd.f32 %v5750_v23, %v3041_v26  ;;  %v3142_v54 = vmul.f32 %v8044_v48, %v8046_v1  ;;  %6721 = vtanh.f32 %v8046_v1 }
 0x9b7   : > { %v6349_v9 = vpop.f32.mrf.mxu0 }
 0x9b8   : > { %v3140_v17 = vmul.f32 %v8044_v48, %v8042_v61  ;;  %v3053_v22 = vadd.f32 %v6349_v9, %v5750_v23  ;;  %6723 = vtanh.f32 %v8042_v61 }
 0x9b9   : > { %v3044_v40 = vpop.f32.mrf.mxu0 }
 0x9ba   : > { %v8050_v39 = vadd.f32 %v5750_v23, %v3044_v40  ;;  %3220 = vrot.lane.b32.xlu0 %v3140_v17, %s6994_s9  ;;  %v3143_v13 = vmul.f32 %v8044_v48, %v3053_v22 }
 0x9bc   : > { %v6352_v50 = vpop.f32.mrf.mxu0  ;;  %v3141_v55 = vmul.f32 %v8044_v48, %v8050_v39  ;;  %6725 = vtanh.f32 %v8050_v39 }
 0x9bd   : > { %v3066_v3 = vadd.f32 %v6352_v50, %v5750_v23  ;;  %6727 = vtanh.f32 %v3053_v22 }
 0x9be   : > { %v3057_v47 = vpop.f32.mrf.mxu0  ;;  %3222 = vrot.lane.b32.xlu1 %v3141_v55, %s6994_s9  ;;  %3224 = vrot.lane.b32.xlu0 %v3142_v54, %s6994_s9 }
 0x9bf   : > { %v3058_v12 = vadd.f32 %v5750_v23, %v3057_v47  ;;  %v3146_v59 = vmul.f32 %v8044_v48, %v3066_v3 }
 0x9c0   : > { %v6353_v63 = vpop.f32.mrf.mxu0 }
 0x9c1   : > { %v3144_v15 = vmul.f32 %v8044_v48, %v3058_v12  ;;  %v3069_v46 = vadd.f32 %v6353_v63, %v5750_v23  ;;  %6729 = vtanh.f32 %v3058_v12 }
 0x9c2   : > { %v3060_v36 = vpop.f32.mrf.mxu0  ;;  %3226 = vrot.lane.b32.xlu1 %v3143_v13, %s6994_s9  ;;  %6731 = vtanh.f32 %v3066_v3 }
 0x9c3   : > { %v3061_v0 = vadd.f32 %v5750_v23, %v3060_v36  ;;  %3228 = vrot.lane.b32.xlu0 %v3144_v15, %s6994_s9  ;;  %v3147_v6 = vmul.f32 %v8044_v48, %v3069_v46 }
 0x9c4   : > { %v6356_v7 = vpop.f32.mrf.mxu0 }
 0x9c5   : > { %v3145_v34 = vmul.f32 %v8044_v48, %v3061_v0  ;;  %v3082_v26 = vadd.f32 %v6356_v7, %v5750_v23  ;;  %6733 = vtanh.f32 %v3061_v0 }
 0x9c6   : > { %v3073_v32 = vpop.f32.mrf.mxu0  ;;  %6735 = vtanh.f32 %v3069_v46 }
 0x9c7   : > { %v3074_v5 = vadd.f32 %v5750_v23, %v3073_v32  ;;  %3230 = vrot.lane.b32.xlu1 %v3145_v34, %s6994_s9  ;;  %3232 = vrot.lane.b32.xlu0 %v3146_v59, %s6994_s9  ;;  %v3150_v55 = vmul.f32 %v8044_v48, %v3082_v26 }
 0x9c8   : > { %v6357_v2 = vpop.f32.mrf.mxu0 }
 0x9c9   : > { %v3148_v9 = vmul.f32 %v8044_v48, %v3074_v5  ;;  %v3085_v54 = vadd.f32 %v6357_v2, %v5750_v23  ;;  %6737 = vtanh.f32 %v3074_v5 }
 0x9ca   : > { %v3076_v17 = vpop.f32.mrf.mxu0  ;;  %6739 = vtanh.f32 %v3082_v26 }
 0x9cb   : > { %v3077_v40 = vadd.f32 %v5750_v23, %v3076_v17  ;;  %3234 = vrot.lane.b32.xlu1 %v3147_v6, %s6994_s9  ;;  %3236 = vrot.lane.b32.xlu0 %v3148_v9, %s6994_s9  ;;  %v3151_v36 = vmul.f32 %v8044_v48, %v3085_v54  ;;  %v6633_v17 = vld [vmem:[%s9315_s5 + $0xd8] sm:$0xff]  }
 0x9cc   : > { %v6360_v50 = vpop.f32.mrf.mxu0  ;;  %6380 = vmatprep.subr.bf16.mxu0 %v6633_v17 }
 0x9cd   : > { %v3149_v47 = vmul.f32 %v8044_v48, %v3077_v40  ;;  %v3098_v7 = vadd.f32 %v6360_v50, %v5750_v23  ;;  %v6634_v50 = vld [vmem:[%s9315_s5 + $0xd0] sm:$0xff]   ;;  %6381 = vmatpush3.bf16.msra.mxu0 %v6633_v17  ;;  %6741 = vtanh.f32 %v3077_v40 }
 0x9ce   : > { %v3089_v63 = vpop.f32.mrf.mxu0  ;;  %6382 = vmatprep.subr.bf16.mxu0 %v6634_v50 }
 0x9cf   : > { %v3090_v13 = vadd.f32 %v5750_v23, %v3089_v63  ;;  %3238 = vrot.lane.b32.xlu1 %v3149_v47, %s6994_s9  ;;  %3240 = vrot.lane.b32.xlu0 %v3150_v55, %s6994_s9  ;;  %v3154_v2 = vmul.f32 %v8044_v48, %v3098_v7 }
 0x9d0   : > { %v6361_v15 = vpop.f32.mrf.mxu0 }
 0x9d1   : > { %v3152_v59 = vmul.f32 %v8044_v48, %v3090_v13  ;;  %v3101_v6 = vadd.f32 %v6361_v15, %v5750_v23  ;;  %6383 = vmatpush3.bf16.msra.mxu0 %v6634_v50 }
 0x9d2   : > { %v3092_v34 = vpop.f32.mrf.mxu0 }
 0x9d3   : > { %v3093_v32 = vadd.f32 %v5750_v23, %v3092_v34  ;;  %3242 = vrot.lane.b32.xlu1 %v3151_v36, %s6994_s9  ;;  %3244 = vrot.lane.b32.xlu0 %v3152_v59, %s6994_s9  ;;  %v3155_v55 = vmul.f32 %v8044_v48, %v3101_v6  ;;  %v6722_v23 = vpop.eup %6721 }
 0x9d4   : > { %v6724_v47 = vpop.eup %6723  ;;  %v8095_v63 = vmul.f32 %v6722_v23, %v7265_v4 }
 0x9d5   : > { %v3153_v9 = vmul.f32 %v8044_v48, %v3093_v32  ;;  %v6726_v15 = vpop.eup %6725  ;;  %v8098_v36 = vmul.f32 %v6724_v47, %v7265_v4 }
 0x9d6   : > { %v3160_v1 = vmul.f32 1.442695, %v8095_v63  ;;  %v6728_v61 = vpop.eup %6727  ;;  %v8102_v39 = vmul.f32 %v6726_v15, %v7265_v4 }
 0x9d7   : > { %3246 = vrot.lane.b32.xlu1 %v3153_v9, %s6994_s9  ;;  %3248 = vrot.lane.b32.xlu0 %v3154_v2, %s6994_s9  ;;  %v3156_v22 = vmul.f32 1.442695, %v8098_v36  ;;  %v6730_v12 = vpop.eup %6729  ;;  %v8106_v3 = vmul.f32 %v6728_v61, %v7265_v4 }
 0x9d8   : > { %6743 = vpow2.f32 %v3160_v1  ;;  %v6732_v0 = vpop.eup %6731  ;;  %v3158_v46 = vmul.f32 1.442695, %v8102_v39  ;;  %v8110_v59 = vmul.f32 %v6730_v12, %v7265_v4 }
 0x9d9   : > { %6745 = vtanh.f32 %v3085_v54  ;;  %v6734_v5 = vpop.eup %6733  ;;  %v8113_v26 = vmul.f32 %v6732_v0, %v7265_v4  ;;  %v3162_v40 = vmul.f32 1.442695, %v8106_v3 }
 0x9da   : > { %6747 = vpow2.f32 %v3156_v22  ;;  %v8117_v34 = vmul.f32 %v6734_v5, %v7265_v4  ;;  %v6736_v2 = vpop.eup %6735  ;;  %v3164_v54 = vmul.f32 1.442695, %v8110_v59 }
 0x9db   : > { %3250 = vrot.lane.b32.xlu1 %v3155_v55, %s6994_s9  ;;  %6749 = vtanh.f32 %v3090_v13  ;;  %v6738_v9 = vpop.eup %6737  ;;  %v3168_v17 = vmul.f32 1.442695, %v8113_v26  ;;  %v8122_v13 = vmul.f32 %v6736_v2, %v7265_v4 }
 0x9dc   : > { %6751 = vtanh.f32 %v3098_v7  ;;  %9437 = vst [vmem:[#allocation9_spill] sm:$0xff] %v8117_v34  ;;  %v3166_v7 = vmul.f32 1.442695, %v8117_v34  ;;  %v6740_v50 = vpop.eup %6739  ;;  %v8126_v23 = vmul.f32 %v6738_v9, %v7265_v4 }
 0x9dd   : > { %6753 = vpow2.f32 %v3158_v46  ;;  %v6742_v55 = vpop.eup %6741  ;;  %v8129_v47 = vmul.f32 %v6740_v50, %v7265_v4  ;;  %v3170_v15 = vmul.f32 1.442695, %v8122_v13 }
 0x9de   : > { %6755 = vtanh.f32 %v3093_v32  ;;  %9438 = vst [vmem:[#allocation8_spill] sm:$0xff] %v8126_v23  ;;  %v8133_v61 = vmul.f32 %v6742_v55, %v7265_v4  ;;  %v3172_v22 = vmul.f32 1.442695, %v8126_v23 }
 0x9df   : > { %6757 = vpow2.f32 %v3162_v40  ;;  %v3176_v5 = vmul.f32 1.442695, %v8129_v47 }
 0x9e0   : > { %6759 = vtanh.f32 %v3101_v6  ;;  %9439 = vst [vmem:[#allocation12_spill] sm:$0xff] %v8133_v61 }
 0x9e1   : > { %6761 = vpow2.f32 %v3164_v54  ;;  %v3174_v54 = vmul.f32 1.442695, %v8133_v61 }
 0x9e2   : > { %6763 = vpow2.f32 %v3168_v17 }
 0x9e3   : > { %6765 = vpow2.f32 %v3166_v7 }
 0x9e4   : > { %6767 = vpow2.f32 %v3170_v15 }
 0x9e5   : > { %v6744_v32 = vpop.eup %6743  ;;  %6769 = vpow2.f32 %v3172_v22 }
 0x9e6   : > { %v6746_v1 = vpop.eup %6745  ;;  %6771 = vpow2.f32 %v3176_v5 }
 0x9e7   : > { %v6748_v6 = vpop.eup %6747  ;;  %v8137_v46 = vmul.f32 %v6746_v1, %v7265_v4  ;;  %6773 = vpow2.f32 %v3174_v54 }
 0x9e8   : > { %v6750_v12 = vpop.eup %6749  ;;  %v3188_v2 = vmul.f32 %v6748_v6, %v7737_v8  ;;  %v3190_v6 = vmul.f32 %v6744_v32, %v7761_v42 }
 0x9e9   : > { %v6752_v0 = vpop.eup %6751  ;;  %9440 = vst [vmem:[#allocation10_spill] sm:$0xff] %v8137_v46  ;;  %v8143_v17 = vmul.f32 %v6750_v12, %v7265_v4  ;;  %v3178_v15 = vmul.f32 1.442695, %v8137_v46 }
 0x9ea   : > { %v6754_v40 = vpop.eup %6753  ;;  %v8146_v48 = vmul.f32 %v6752_v0, %v7265_v4 }
 0x9eb   : > { %v6756_v9 = vpop.eup %6755  ;;  %v3189_v8 = vmul.f32 %v6754_v40, %v7743_v14  ;;  %v3180_v0 = vmul.f32 1.442695, %v8143_v17  ;;  %6775 = vpow2.f32 %v3178_v15 }
 0x9ec   : > { %v6758_v55 = vpop.eup %6757  ;;  %v8150_v23 = vmul.f32 %v6756_v9, %v7265_v4  ;;  %v3184_v14 = vmul.f32 1.442695, %v8146_v48 }
 0x9ed   : > { %v6760_v1 = vpop.eup %6759  ;;  %v3191_v9 = vmul.f32 %v6758_v55, %v7757_v10  ;;  %6777 = vpow2.f32 %v3180_v0 }
 0x9ee   : > { %v6762_v12 = vpop.eup %6761  ;;  %v8157_v46 = vmul.f32 %v6760_v1, %v7265_v4  ;;  %6779 = vpow2.f32 %v3184_v14 }
 0x9ef   : > { %v6764_v34 = vpop.eup %6763  ;;  %v3192_v54 = vmul.f32 %v6762_v12, %v7781_v57 }
 0x9f0   : > { %v6766_v42 = vpop.eup %6765  ;;  %v3186_v12 = vmul.f32 1.442695, %v8157_v46 }
 0x9f1   : > { %v3193_v57 = vmul.f32 %v6766_v42, %v7784_v60 }
 0xa2c   : > { %v3221_v7 = vpop.permute.xlu0 %3220 }
 0xa2d   : > { %v3268_v50 = vadd.f32 %v3221_v7, %v3188_v2 }
 0xa2f   : > { %v3284_v22 = vmul.f32 %v3268_v50, %v7265_v4  ;;  %v3182_v50 = vmul.f32 1.442695, %v8150_v23 }
 0xa30   : > { %v3223_v2 = vpop.permute.xlu1 %3222  ;;  %v3225_v7 = vpop.permute.xlu0 %3224 }
 0xa31   : > { %v3269_v61 = vadd.f32 %v3223_v2, %v3189_v8  ;;  %v3270_v5 = vadd.f32 %v3225_v7, %v3190_v6  ;;  %v8166_v8 = vadd.f32 %v3284_v22, %v7750_v33  ;;  %v3194_v2 = vmul.f32 %v6764_v34, %v7800_v58  ;;  %v6768_v33 = vpop.eup %6767 }
 0xa32   : > { %6781 = vpow2.f32 %v3182_v50  ;;  %v6770_v60 = vpop.eup %6769 }
 0xa33   : > { %v3285_v32 = vmul.f32 %v3269_v61, %v7265_v4  ;;  %v3286_v40 = vmul.f32 %v3270_v5, %v7265_v4  ;;  %v8185_v58 = vmul.f32 %v8166_v8, %v7265_v4  ;;  %6783 = vpow2.f32 %v3186_v12 }
 0xa34   : > { %v3227_v6 = vpop.permute.xlu1 %3226 }
 0xa35   : > { %v3229_v1 = vpop.permute.xlu0 %3228  ;;  %v8169_v10 = vadd.f32 %v3285_v32, %v7754_v16  ;;  %v3271_v55 = vadd.f32 %v3227_v6, %v3191_v9  ;;  %v8173_v61 = vadd.f32 %v3286_v40, %v7772_v25  ;;  %v3195_v32 = vmul.f32 %v6768_v33, %v7805_v37  ;;  %v6772_v40 = vpop.eup %6771 }
 0xa36   : > { %v3272_v15 = vadd.f32 %v3229_v1, %v3192_v54  ;;  %v6774_v1 = vpop.eup %6773 }
 0xa37   : > { %v8179_v22 = vmul.f32 %v8169_v10, %v7265_v4  ;;  %v3287_v16 = vmul.f32 %v3271_v55, %v7265_v4  ;;  %v8192_v14 = vmul.f32 %v8173_v61, %v7265_v4 }
 0xa38   : > { %v3288_v7 = vmul.f32 %v3272_v15, %v7265_v4  ;;  %v3196_v15 = vmul.f32 %v6770_v60, %v7821_v56 }
 0xa39   : > { %v3231_v25 = vpop.permute.xlu1 %3230  ;;  %v3233_v34 = vpop.permute.xlu0 %3232  ;;  %v8188_v0 = vadd.f32 %v3287_v16, %v7768_v62  ;;  %v3350_v42 = vpack.c.bf16 %v8179_v22, %v8185_v58  ;;  %v3198_v16 = vmul.f32 %v6772_v40, %v7842_v21 }
 0xa3a   : > { %v3273_v5 = vadd.f32 %v3231_v25, %v3193_v57  ;;  %v3274_v9 = vadd.f32 %v3233_v34, %v3194_v2  ;;  %v8202_v62 = vadd.f32 %v3288_v7, %v7789_v49  ;;  %v6776_v7 = vpop.eup %6775 }
 0xa3b   : > { %v8199_v54 = vmul.f32 %v8188_v0, %v7265_v4  ;;  %6364 = vmatprep.mubr.msk.bf16.mxu1 %vm1272_vm8, %v3350_v42  ;;  %v6778_v21 = vpop.eup %6777 }
 0xa3c   : > { %v3289_v50 = vmul.f32 %v3273_v5, %v7265_v4  ;;  %v3290_v6 = vmul.f32 %v3274_v9, %v7265_v4  ;;  %v8219_v25 = vmul.f32 %v8202_v62, %v7265_v4 }
 0xa3d   : > { %v3235_v55 = vpop.permute.xlu1 %3234  ;;  %v3237_v37 = vpop.permute.xlu0 %3236  ;;  %v3351_v2 = vpack.c.bf16 %v8199_v54, %v8192_v14 }
 0xa3e   : > { %v8211_v57 = vadd.f32 %v3289_v50, %v7793_v28  ;;  %v3275_v12 = vadd.f32 %v3235_v55, %v3195_v32  ;;  %v8214_v49 = vadd.f32 %v3290_v6, %v7810_v11  ;;  %v3276_v33 = vadd.f32 %v3237_v37, %v3196_v15 }
 0xa3f   : > { %6365 = vmatmul.mubr.msk.bf16.vlgmr.msra.gmra.mxu1 %vm1272_vm8, %v3351_v2  ;;  %v3197_v28 = vmul.f32 %v6774_v1, %v7824_v51  ;;  %v3199_v6 = vmul.f32 %v6776_v7, %v7845_v52  ;;  %v6780_v51 = vpop.eup %6779 }
 0xa40   : > { %v8223_v56 = vmul.f32 %v8211_v57, %v7265_v4  ;;  %v3291_v34 = vmul.f32 %v3275_v12, %v7265_v4  ;;  %v3292_v11 = vmul.f32 %v3276_v33, %v7265_v4  ;;  %v8236_v50 = vmul.f32 %v8214_v49, %v7265_v4  ;;  %v6782_v37 = vpop.eup %6781 }
 0xa41   : > { %v3239_v60 = vpop.permute.xlu1 %3238  ;;  %v3241_v5 = vpop.permute.xlu0 %3240  ;;  %v3200_v12 = vmul.f32 %v6778_v21, %v7863_v19 }
 0xa42   : > { %v8230_v9 = vadd.f32 %v3291_v34, %v7818_v30  ;;  %v3277_v42 = vadd.f32 %v3239_v60, %v3197_v28  ;;  %v3278_v32 = vadd.f32 %v3241_v5, %v3198_v16  ;;  %v3352_v40 = vpack.c.bf16 %v8223_v56, %v8219_v25 }
 0xa43   : > { %v8244_v55 = vadd.f32 %v3292_v11, %v7832_v27  ;;  %v3202_v28 = vmul.f32 %v6780_v51, %v7882_v41  ;;  %v6784_v11 = vpop.eup %6783 }
 0xa44   : > { %v8241_v1 = vmul.f32 %v8230_v9, %v7265_v4  ;;  %v3293_v30 = vmul.f32 %v3277_v42, %v7265_v4  ;;  %v3294_v15 = vmul.f32 %v3278_v32, %v7265_v4  ;;  %6368 = vmatprep.mubr.msk.bf16.mxu1 %vm1272_vm8, %v3352_v40 }
 0xa45   : > { %v3243_v2 = vpop.permute.xlu1 %3242  ;;  %v3245_v33 = vpop.permute.xlu0 %3244  ;;  %v8261_v60 = vmul.f32 %v8244_v55, %v7265_v4 }
 0xa46   : > { %v3353_v52 = vpack.c.bf16 %v8241_v1, %v8236_v50  ;;  %v8253_v16 = vadd.f32 %v3293_v30, %v7836_v31  ;;  %v3279_v7 = vadd.f32 %v3243_v2, %v3199_v6  ;;  %v8256_v27 = vadd.f32 %v3294_v15, %v7853_v53 }
 0xa47   : > { %v3280_v34 = vadd.f32 %v3245_v33, %v3200_v12  ;;  %v3201_v31 = vmul.f32 %v6782_v37, %v7866_v35  ;;  %v3203_v30 = vmul.f32 %v6784_v11, %v7885_v43 }
 0xa48   : > { %v8265_v19 = vmul.f32 %v8253_v16, %v7265_v4  ;;  %v3295_v5 = vmul.f32 %v3279_v7, %v7265_v4  ;;  %6369 = vmatmul.mubr.msk.bf16.gmra.mxu1 %vm1272_vm8, %v3353_v52  ;;  %v8278_v51 = vmul.f32 %v8256_v27, %v7265_v4 }
 0xa49   : > { %v3296_v53 = vmul.f32 %v3280_v34, %v7265_v4  ;;  %v3247_v21 = vpop.permute.xlu1 %3246  ;;  %v3249_v42 = vpop.permute.xlu0 %3248 }
 0xa4a   : > { %v8272_v41 = vadd.f32 %v3295_v5, %v7857_v38  ;;  %v3281_v32 = vadd.f32 %v3247_v21, %v3201_v31  ;;  %v3282_v40 = vadd.f32 %v3249_v42, %v3202_v28  ;;  %v3354_v6 = vpack.c.bf16 %v8265_v19, %v8261_v60  ;;  %9441 = vst [vmem:[#allocation13_spill] sm:$0xff] %v8278_v51  ;;  %v6636_v31 = vld [vmem:[%s9315_s5 + $0xc0] sm:$0xff]   ;;  %v6638_v21 = vld [vmem:[%s9315_s5 + $0xf0] sm:$0xff]   ;;  %v6639_v42 = vld [vmem:[%s9315_s5 + $0xe8] sm:$0xff]  }
 0xa4b   : > { %v8286_v15 = vadd.f32 %v3296_v53, %v7872_v29  ;;  %v6637_v53 = vld [vmem:[%s9315_s5 + $0xf8] sm:$0xff]  }
 0xa4c   : > { %v8283_v35 = vmul.f32 %v8272_v41, %v7265_v4  ;;  %v3297_v38 = vmul.f32 %v3281_v32, %v7265_v4  ;;  %v3298_v37 = vmul.f32 %v3282_v40, %v7265_v4  ;;  %6372 = vmatprep.mubr.msk.bf16.mxu1 %vm1272_vm8, %v3354_v6  ;;  %6404 = vmatprep.subr.bf16.mxu1 %v6637_v53 }
 0xa4d   : > { %v3251_v2 = vpop.permute.xlu1 %3250  ;;  %v8298_v52 = vmul.f32 %v8286_v15, %v7265_v4  ;;  %6405 = vmatpush3.bf16.msra.mxu1 %v6637_v53 }
 0xa4e   : > { %9442 = vst [vmem:[#allocation11_spill] sm:$0xff] %v8283_v35  ;;  %v3355_v12 = vpack.c.bf16 %v8283_v35, %v8278_v51  ;;  %v8294_v33 = vadd.f32 %v3297_v38, %v7876_v18  ;;  %v3283_v43 = vadd.f32 %v3251_v2, %v3203_v30  ;;  %v8305_v7 = vadd.f32 %v3298_v37, %v7891_v24  ;;  %v8346_v38 = vld [vmem:[%s9316_s6 + $0x5] ss:$0 sm:$0xff]  ;;  %v9450_v2 = vld [vmem:[#allocation18_spill] sm:$0xff] }
 0xa4f   : > { %9444 = vst [vmem:[#allocation62_spill] sm:$0xff] %v8298_v52  ;;  %6406 = vmatprep.subr.bf16.mxu1 %v6638_v21 }
 0xa50   : > { %9443 = vst [vmem:[#allocation61_spill] sm:$0xff] %v8294_v33  ;;  %v8302_v29 = vmul.f32 %v8294_v33, %v7265_v4  ;;  %9446 = vst [vmem:[#allocation64_spill] sm:$0xff] %v8305_v7  ;;  %v3299_v34 = vmul.f32 %v3283_v43, %v7265_v4  ;;  %6373 = vmatmul.mubr.msk.bf16.gmra.mxu1 %vm1272_vm8, %v3355_v12  ;;  %v8316_v11 = vmul.f32 %v8305_v7, %v7265_v4 }
 0xa51   : > { %6407 = vmatpush3.bf16.msra.mxu1 %v6638_v21 }
 0xa52   : > { %9445 = vst [vmem:[#allocation63_spill] sm:$0xff] %v8302_v29  ;;  %v8310_v28 = vadd.f32 %v3299_v34, %v7895_v20  ;;  %v3356_v18 = vpack.c.bf16 %v8302_v29, %v8298_v52  ;;  %9448 = vst [vmem:[#allocation66_spill] sm:$0xff] %v8316_v11  ;;  %v6635_v20 = vld [vmem:[%s9315_s5 + $0xc8] sm:$0xff]   ;;  %6408 = vmatprep.subr.bf16.mxu1 %v6639_v42 }
 0xa53   : > { %6384 = vmatprep.subr.bf16.mxu0 %v6635_v20 }
 0xa54   : > { %9447 = vst [vmem:[#allocation65_spill] sm:$0xff] %v8310_v28  ;;  %v8320_v5 = vmul.f32 %v8310_v28, %v7265_v4  ;;  %6376 = vmatprep.mubr.msk.bf16.mxu1 %vm1272_vm8, %v3356_v18  ;;  %6385 = vmatpush3.bf16.msra.mxu0 %v6635_v20  ;;  %v9451_v20 = vld [vmem:[#allocation15_spill] sm:$0xff] }
 0xa55   : > { %6386 = vmatprep.subr.bf16.mxu0 %v6636_v31  ;;  %6409 = vmatpush3.bf16.msra.mxu1 %v6639_v42 }
 0xa56   : > { %9449 = vst [vmem:[#allocation67_spill] sm:$0xff] %v8320_v5  ;;  %v3357_v24 = vpack.c.bf16 %v8320_v5, %v8316_v11 }
 0xa58   : > { %6377 = vmatmul.mubr.msk.bf16.gmra.mxu1 %vm1272_vm8, %v3357_v24  ;;  %6387 = vmatpush3.bf16.msra.mxu0 %v6636_v31 }
 0xaff   : > { %v6366_v32 = vpop.f32.mrf.mxu1 }
 0xb00   : > { %v3428_v6 = vadd.f32 %v6366_v32, %v7475_v44 }
 0xb01   : > { %v3419_v40 = vpop.f32.mrf.mxu1 }
 0xb02   : > { %v3420_v30 = vadd.f32 %v3419_v40, %v7464_v45  ;;  %v3489_v34 = vadd.f32 %v8346_v38, %v3428_v6  ;;  %v9452_v40 = vld [vmem:[#allocation20_spill] sm:$0xff] }
 0xb03   : > { %v6367_v37 = vpop.f32.mrf.mxu1  ;;  %v9453_v6 = vld [vmem:[#allocation24_spill] sm:$0xff] }
 0xb04   : > { %v3431_v12 = vadd.f32 %v6367_v37, %v9450_v2  ;;  %v3487_v18 = vadd.f32 %v8346_v38, %v3420_v30  ;;  %v3521_v42 = vmul.f32 0.2, %v3489_v34  ;;  %vm3505_vm1 = vcmp.ge.f32.partialorder %v3489_v34, 0.0 }
 0xb05   : > { %v3422_v43 = vpop.f32.mrf.mxu1 }
 0xb06   : > { %v3490_v24 = vadd.f32 %v8346_v38, %v3431_v12  ;;  %v3423_v31 = vadd.f32 %v3422_v43, %v9451_v20  ;;  %v3519_v32 = vmul.f32 0.2, %v3487_v18  ;;  %vm3503_vm15 = vcmp.ge.f32.partialorder %v3487_v18, 0.0  ;;  %v9454_v12 = vld [vmem:[#allocation26_spill] sm:$0xff] }
 0xb07   : > { %v3537_v28 = vsel %vm3505_vm1, %v3489_v34, %v3521_v42 }
 0xb08   : > { %v6370_v44 = vpop.f32.mrf.mxu1  ;;  %v3522_v53 = vmul.f32 0.2, %v3490_v24  ;;  %v3488_v45 = vadd.f32 %v8346_v38, %v3423_v31  ;;  %vm3506_vm14 = vcmp.ge.f32.partialorder %v3490_v24, 0.0  ;;  %v3535_v29 = vsel %vm3503_vm15, %v3487_v18, %v3519_v32  ;;  %v9456_v18 = vld [vmem:[#allocation32_spill] sm:$0xff] }
 0xb09   : > { %v3444_v2 = vadd.f32 %v6370_v44, %v9453_v6 }
 0xb0a   : > { %v3435_v21 = vpop.f32.mrf.mxu1  ;;  %vm3504_vm0 = vcmp.ge.f32.partialorder %v3488_v45, 0.0  ;;  %v3520_v37 = vmul.f32 0.2, %v3488_v45  ;;  %v3538_v43 = vsel %vm3506_vm14, %v3490_v24, %v3522_v53 }
 0xb0b   : > { %v3436_v4 = vadd.f32 %v3435_v21, %v9452_v40  ;;  %v3493_v21 = vadd.f32 %v8346_v38, %v3444_v2  ;;  %v9455_v40 = vld [vmem:[#allocation22_spill] sm:$0xff]  ;;  %v3561_v44 = vpack.c.bf16 %v3538_v43, %v3537_v28 }
 0xb0c   : > { %v6371_v30 = vpop.f32.mrf.mxu1  ;;  %v3536_v20 = vsel %vm3504_vm0, %v3488_v45, %v3520_v37  ;;  %v9458_v28 = vld [vmem:[#allocation34_spill] sm:$0xff] }
 0xb0d   : > { %v3447_v5 = vadd.f32 %v6371_v30, %v9454_v12  ;;  %v3491_v31 = vadd.f32 %v8346_v38, %v3436_v4  ;;  %v3560_v7 = vpack.c.bf16 %v3536_v20, %v3535_v29  ;;  %v3525_v45 = vmul.f32 0.2, %v3493_v21  ;;  %v9459_v43 = vld [vmem:[#allocation30_spill] sm:$0xff] }
 0xb0e   : > { %v3438_v11 = vpop.f32.mrf.mxu1  ;;  %vm3509_vm7 = vcmp.ge.f32.partialorder %v3493_v21, 0.0 }
 0xb0f   : > { %v3494_v52 = vadd.f32 %v8346_v38, %v3447_v5  ;;  %v3439_v35 = vadd.f32 %v3438_v11, %v9455_v40  ;;  %6388 = vmatprep.mubr.msk.bf16.mxu0 %vm1512_vm12, %v3560_v7  ;;  %v3523_v53 = vmul.f32 0.2, %v3491_v31  ;;  %v9457_v5 = vld [vmem:[#allocation28_spill] sm:$0xff]  ;;  %vm3507_vm4 = vcmp.ge.f32.partialorder %v3491_v31, 0.0 }
 0xb10   : > { %v6374_v33 = vpop.f32.mrf.mxu1  ;;  %6389 = vmatmul.mubr.msk.bf16.vlgmr.msra.gmra.mxu0 %vm1512_vm12, %v3561_v44  ;;  %v3541_v12 = vsel %vm3509_vm7, %v3493_v21, %v3525_v45 }
 0xb11   : > { %v3526_v6 = vmul.f32 0.2, %v3494_v52  ;;  %v3492_v51 = vadd.f32 %v8346_v38, %v3439_v35  ;;  %vm3510_vm2 = vcmp.ge.f32.partialorder %v3494_v52, 0.0  ;;  %v3460_v4 = vadd.f32 %v6374_v33, %v9456_v18 }
 0xb12   : > { %v3451_v24 = vpop.f32.mrf.mxu1  ;;  %v3539_v37 = vsel %vm3507_vm4, %v3491_v31, %v3523_v53 }
 0xb13   : > { %v3452_v34 = vadd.f32 %v3451_v24, %v9457_v5  ;;  %vm3508_vm6 = vcmp.ge.f32.partialorder %v3492_v51, 0.0  ;;  %v3524_v11 = vmul.f32 0.2, %v3492_v51  ;;  %v3542_v35 = vsel %vm3510_vm2, %v3494_v52, %v3526_v6  ;;  %v9460_v6 = vld [vmem:[#allocation36_spill] sm:$0xff] }
 0xb14   : > { %v6375_v29 = vpop.f32.mrf.mxu1  ;;  %v3497_v2 = vadd.f32 %v8346_v38, %v3460_v4  ;;  %v3563_v24 = vpack.c.bf16 %v3542_v35, %v3541_v12  ;;  %v9461_v4 = vld [vmem:[#allocation40_spill] sm:$0xff] }
 0xb15   : > { %v3463_v42 = vadd.f32 %v6375_v29, %v9458_v28  ;;  %v3540_v32 = vsel %vm3508_vm6, %v3492_v51, %v3524_v11  ;;  %v3495_v33 = vadd.f32 %v8346_v38, %v3452_v34  ;;  %v9462_v11 = vld [vmem:[#allocation42_spill] sm:$0xff] }
 0xb16   : > { %v3454_v7 = vpop.f32.mrf.mxu1  ;;  %v3562_v44 = vpack.c.bf16 %v3540_v32, %v3539_v37  ;;  %v3529_v52 = vmul.f32 0.2, %v3497_v2  ;;  %vm3513_vm11 = vcmp.ge.f32.partialorder %v3497_v2, 0.0 }
 0xb17   : > { %v3498_v30 = vadd.f32 %v8346_v38, %v3463_v42  ;;  %v3455_v20 = vadd.f32 %v3454_v7, %v9459_v43  ;;  %v3527_v31 = vmul.f32 0.2, %v3495_v33  ;;  %vm3511_vm9 = vcmp.ge.f32.partialorder %v3495_v33, 0.0 }
 0xb18   : > { %v6378_v40 = vpop.f32.mrf.mxu1  ;;  %6392 = vmatprep.mubr.msk.bf16.mxu0 %vm1512_vm12, %v3562_v44  ;;  %v3545_v12 = vsel %vm3513_vm11, %v3497_v2, %v3529_v52 }
 0xb19   : > { %v3530_v18 = vmul.f32 0.2, %v3498_v30  ;;  %v3496_v5 = vadd.f32 %v8346_v38, %v3455_v20  ;;  %vm3514_vm5 = vcmp.ge.f32.partialorder %v3498_v30, 0.0  ;;  %6393 = vmatmul.mubr.msk.bf16.gmra.mxu0 %vm1512_vm12, %v3563_v24  ;;  %v3476_v34 = vadd.f32 %v6378_v40, %v9461_v4  ;;  %v9463_v20 = vld [vmem:[#allocation38_spill] sm:$0xff] }
 0xb1a   : > { %v3467_v51 = vpop.f32.mrf.mxu1  ;;  %v3543_v7 = vsel %vm3511_vm9, %v3495_v33, %v3527_v31 }
 0xb1b   : > { %v3468_v53 = vadd.f32 %v3467_v51, %v9460_v6  ;;  %vm3512_vm10 = vcmp.ge.f32.partialorder %v3496_v5, 0.0  ;;  %v3528_v21 = vmul.f32 0.2, %v3496_v5  ;;  %v3546_v28 = vsel %vm3514_vm5, %v3498_v30, %v3530_v18 }
 0xb1c   : > { %v6379_v45 = vpop.f32.mrf.mxu1  ;;  %v3501_v43 = vadd.f32 %v8346_v38, %v3476_v34  ;;  %v3565_v51 = vpack.c.bf16 %v3546_v28, %v3545_v12  ;;  %v6642_v34 = vld [vmem:[%s9315_s5 + $0x110] sm:$0xff]  }
 0xb1d   : > { %v3479_v29 = vadd.f32 %v6379_v45, %v9462_v11  ;;  %v3544_v42 = vsel %vm3512_vm10, %v3496_v5, %v3528_v21  ;;  %v3499_v35 = vadd.f32 %v8346_v38, %v3468_v53  ;;  %v6641_v21 = vld [vmem:[%s9315_s5 + $0x118] sm:$0xff]   ;;  %v6643_v45 = vld [vmem:[%s9315_s5 + $0x108] sm:$0xff]  }
 0xb1e   : > { %v3470_v32 = vpop.f32.mrf.mxu1  ;;  %v3564_v24 = vpack.c.bf16 %v3544_v42, %v3543_v7  ;;  %v3533_v33 = vmul.f32 0.2, %v3501_v43  ;;  %vm3517_vm0 = vcmp.ge.f32.partialorder %v3501_v43, 0.0  ;;  %6428 = vmatprep.subr.bf16.mxu0 %v6641_v21 }
 0xb1f   : > { %v3502_v37 = vadd.f32 %v8346_v38, %v3479_v29  ;;  %v3471_v44 = vadd.f32 %v3470_v32, %v9463_v20  ;;  %v3531_v40 = vmul.f32 0.2, %v3499_v35  ;;  %vm3515_vm13 = vcmp.ge.f32.partialorder %v3499_v35, 0.0  ;;  %6429 = vmatpush3.bf16.msra.mxu0 %v6641_v21  ;;  %v8401_v29 = vld [vmem:[%s9316_s6 + $0x9] ss:$0 sm:$0xff] }
 0xb20   : > { %6396 = vmatprep.mubr.msk.bf16.mxu0 %vm1512_vm12, %v3564_v24  ;;  %v3549_v31 = vsel %vm3517_vm0, %v3501_v43, %v3533_v33  ;;  %6430 = vmatprep.subr.bf16.mxu0 %v6642_v34 }
 0xb21   : > { %v3534_v6 = vmul.f32 0.2, %v3502_v37  ;;  %v3500_v4 = vadd.f32 %v8346_v38, %v3471_v44  ;;  %vm3518_vm14 = vcmp.ge.f32.partialorder %v3502_v37, 0.0  ;;  %6397 = vmatmul.mubr.msk.bf16.gmra.mxu0 %vm1512_vm12, %v3565_v51  ;;  %v3547_v2 = vsel %vm3515_vm13, %v3499_v35, %v3531_v40  ;;  %v6640_v38 = vld [vmem:[%s9315_s5 + $0xe0] sm:$0xff]  }
 0xb22   : > { %6410 = vmatprep.subr.bf16.mxu1 %v6640_v38 }
 0xb23   : > { %vm3516_vm15 = vcmp.ge.f32.partialorder %v3500_v4, 0.0  ;;  %v3532_v30 = vmul.f32 0.2, %v3500_v4  ;;  %v3550_v18 = vsel %vm3518_vm14, %v3502_v37, %v3534_v6  ;;  %6411 = vmatpush3.bf16.msra.mxu1 %v6640_v38  ;;  %6431 = vmatpush3.bf16.msra.mxu0 %v6642_v34 }
 0xb24   : > { %v3567_v53 = vpack.c.bf16 %v3550_v18, %v3549_v31  ;;  %6432 = vmatprep.subr.bf16.mxu0 %v6643_v45 }
 0xb25   : > { %v3548_v5 = vsel %vm3516_vm15, %v3500_v4, %v3532_v30 }
 0xb26   : > { %v3566_v52 = vpack.c.bf16 %v3548_v5, %v3547_v2 }
 0xb27   : > { %6433 = vmatpush3.bf16.msra.mxu0 %v6643_v45 }
 0xb28   : > { %6400 = vmatprep.mubr.msk.bf16.mxu0 %vm1512_vm12, %v3566_v52 }
 0xb29   : > { %6401 = vmatmul.mubr.msk.bf16.gmra.mxu0 %vm1512_vm12, %v3567_v53 }
 0xbd0   : > { %v6390_v11 = vpop.f32.mrf.mxu0 }
 0xbd1   : > { %v3664_v35 = vadd.f32 %v6390_v11, %v8401_v29 }
 0xbd2   : > { %v3655_v28 = vpop.f32.mrf.mxu0 }
 0xbd3   : > { %v3656_v42 = vadd.f32 %v8401_v29, %v3655_v28  ;;  %v3736_v44 = vmul.f32 0.2, %v3664_v35  ;;  %vm3720_vm4 = vcmp.ge.f32.partialorder %v3664_v35, 0.0 }
 0xbd4   : > { %v6391_v32 = vpop.f32.mrf.mxu0 }
 0xbd5   : > { %v3667_v7 = vadd.f32 %v6391_v32, %v8401_v29  ;;  %v3734_v12 = vmul.f32 0.2, %v3656_v42  ;;  %vm3718_vm2 = vcmp.ge.f32.partialorder %v3656_v42, 0.0  ;;  %v3752_v2 = vsel %vm3720_vm4, %v3664_v35, %v3736_v44 }
 0xbd6   : > { %v3658_v37 = vpop.f32.mrf.mxu0 }
 0xbd7   : > { %vm3721_vm1 = vcmp.ge.f32.partialorder %v3667_v7, 0.0  ;;  %v3737_v43 = vmul.f32 0.2, %v3667_v7  ;;  %v3659_v20 = vadd.f32 %v8401_v29, %v3658_v37  ;;  %v3750_v4 = vsel %vm3718_vm2, %v3656_v42, %v3734_v12 }
 0xbd9   : > { %v6394_v24 = vpop.f32.mrf.mxu0  ;;  %vm3719_vm6 = vcmp.ge.f32.partialorder %v3659_v20, 0.0  ;;  %v3735_v51 = vmul.f32 0.2, %v3659_v20  ;;  %v3753_v40 = vsel %vm3721_vm1, %v3667_v7, %v3737_v43 }
 0xbda   : > { %v3680_v5 = vadd.f32 %v6394_v24, %v8401_v29  ;;  %v3775_v31 = vpack.c.bf16 %v3753_v40, %v3752_v2 }
 0xbdb   : > { %v3671_v6 = vpop.f32.mrf.mxu0  ;;  %v3751_v33 = vsel %vm3719_vm6, %v3659_v20, %v3735_v51 }
 0xbdc   : > { %v3672_v30 = vadd.f32 %v8401_v29, %v3671_v6  ;;  %v3774_v18 = vpack.c.bf16 %v3751_v33, %v3750_v4  ;;  %v3740_v11 = vmul.f32 0.2, %v3680_v5  ;;  %vm3724_vm9 = vcmp.ge.f32.partialorder %v3680_v5, 0.0 }
 0xbdd   : > { %v6395_v52 = vpop.f32.mrf.mxu0 }
 0xbde   : > { %v3683_v53 = vadd.f32 %v6395_v52, %v8401_v29  ;;  %6412 = vmatprep.mubr.msk.bf16.mxu1 %vm1512_vm12, %v3774_v18  ;;  %v3738_v21 = vmul.f32 0.2, %v3672_v30  ;;  %vm3722_vm5 = vcmp.ge.f32.partialorder %v3672_v30, 0.0  ;;  %v3756_v43 = vsel %vm3724_vm9, %v3680_v5, %v3740_v11 }
 0xbdf   : > { %v3674_v38 = vpop.f32.mrf.mxu0  ;;  %6413 = vmatmul.mubr.msk.bf16.vlgmr.msra.gmra.mxu1 %vm1512_vm12, %v3775_v31 }
 0xbe0   : > { %vm3725_vm7 = vcmp.ge.f32.partialorder %v3683_v53, 0.0  ;;  %v3741_v34 = vmul.f32 0.2, %v3683_v53  ;;  %v3675_v45 = vadd.f32 %v8401_v29, %v3674_v38  ;;  %v3754_v7 = vsel %vm3722_vm5, %v3672_v30, %v3738_v21 }
 0xbe1   : > { %v6398_v28 = vpop.f32.mrf.mxu0 }
 0xbe2   : > { %vm3723_vm10 = vcmp.ge.f32.partialorder %v3675_v45, 0.0  ;;  %v3739_v42 = vmul.f32 0.2, %v3675_v45  ;;  %v3757_v35 = vsel %vm3725_vm7, %v3683_v53, %v3741_v34  ;;  %v3696_v44 = vadd.f32 %v6398_v28, %v8401_v29 }
 0xbe3   : > { %v3687_v32 = vpop.f32.mrf.mxu0  ;;  %v3777_v51 = vpack.c.bf16 %v3757_v35, %v3756_v43 }
 0xbe4   : > { %v3755_v37 = vsel %vm3723_vm10, %v3675_v45, %v3739_v42  ;;  %v3688_v12 = vadd.f32 %v8401_v29, %v3687_v32  ;;  %v3744_v30 = vmul.f32 0.2, %v3696_v44  ;;  %vm3728_vm14 = vcmp.ge.f32.partialorder %v3696_v44, 0.0 }
 0xbe5   : > { %v3776_v20 = vpack.c.bf16 %v3755_v37, %v3754_v7  ;;  %v6399_v24 = vpop.f32.mrf.mxu0 }
 0xbe6   : > { %v3699_v40 = vadd.f32 %v6399_v24, %v8401_v29  ;;  %v3742_v4 = vmul.f32 0.2, %v3688_v12  ;;  %vm3726_vm13 = vcmp.ge.f32.partialorder %v3688_v12, 0.0  ;;  %v3760_v34 = vsel %vm3728_vm14, %v3696_v44, %v3744_v30 }
 0xbe7   : > { %v3690_v6 = vpop.f32.mrf.mxu0  ;;  %6416 = vmatprep.mubr.msk.bf16.mxu1 %vm1512_vm12, %v3776_v20 }
 0xbe8   : > { %vm3729_vm11 = vcmp.ge.f32.partialorder %v3699_v40, 0.0  ;;  %v3745_v33 = vmul.f32 0.2, %v3699_v40  ;;  %v3691_v2 = vadd.f32 %v8401_v29, %v3690_v6  ;;  %6417 = vmatmul.mubr.msk.bf16.gmra.mxu1 %vm1512_vm12, %v3777_v51  ;;  %v3758_v53 = vsel %vm3726_vm13, %v3688_v12, %v3742_v4 }
 0xbe9   : > { %v6402_v18 = vpop.f32.mrf.mxu0 }
 0xbea   : > { %vm3727_vm15 = vcmp.ge.f32.partialorder %v3691_v2, 0.0  ;;  %v3743_v5 = vmul.f32 0.2, %v3691_v2  ;;  %v3761_v52 = vsel %vm3729_vm11, %v3699_v40, %v3745_v33  ;;  %v3712_v11 = vadd.f32 %v6402_v18, %v8401_v29 }
 0xbeb   : > { %v3703_v31 = vpop.f32.mrf.mxu0  ;;  %v3779_v42 = vpack.c.bf16 %v3761_v52, %v3760_v34 }
 0xbec   : > { %v3759_v38 = vsel %vm3727_vm15, %v3691_v2, %v3743_v5  ;;  %v3704_v21 = vadd.f32 %v8401_v29, %v3703_v31  ;;  %v3748_v12 = vmul.f32 0.2, %v3712_v11  ;;  %vm3732_vm2 = vcmp.ge.f32.partialorder %v3712_v11, 0.0  ;;  %v8433_v2 = vld [vmem:[%s9316_s6 + $0xd] ss:$0 sm:$0xff] }
 0xbed   : > { %v3778_v45 = vpack.c.bf16 %v3759_v38, %v3758_v53  ;;  %v6403_v28 = vpop.f32.mrf.mxu0 }
 0xbee   : > { %v3715_v35 = vadd.f32 %v6403_v28, %v8401_v29  ;;  %v3746_v7 = vmul.f32 0.2, %v3704_v21  ;;  %vm3730_vm1 = vcmp.ge.f32.partialorder %v3704_v21, 0.0  ;;  %v3764_v40 = vsel %vm3732_vm2, %v3712_v11, %v3748_v12 }
 0xbef   : > { %v3706_v32 = vpop.f32.mrf.mxu0  ;;  %6420 = vmatprep.mubr.msk.bf16.mxu1 %vm1512_vm12, %v3778_v45 }
 0xbf0   : > { %vm3733_vm0 = vcmp.ge.f32.partialorder %v3715_v35, 0.0  ;;  %v3749_v37 = vmul.f32 0.2, %v3715_v35  ;;  %v3707_v43 = vadd.f32 %v8401_v29, %v3706_v32  ;;  %6421 = vmatmul.mubr.msk.bf16.gmra.mxu1 %vm1512_vm12, %v3779_v42  ;;  %v3762_v24 = vsel %vm3730_vm1, %v3704_v21, %v3746_v7  ;;  %v6644_v29 = vld [vmem:[%s9315_s5 + $0x100] sm:$0xff]  }
 0xbf1   : > { %6434 = vmatprep.subr.bf16.mxu0 %v6644_v29 }
 0xbf2   : > { %vm3731_vm4 = vcmp.ge.f32.partialorder %v3707_v43, 0.0  ;;  %v3747_v20 = vmul.f32 0.2, %v3707_v43  ;;  %v3765_v44 = vsel %vm3733_vm0, %v3715_v35, %v3749_v37  ;;  %6435 = vmatpush3.bf16.msra.mxu0 %v6644_v29 }
 0xbf3   : > { %v3781_v4 = vpack.c.bf16 %v3765_v44, %v3764_v40 }
 0xbf4   : > { %v3763_v51 = vsel %vm3731_vm4, %v3707_v43, %v3747_v20 }
 0xbf5   : > { %v3780_v6 = vpack.c.bf16 %v3763_v51, %v3762_v24 }
 0xbf7   : > { %6424 = vmatprep.mubr.msk.bf16.mxu1 %vm1512_vm12, %v3780_v6 }
 0xbf8   : > { %6425 = vmatmul.mubr.msk.bf16.gmra.mxu1 %vm1512_vm12, %v3781_v4 }
 0xc9f   : > { %v6414_v33 = vpop.f32.mrf.mxu1 }
 0xca0   : > { %v3878_v5 = vadd.f32 %v6414_v33, %v8433_v2 }
 0xca1   : > { %v3869_v30 = vpop.f32.mrf.mxu1 }
 0xca2   : > { %v3870_v18 = vadd.f32 %v8433_v2, %v3869_v30  ;;  %v3950_v45 = vmul.f32 0.2, %v3878_v5  ;;  %vm3934_vm5 = vcmp.ge.f32.partialorder %v3878_v5, 0.0 }
 0xca3   : > { %v6415_v52 = vpop.f32.mrf.mxu1 }
 0xca4   : > { %v3881_v31 = vadd.f32 %v6415_v52, %v8433_v2  ;;  %v3948_v38 = vmul.f32 0.2, %v3870_v18  ;;  %vm3932_vm7 = vcmp.ge.f32.partialorder %v3870_v18, 0.0  ;;  %v3966_v43 = vsel %vm3934_vm5, %v3878_v5, %v3950_v45 }
 0xca5   : > { %v3872_v53 = vpop.f32.mrf.mxu1 }
 0xca6   : > { %vm3935_vm6 = vcmp.ge.f32.partialorder %v3881_v31, 0.0  ;;  %v3951_v21 = vmul.f32 0.2, %v3881_v31  ;;  %v3873_v34 = vadd.f32 %v8433_v2, %v3872_v53  ;;  %v3964_v32 = vsel %vm3932_vm7, %v3870_v18, %v3948_v38 }
 0xca8   : > { %v6418_v11 = vpop.f32.mrf.mxu1  ;;  %vm3933_vm9 = vcmp.ge.f32.partialorder %v3873_v34, 0.0  ;;  %v3949_v28 = vmul.f32 0.2, %v3873_v34  ;;  %v3967_v42 = vsel %vm3935_vm6, %v3881_v31, %v3951_v21 }
 0xca9   : > { %v3894_v20 = vadd.f32 %v6418_v11, %v8433_v2  ;;  %v3989_v24 = vpack.c.bf16 %v3967_v42, %v3966_v43 }
 0xcaa   : > { %v3885_v35 = vpop.f32.mrf.mxu1  ;;  %v3965_v7 = vsel %vm3933_vm9, %v3873_v34, %v3949_v28 }
 0xcab   : > { %v3886_v37 = vadd.f32 %v8433_v2, %v3885_v35  ;;  %v3988_v12 = vpack.c.bf16 %v3965_v7, %v3964_v32  ;;  %v3954_v33 = vmul.f32 0.2, %v3894_v20  ;;  %vm3938_vm13 = vcmp.ge.f32.partialorder %v3894_v20, 0.0 }
 0xcac   : > { %v6419_v44 = vpop.f32.mrf.mxu1 }
 0xcad   : > { %v3897_v51 = vadd.f32 %v6419_v44, %v8433_v2  ;;  %6436 = vmatprep.mubr.msk.bf16.mxu0 %vm1512_vm12, %v3988_v12  ;;  %v3952_v6 = vmul.f32 0.2, %v3886_v37  ;;  %vm3936_vm11 = vcmp.ge.f32.partialorder %v3886_v37, 0.0  ;;  %v3970_v21 = vsel %vm3938_vm13, %v3894_v20, %v3954_v33 }
 0xcae   : > { %v3888_v40 = vpop.f32.mrf.mxu1  ;;  %6437 = vmatmul.mubr.msk.bf16.vlgmr.msra.gmra.mxu0 %vm1512_vm12, %v3989_v24 }
 0xcaf   : > { %vm3939_vm10 = vcmp.ge.f32.partialorder %v3897_v51, 0.0  ;;  %v3955_v4 = vmul.f32 0.2, %v3897_v51  ;;  %v3889_v29 = vadd.f32 %v8433_v2, %v3888_v40  ;;  %v3968_v31 = vsel %vm3936_vm11, %v3886_v37, %v3952_v6 }
 0xcb0   : > { %v6422_v30 = vpop.f32.mrf.mxu1 }
 0xcb1   : > { %vm3937_vm14 = vcmp.ge.f32.partialorder %v3889_v29, 0.0  ;;  %v3953_v18 = vmul.f32 0.2, %v3889_v29  ;;  %v3971_v5 = vsel %vm3939_vm10, %v3897_v51, %v3955_v4  ;;  %v3910_v45 = vadd.f32 %v6422_v30, %v8433_v2 }
 0xcb2   : > { %v3901_v52 = vpop.f32.mrf.mxu1  ;;  %v3991_v28 = vpack.c.bf16 %v3971_v5, %v3970_v21 }
 0xcb3   : > { %v3969_v53 = vsel %vm3937_vm14, %v3889_v29, %v3953_v18  ;;  %v3902_v38 = vadd.f32 %v8433_v2, %v3901_v52  ;;  %v3958_v37 = vmul.f32 0.2, %v3910_v45  ;;  %vm3942_vm1 = vcmp.ge.f32.partialorder %v3910_v45, 0.0 }
 0xcb4   : > { %v3990_v34 = vpack.c.bf16 %v3969_v53, %v3968_v31  ;;  %v6423_v11 = vpop.f32.mrf.mxu1 }
 0xcb5   : > { %v3913_v42 = vadd.f32 %v6423_v11, %v8433_v2  ;;  %v3956_v32 = vmul.f32 0.2, %v3902_v38  ;;  %vm3940_vm0 = vcmp.ge.f32.partialorder %v3902_v38, 0.0  ;;  %v3974_v4 = vsel %vm3942_vm1, %v3910_v45, %v3958_v37 }
 0xcb6   : > { %v3904_v35 = vpop.f32.mrf.mxu1  ;;  %6440 = vmatprep.mubr.msk.bf16.mxu0 %vm1512_vm12, %v3990_v34 }
 0xcb7   : > { %vm3943_vm15 = vcmp.ge.f32.partialorder %v3913_v42, 0.0  ;;  %v3959_v7 = vmul.f32 0.2, %v3913_v42  ;;  %v3905_v43 = vadd.f32 %v8433_v2, %v3904_v35  ;;  %6441 = vmatmul.mubr.msk.bf16.gmra.mxu0 %vm1512_vm12, %v3991_v28  ;;  %v3972_v51 = vsel %vm3940_vm0, %v3902_v38, %v3956_v32 }
 0xcb8   : > { %v6426_v12 = vpop.f32.mrf.mxu1 }
 0xcb9   : > { %vm3941_vm2 = vcmp.ge.f32.partialorder %v3905_v43, 0.0  ;;  %v3957_v20 = vmul.f32 0.2, %v3905_v43  ;;  %v3975_v44 = vsel %vm3943_vm15, %v3913_v42, %v3959_v7  ;;  %v3926_v33 = vadd.f32 %v6426_v12, %v8433_v2 }
 0xcba   : > { %v3917_v24 = vpop.f32.mrf.mxu1  ;;  %v3993_v18 = vpack.c.bf16 %v3975_v44, %v3974_v4 }
 0xcbb   : > { %v3973_v40 = vsel %vm3941_vm2, %v3905_v43, %v3957_v20  ;;  %v3918_v6 = vadd.f32 %v8433_v2, %v3917_v24  ;;  %v3962_v38 = vmul.f32 0.2, %v3926_v33  ;;  %vm3946_vm7 = vcmp.ge.f32.partialorder %v3926_v33, 0.0  ;;  %v8467_v43 = vld [vmem:[%s9316_s6 + $0x11] ss:$0 sm:$0xff] }
 0xcbc   : > { %v3992_v29 = vpack.c.bf16 %v3973_v40, %v3972_v51  ;;  %v6427_v30 = vpop.f32.mrf.mxu1  ;;  %v9464_v51 = vld [vmem:[#allocation44_spill] sm:$0xff] }
 0xcbd   : > { %v3929_v5 = vadd.f32 %v6427_v30, %v8433_v2  ;;  %v3960_v31 = vmul.f32 0.2, %v3918_v6  ;;  %vm3944_vm6 = vcmp.ge.f32.partialorder %v3918_v6, 0.0  ;;  %v3978_v42 = vsel %vm3946_vm7, %v3926_v33, %v3962_v38 }
 0xcbe   : > { %v3920_v52 = vpop.f32.mrf.mxu1  ;;  %6444 = vmatprep.mubr.msk.bf16.mxu0 %vm1512_vm12, %v3992_v29 }
 0xcbf   : > { %vm3947_vm4 = vcmp.ge.f32.partialorder %v3929_v5, 0.0  ;;  %v3963_v53 = vmul.f32 0.2, %v3929_v5  ;;  %v3921_v21 = vadd.f32 %v8433_v2, %v3920_v52  ;;  %6445 = vmatmul.mubr.msk.bf16.gmra.mxu0 %vm1512_vm12, %v3993_v18  ;;  %v3976_v11 = vsel %vm3944_vm6, %v3918_v6, %v3960_v31  ;;  %v5836_v2 = vld [vmem:[%s9314_s4 + $0xc] sm:$0xf] }
 0xcc0   : > { %6547 = vmatprep.subr.msk.bf16.mxu1 %vm1297_vm3, %v5836_v2  ;;  %v4421_v7 = vsel %vm1297_vm3, %v5836_v2, 0 }
 0xcc1   : > { %vm3945_vm5 = vcmp.ge.f32.partialorder %v3921_v21, 0.0  ;;  %v3961_v34 = vmul.f32 0.2, %v3921_v21  ;;  %v3979_v45 = vsel %vm3947_vm4, %v3929_v5, %v3963_v53  ;;  %6453 = vmatpush3.bf16.msra.mxu1 %v4421_v7 }
 0xcc2   : > { %v3995_v32 = vpack.c.bf16 %v3979_v45, %v3978_v42 }
 0xcc3   : > { %v3977_v28 = vsel %vm3945_vm5, %v3921_v21, %v3961_v34 }
 0xcc4   : > { %v3994_v35 = vpack.c.bf16 %v3977_v28, %v3976_v11 }
 0xcc6   : > { %6448 = vmatprep.mubr.msk.bf16.mxu0 %vm1512_vm12, %v3994_v35 }
 0xcc7   : > { %6449 = vmatmul.mubr.msk.bf16.gmra.mxu0 %vm1512_vm12, %v3995_v32  ;;  %v9465_v32 = vld [vmem:[#allocation5_spill] sm:$0xff] }
 0xd6e   : > { %v6438_v37 = vpop.f32.mrf.mxu0 }
 0xd6f   : > { %v4092_v12 = vadd.f32 %v6438_v37, %v8467_v43 }
 0xd70   : > { %v4083_v20 = vpop.f32.mrf.mxu0 }
 0xd71   : > { %6785 = vtanh.f32 %v4092_v12  ;;  %v4084_v44 = vadd.f32 %v8467_v43, %v4083_v20  ;;  %v4180_v30 = vmul.f32 %v4092_v12, %v9464_v51 }
 0xd72   : > { %v6439_v24 = vpop.f32.mrf.mxu0 }
 0xd73   : > { %6787 = vtanh.f32 %v4084_v44  ;;  %v4178_v40 = vmul.f32 %v4084_v44, %v9464_v51  ;;  %v4095_v6 = vadd.f32 %v6439_v24, %v8467_v43  ;;  %v9466_v44 = vld [vmem:[#allocation48_spill] sm:$0xff] }
 0xd74   : > { %v4086_v4 = vpop.f32.mrf.mxu0  ;;  %v3318_v24 = vadd.f32 %v8095_v63, %v9466_v44 }
 0xd75   : > { %6789 = vtanh.f32 %v4095_v6  ;;  %v4087_v29 = vadd.f32 %v8467_v43, %v4086_v4  ;;  %4258 = vrot.lane.b32.xlu0 %v4178_v40, %s6994_s9  ;;  %v4181_v21 = vmul.f32 %v4095_v6, %v9464_v51 }
 0xd77   : > { %v6442_v33 = vpop.f32.mrf.mxu0  ;;  %6791 = vtanh.f32 %v4087_v29  ;;  %v4179_v18 = vmul.f32 %v4087_v29, %v9464_v51 }
 0xd78   : > { %v4108_v5 = vadd.f32 %v6442_v33, %v8467_v43 }
 0xd79   : > { %v4099_v52 = vpop.f32.mrf.mxu0  ;;  %4260 = vrot.lane.b32.xlu1 %v4179_v18, %s6994_s9  ;;  %4262 = vrot.lane.b32.xlu0 %v4180_v30, %s6994_s9  ;;  %v9468_v18 = vld [vmem:[#allocation45_spill] sm:$0xff] }
 0xd7a   : > { %6793 = vtanh.f32 %v4108_v5  ;;  %v4100_v31 = vadd.f32 %v8467_v43, %v4099_v52  ;;  %v4184_v42 = vmul.f32 %v4108_v5, %v9464_v51  ;;  %v3316_v63 = vadd.f32 %v8098_v36, %v9468_v18 }
 0xd7b   : > { %v6443_v53 = vpop.f32.mrf.mxu0 }
 0xd7c   : > { %6795 = vtanh.f32 %v4100_v31  ;;  %v4182_v38 = vmul.f32 %v4100_v31, %v9464_v51  ;;  %v4111_v34 = vadd.f32 %v6443_v53, %v8467_v43 }
 0xd7d   : > { %v4102_v45 = vpop.f32.mrf.mxu0  ;;  %4264 = vrot.lane.b32.xlu1 %v4181_v21, %s6994_s9 }
 0xd7e   : > { %6797 = vtanh.f32 %v4111_v34  ;;  %v4103_v11 = vadd.f32 %v8467_v43, %v4102_v45  ;;  %4266 = vrot.lane.b32.xlu0 %v4182_v38, %s6994_s9  ;;  %v6786_v28 = vpop.eup %6785  ;;  %v4185_v29 = vmul.f32 %v4111_v34, %v9464_v51  ;;  %v9470_v34 = vld [vmem:[#allocation46_spill] sm:$0xff] }
 0xd7f   : > { %v6446_v35 = vpop.f32.mrf.mxu0  ;;  %v8489_v2 = vmul.f32 %v6786_v28, %v9465_v32  ;;  %v3319_v45 = vadd.f32 %v8106_v3, %v9470_v34  ;;  %v9473_v34 = vld [vmem:[#allocation49_spill] sm:$0xff] }
 0xd80   : > { %6799 = vtanh.f32 %v4103_v11  ;;  %v4183_v7 = vmul.f32 %v4103_v11, %v9464_v51  ;;  %v4124_v37 = vadd.f32 %v6446_v35, %v8467_v43  ;;  %v6788_v12 = vpop.eup %6787 }
 0xd81   : > { %v4115_v20 = vpop.f32.mrf.mxu0  ;;  %v8496_v40 = vmul.f32 %v6788_v12, %v9465_v32  ;;  %v8503_v30 = vadd.f32 %v8489_v2, %v3318_v24 }
 0xd82   : > { %6801 = vtanh.f32 %v4124_v37  ;;  %v4116_v6 = vadd.f32 %v8467_v43, %v4115_v20  ;;  %4268 = vrot.lane.b32.xlu1 %v4183_v7, %s6994_s9  ;;  %4270 = vrot.lane.b32.xlu0 %v4184_v42, %s6994_s9  ;;  %v6790_v4 = vpop.eup %6789  ;;  %v4188_v42 = vmul.f32 %v4124_v37, %v9464_v51  ;;  %v9471_v7 = vld [vmem:[#allocation47_spill] sm:$0xff] }
 0xd83   : > { %v6447_v33 = vpop.f32.mrf.mxu0  ;;  %9467 = vst [vmem:[#allocation18_spill] sm:$0xff] %v8503_v30  ;;  %v8508_v5 = vmul.f32 %v6790_v4, %v9465_v32  ;;  %v8513_v38 = vadd.f32 %v8496_v40, %v3316_v63  ;;  %v3317_v12 = vadd.f32 %v8102_v39, %v9471_v7  ;;  %v9472_v37 = vld [vmem:[#allocation51_spill] sm:$0xff] }
 0xd84   : > { %6803 = vtanh.f32 %v4116_v6  ;;  %v4186_v52 = vmul.f32 %v4116_v6, %v9464_v51  ;;  %v4127_v31 = vadd.f32 %v6447_v33, %v8467_v43  ;;  %v6792_v53 = vpop.eup %6791  ;;  %v3322_v33 = vadd.f32 %v8113_v26, %v9472_v37  ;;  %v9475_v37 = vld [vmem:[#allocation55_spill] sm:$0xff] }
 0xd85   : > { %v4118_v21 = vpop.f32.mrf.mxu0  ;;  %9469 = vst [vmem:[#allocation15_spill] sm:$0xff] %v8513_v38  ;;  %v8518_v11 = vmul.f32 %v6792_v53, %v9465_v32  ;;  %v8527_v20 = vadd.f32 %v8508_v5, %v3319_v45  ;;  %v3320_v26 = vadd.f32 %v8110_v59, %v9473_v34 }
 0xd86   : > { %6805 = vtanh.f32 %v4127_v31  ;;  %v4119_v36 = vadd.f32 %v8467_v43, %v4118_v21  ;;  %4272 = vrot.lane.b32.xlu1 %v4185_v29, %s6994_s9  ;;  %4274 = vrot.lane.b32.xlu0 %v4186_v52, %s6994_s9  ;;  %v4189_v52 = vmul.f32 %v4127_v31, %v9464_v51  ;;  %v9474_v31 = vld [vmem:[#allocation52_spill] sm:$0xff] }
 0xd87   : > { %v6794_v28 = vpop.eup %6793  ;;  %v6450_v35 = vpop.f32.mrf.mxu0  ;;  %v8535_v29 = vadd.f32 %v8518_v11, %v3317_v12  ;;  %v3323_v12 = vadd.f32 %v8122_v13, %v9474_v31 }
 0xd88   : > { %v8530_v3 = vmul.f32 %v6794_v28, %v9465_v32  ;;  %6807 = vtanh.f32 %v4119_v36  ;;  %v4187_v44 = vmul.f32 %v4119_v36, %v9464_v51  ;;  %v4140_v24 = vadd.f32 %v6450_v35, %v8467_v43 }
 0xd89   : > { %v6796_v6 = vpop.eup %6795  ;;  %v4131_v4 = vpop.f32.mrf.mxu0 }
 0xd8a   : > { %v8540_v39 = vmul.f32 %v6796_v6, %v9465_v32  ;;  %6809 = vtanh.f32 %v4140_v24  ;;  %v4132_v18 = vadd.f32 %v8467_v43, %v4131_v4  ;;  %4276 = vrot.lane.b32.xlu1 %v4187_v44, %s6994_s9  ;;  %4278 = vrot.lane.b32.xlu0 %v4188_v42, %s6994_s9  ;;  %v8547_v21 = vadd.f32 %v8530_v3, %v3322_v33 }
 0xd8b   : > { %v6798_v63 = vpop.eup %6797  ;;  %v6451_v53 = vpop.f32.mrf.mxu0  ;;  %v3326_v33 = vadd.f32 %v8129_v47, %v9475_v37  ;;  %v4192_v34 = vmul.f32 %v4140_v24, %v9464_v51  ;;  %v6645_v24 = vld [vmem:[%s9315_s5 + $0x138] sm:$0xff]  }
 0xd8c   : > { %v8552_v45 = vmul.f32 %v6798_v63, %v9465_v32  ;;  %6811 = vtanh.f32 %v4132_v18  ;;  %v4190_v36 = vmul.f32 %v4132_v18, %v9464_v51  ;;  %v4143_v28 = vadd.f32 %v6451_v53, %v8467_v43  ;;  %v9476_v18 = vld [vmem:[#allocation50_spill] sm:$0xff]  ;;  %v9477_v63 = vld [vmem:[#allocation9_spill] sm:$0xff]  ;;  %6470 = vmatprep.subr.bf16.mxu0 %v6645_v24 }
 0xd8d   : > { %v6800_v35 = vpop.eup %6799  ;;  %v4134_v42 = vpop.f32.mrf.mxu0  ;;  %v8557_v7 = vadd.f32 %v8540_v39, %v3320_v26  ;;  %v3321_v53 = vadd.f32 %v9477_v63, %v9476_v18  ;;  %v9481_v63 = vld [vmem:[#allocation10_spill] sm:$0xff]  ;;  %6471 = vmatpush3.bf16.msra.mxu0 %v6645_v24  ;;  %v9486_v24 = vld [vmem:[#allocation57_spill] sm:$0xff] }
 0xd8e   : > { %v4167_v44 = vmul.f32 %v6800_v35, %v9465_v32  ;;  %6813 = vtanh.f32 %v4143_v28  ;;  %v4135_v59 = vadd.f32 %v8467_v43, %v4134_v42  ;;  %4280 = vrot.lane.b32.xlu1 %v4189_v52, %s6994_s9  ;;  %4282 = vrot.lane.b32.xlu0 %v4190_v36, %s6994_s9  ;;  %v8566_v4 = vadd.f32 %v8552_v45, %v3323_v12  ;;  %v9478_v35 = vld [vmem:[#allocation53_spill] sm:$0xff]  ;;  %v9479_v42 = vld [vmem:[#allocation8_spill] sm:$0xff] }
 0xd8f   : > { %v6802_v6 = vpop.eup %6801  ;;  %v3324_v31 = vadd.f32 %v9479_v42, %v9478_v35  ;;  %v4193_v37 = vmul.f32 %v4143_v28, %v9464_v51  ;;  %v9482_v35 = vld [vmem:[#allocation54_spill] sm:$0xff]  ;;  %v9483_v42 = vld [vmem:[#allocation12_spill] sm:$0xff]  ;;  %v9484_v28 = vld [vmem:[#allocation59_spill] sm:$0xff] }
 0xd90   : > { %v4172_v13 = vmul.f32 %v6802_v6, %v9465_v32  ;;  %6815 = vtanh.f32 %v4135_v59  ;;  %v4191_v43 = vmul.f32 %v4135_v59, %v9464_v51  ;;  %v8575_v26 = vadd.f32 %v4167_v44, %v3321_v53  ;;  %v6646_v59 = vld [vmem:[%s9315_s5 + $0x130] sm:$0xff]  }
 0xd91   : > { %v6804_v52 = vpop.eup %6803  ;;  %v3325_v38 = vadd.f32 %v9483_v42, %v9482_v35  ;;  %6472 = vmatprep.subr.bf16.mxu0 %v6646_v59 }
 0xd92   : > { %v4170_v36 = vmul.f32 %v6804_v52, %v9465_v32  ;;  %4284 = vrot.lane.b32.xlu1 %v4191_v43, %s6994_s9  ;;  %4286 = vrot.lane.b32.xlu0 %v4192_v34, %s6994_s9  ;;  %v8580_v47 = vadd.f32 %v4172_v13, %v3326_v33  ;;  %v9480_v33 = vld [vmem:[#allocation56_spill] sm:$0xff] }
 0xd93   : > { %v6806_v12 = vpop.eup %6805  ;;  %v3327_v53 = vadd.f32 %v9481_v63, %v9480_v33  ;;  %6473 = vmatpush3.bf16.msra.mxu0 %v6646_v59  ;;  %v9488_v59 = vld [vmem:[#allocation58_spill] sm:$0xff] }
 0xd94   : > { %v4173_v6 = vmul.f32 %v6806_v12, %v9465_v32  ;;  %v8592_v18 = vadd.f32 %v4170_v36, %v3324_v31  ;;  %v3330_v31 = vadd.f32 %v8146_v48, %v9484_v28 }
 0xd95   : > { %v6808_v34 = vpop.eup %6807 }
 0xd96   : > { %v4171_v43 = vmul.f32 %v6808_v34, %v9465_v32  ;;  %4288 = vrot.lane.b32.xlu1 %v4193_v37, %s6994_s9  ;;  %v8598_v52 = vadd.f32 %v4173_v6, %v3327_v53  ;;  %v3328_v53 = vadd.f32 %v8143_v17, %v9486_v24  ;;  %v4194_v17 = vmul.f32 1.442695, %v8496_v40 }
 0xd97   : > { %v6810_v12 = vpop.eup %6809  ;;  %v4196_v24 = vmul.f32 1.442695, %v8518_v11 }
 0xd98   : > { %v4176_v51 = vmul.f32 %v6810_v12, %v9465_v32  ;;  %v8605_v33 = vadd.f32 %v4171_v43, %v3325_v38  ;;  %v9487_v12 = vld [vmem:[#allocation60_spill] sm:$0xff]  ;;  %6817 = vpow2.f32 %v4194_v17 }
 0xd99   : > { %v6812_v63 = vpop.eup %6811  ;;  %v3331_v48 = vadd.f32 %v8157_v46, %v9487_v12  ;;  %v4200_v46 = vmul.f32 1.442695, %v8508_v5  ;;  %v4206_v12 = vmul.f32 1.442695, %v8530_v3  ;;  %v4212_v5 = vmul.f32 1.442695, %v4171_v43 }
 0xd9a   : > { %v4174_v34 = vmul.f32 %v6812_v63, %v9465_v32  ;;  %v8608_v37 = vadd.f32 %v4176_v51, %v3330_v31  ;;  %v3329_v31 = vadd.f32 %v8150_v23, %v9488_v59  ;;  %v4208_v23 = vmul.f32 1.442695, %v8552_v45 }
 0xd9b   : > { %v6814_v30 = vpop.eup %6813  ;;  %v4216_v3 = vmul.f32 1.442695, %v4173_v6 }
 0xd9c   : > { %9485 = vst [vmem:[#allocation20_spill] sm:$0xff] %v8608_v37  ;;  %v8613_v35 = vmul.f32 %v6814_v30, %v9465_v32  ;;  %v8615_v42 = vadd.f32 %v4174_v34, %v3328_v53  ;;  %v4198_v30 = vmul.f32 1.442695, %v8489_v2  ;;  %v4202_v53 = vmul.f32 1.442695, %v8540_v39 }
 0xd9d   : > { %v6816_v38 = vpop.eup %6815  ;;  %v4210_v2 = vmul.f32 1.442695, %v4170_v36 }
 0xd9e   : > { %v4175_v28 = vmul.f32 %v6816_v38, %v9465_v32  ;;  %v8621_v63 = vadd.f32 %v8613_v35, %v3331_v48  ;;  %6819 = vpow2.f32 %v4198_v30  ;;  %v4204_v48 = vmul.f32 1.442695, %v4167_v44 }
 0xd9f   : > { %6821 = vpow2.f32 %v4196_v24  ;;  %v4214_v38 = vmul.f32 1.442695, %v4172_v13 }
 0xda0   : > { %v8625_v37 = vadd.f32 %v4175_v28, %v3329_v31  ;;  %6823 = vpow2.f32 %v4200_v46 }
 0xda1   : > { %6825 = vpow2.f32 %v4202_v53  ;;  %v4218_v53 = vmul.f32 1.442695, %v4174_v34 }
 0xda2   : > { %6827 = vpow2.f32 %v4206_v12 }
 0xda3   : > { %6829 = vpow2.f32 %v4204_v48 }
 0xda4   : > { %6831 = vpow2.f32 %v4208_v23  ;;  %v4222_v23 = vmul.f32 1.442695, %v4176_v51 }
 0xda5   : > { %v6818_v40 = vpop.eup %6817  ;;  %6833 = vpow2.f32 %v4210_v2  ;;  %v4220_v2 = vmul.f32 1.442695, %v4175_v28 }
 0xda6   : > { %v4226_v59 = vmul.f32 %v6818_v40, %v8166_v8  ;;  %6835 = vpow2.f32 %v4214_v38 }
 0xda7   : > { %6837 = vpow2.f32 %v4212_v5 }
 0xda8   : > { %6839 = vpow2.f32 %v4216_v3 }
 0xda9   : > { %6841 = vpow2.f32 %v4218_v53 }
 0xdaa   : > { %6843 = vpow2.f32 %v4222_v23 }
 0xdab   : > { %v6820_v11 = vpop.eup %6819  ;;  %6845 = vpow2.f32 %v4220_v2 }
 0xdac   : > { %v6822_v31 = vpop.eup %6821  ;;  %v4228_v24 = vmul.f32 %v6820_v11, %v8173_v61 }
 0xdad   : > { %v6824_v44 = vpop.eup %6823  ;;  %v4227_v30 = vmul.f32 %v6822_v31, %v8169_v10 }
 0xdae   : > { %v6826_v45 = vpop.eup %6825  ;;  %v4229_v48 = vmul.f32 %v6824_v44, %v8188_v0 }
 0xdaf   : > { %v6828_v12 = vpop.eup %6827  ;;  %v4230_v61 = vmul.f32 %v6826_v45, %v8202_v62  ;;  %v4224_v62 = vmul.f32 1.442695, %v8613_v35 }
 0xdb0   : > { %v6830_v6 = vpop.eup %6829  ;;  %v4232_v51 = vmul.f32 %v6828_v12, %v8214_v49 }
 0xdb1   : > { %6847 = vpow2.f32 %v4224_v62 }
 0xde7   : > { %v4259_v17 = vpop.permute.xlu0 %4258 }
 0xde8   : > { %v4306_v39 = vadd.f32 %v4259_v17, %v4226_v59  ;;  %v4231_v17 = vmul.f32 %v6830_v6, %v8211_v57 }
 0xdea   : > { %v4322_v36 = vmul.f32 %v9465_v32, %v4306_v39 }
 0xdeb   : > { %v4261_v13 = vpop.permute.xlu1 %4260  ;;  %v4263_v46 = vpop.permute.xlu0 %4262 }
 0xdec   : > { %v4307_v8 = vadd.f32 %v4261_v13, %v4227_v30  ;;  %v4308_v43 = vadd.f32 %v4263_v46, %v4228_v24  ;;  %v8643_v38 = vadd.f32 %v4322_v36, %v8185_v58  ;;  %v6832_v58 = vpop.eup %6831 }
 0xded   : > { %v6834_v57 = vpop.eup %6833  ;;  %v4233_v36 = vmul.f32 %v6832_v58, %v8230_v9 }
 0xdee   : > { %v4323_v40 = vmul.f32 %v9465_v32, %v4307_v8  ;;  %v4324_v10 = vmul.f32 %v9465_v32, %v4308_v43  ;;  %v8662_v49 = vmul.f32 %v9465_v32, %v8643_v38  ;;  %v6836_v13 = vpop.eup %6835 }
 0xdef   : > { %v4265_v11 = vpop.permute.xlu1 %4264  ;;  %v6838_v43 = vpop.eup %6837 }
 0xdf0   : > { %v4267_v34 = vpop.permute.xlu0 %4266  ;;  %v8646_v59 = vadd.f32 %v4323_v40, %v8179_v22  ;;  %v4309_v0 = vadd.f32 %v4265_v11, %v4229_v48  ;;  %v8650_v31 = vadd.f32 %v4324_v10, %v8192_v14  ;;  %v4234_v48 = vmul.f32 %v6834_v57, %v8244_v55  ;;  %v6840_v2 = vpop.eup %6839 }
 0xdf1   : > { %v4310_v5 = vadd.f32 %v4267_v34, %v4230_v61  ;;  %v4236_v61 = vmul.f32 %v6836_v13, %v8256_v27  ;;  %v6842_v27 = vpop.eup %6841 }
 0xdf2   : > { %v8656_v28 = vmul.f32 %v9465_v32, %v8646_v59  ;;  %v4325_v22 = vmul.f32 %v9465_v32, %v4309_v0  ;;  %v8669_v24 = vmul.f32 %v9465_v32, %v8650_v31 }
 0xdf3   : > { %v4326_v39 = vmul.f32 %v9465_v32, %v4310_v5 }
 0xdf4   : > { %v4269_v14 = vpop.permute.xlu1 %4268  ;;  %v4271_v3 = vpop.permute.xlu0 %4270  ;;  %v8665_v44 = vadd.f32 %v4325_v22, %v8199_v54  ;;  %v4388_v45 = vpack.c.bf16 %v8656_v28, %v8662_v49 }
 0xdf5   : > { %v4311_v35 = vadd.f32 %v4269_v14, %v4231_v17  ;;  %v4312_v30 = vadd.f32 %v4271_v3, %v4232_v51  ;;  %v8679_v54 = vadd.f32 %v4326_v39, %v8219_v25  ;;  %v4237_v39 = vmul.f32 %v6840_v2, %v8272_v41 }
 0xdf6   : > { %v8676_v46 = vmul.f32 %v9465_v32, %v8665_v44  ;;  %6454 = vmatprep.mubr.msk.bf16.mxu1 %vm1272_vm8, %v4388_v45  ;;  %v4238_v45 = vmul.f32 %v6842_v27, %v8286_v15 }
 0xdf7   : > { %v4327_v53 = vmul.f32 %v9465_v32, %v4311_v35  ;;  %v4328_v8 = vmul.f32 %v9465_v32, %v4312_v30  ;;  %v8696_v11 = vmul.f32 %v9465_v32, %v8679_v54 }
 0xdf8   : > { %v4273_v12 = vpop.permute.xlu1 %4272  ;;  %v4275_v9 = vpop.permute.xlu0 %4274  ;;  %v4389_v23 = vpack.c.bf16 %v8676_v46, %v8669_v24 }
 0xdf9   : > { %v8688_v6 = vadd.f32 %v4327_v53, %v8223_v56  ;;  %v4313_v40 = vadd.f32 %v4273_v12, %v4233_v36  ;;  %v8691_v25 = vadd.f32 %v4328_v8, %v8236_v50  ;;  %v4314_v10 = vadd.f32 %v4275_v9, %v4234_v48  ;;  %v9493_v12 = vld [vmem:[#allocation64_spill] sm:$0xff] }
 0xdfa   : > { %6455 = vmatmul.mubr.msk.bf16.vlgmr.msra.gmra.mxu1 %vm1272_vm8, %v4389_v23  ;;  %v4235_v56 = vmul.f32 %v6838_v43, %v8253_v16  ;;  %v6844_v16 = vpop.eup %6843 }
 0xdfb   : > { %v8700_v55 = vmul.f32 %v9465_v32, %v8688_v6  ;;  %v4329_v34 = vmul.f32 %v9465_v32, %v4313_v40  ;;  %v4330_v50 = vmul.f32 %v9465_v32, %v4314_v10  ;;  %v8713_v22 = vmul.f32 %v9465_v32, %v8691_v25  ;;  %v6846_v35 = vpop.eup %6845 }
 0xdfc   : > { %v4277_v0 = vpop.permute.xlu1 %4276  ;;  %v4279_v5 = vpop.permute.xlu0 %4278  ;;  %v4240_v48 = vmul.f32 %v6844_v16, %v9493_v12  ;;  %v9501_v16 = vld [vmem:[#allocation62_spill] sm:$0xff] }
 0xdfd   : > { %9489 = vst [vmem:[#allocation24_spill] sm:$0xff] %v8700_v55  ;;  %v8707_v51 = vadd.f32 %v4329_v34, %v8241_v1  ;;  %v4315_v17 = vadd.f32 %v4277_v0, %v4235_v56  ;;  %v4316_v62 = vadd.f32 %v4279_v5, %v4236_v61  ;;  %v4390_v58 = vpack.c.bf16 %v8700_v55, %v8696_v11  ;;  %v6848_v9 = vpop.eup %6847  ;;  %v9497_v56 = vld [vmem:[#allocation11_spill] sm:$0xff]  ;;  %v9507_v12 = vld [vmem:[#allocation66_spill] sm:$0xff] }
 0xdfe   : > { %v8721_v3 = vadd.f32 %v4330_v50, %v8261_v60  ;;  %v9492_v60 = vld [vmem:[#allocation13_spill] sm:$0xff] }
 0xdff   : > { %v8718_v14 = vmul.f32 %v9465_v32, %v8707_v51  ;;  %v4331_v1 = vmul.f32 %v9465_v32, %v4315_v17  ;;  %v4332_v57 = vmul.f32 %v9465_v32, %v4316_v62  ;;  %6458 = vmatprep.mubr.msk.bf16.mxu1 %vm1272_vm8, %v4390_v58  ;;  %v9499_v62 = vld [vmem:[#allocation65_spill] sm:$0xff] }
 0xe00   : > { %v4281_v30 = vpop.permute.xlu1 %4280  ;;  %v4283_v36 = vpop.permute.xlu0 %4282  ;;  %v8738_v23 = vmul.f32 %v9465_v32, %v8721_v3  ;;  %v4241_v58 = vmul.f32 %v6848_v9, %v9499_v62 }
 0xe01   : > { %9490 = vst [vmem:[#allocation26_spill] sm:$0xff] %v8718_v14  ;;  %v4391_v41 = vpack.c.bf16 %v8718_v14, %v8713_v22  ;;  %v8730_v13 = vadd.f32 %v4331_v1, %v8265_v19  ;;  %v4317_v53 = vadd.f32 %v4281_v30, %v4237_v39  ;;  %v8733_v8 = vadd.f32 %v4332_v57, %v9492_v60  ;;  %v9496_v19 = vld [vmem:[#allocation61_spill] sm:$0xff] }
 0xe02   : > { %v4318_v43 = vadd.f32 %v4283_v36, %v4238_v45  ;;  %9494 = vst [vmem:[#allocation32_spill] sm:$0xff] %v8738_v23  ;;  %v4239_v10 = vmul.f32 %v6846_v35, %v9496_v19  ;;  %v9503_v36 = vld [vmem:[#allocation63_spill] sm:$0xff] }
 0xe03   : > { %9491 = vst [vmem:[#allocation22_spill] sm:$0xff] %v8730_v13  ;;  %v8742_v15 = vmul.f32 %v9465_v32, %v8730_v13  ;;  %v4333_v40 = vmul.f32 %v9465_v32, %v4317_v53  ;;  %6459 = vmatmul.mubr.msk.bf16.gmra.mxu1 %vm1272_vm8, %v4391_v41  ;;  %v8755_v17 = vmul.f32 %v9465_v32, %v8733_v8 }
 0xe04   : > { %v4334_v61 = vmul.f32 %v9465_v32, %v4318_v43  ;;  %v4285_v2 = vpop.permute.xlu1 %4284  ;;  %v4287_v34 = vpop.permute.xlu0 %4286 }
 0xe05   : > { %9495 = vst [vmem:[#allocation28_spill] sm:$0xff] %v8742_v15  ;;  %v8749_v50 = vadd.f32 %v4333_v40, %v9497_v56  ;;  %v4319_v0 = vadd.f32 %v4285_v2, %v4239_v10  ;;  %v4320_v5 = vadd.f32 %v4287_v34, %v4240_v48  ;;  %v4392_v27 = vpack.c.bf16 %v8742_v15, %v8738_v23  ;;  %v9509_v40 = vld [vmem:[#allocation67_spill] sm:$0xff]  ;;  %v6647_v56 = vld [vmem:[%s9315_s5 + $0x128] sm:$0xff]  }
 0xe06   : > { %9498 = vst [vmem:[#allocation34_spill] sm:$0xff] %v8755_v17  ;;  %v8763_v1 = vadd.f32 %v4334_v61, %v9501_v16  ;;  %6474 = vmatprep.subr.bf16.mxu0 %v6647_v56  ;;  %v9513_v16 = vld [vmem:[#allocation17_spill] sm:$0xff] }
 0xe07   : > { %v8760_v39 = vmul.f32 %v9465_v32, %v8749_v50  ;;  %v4335_v57 = vmul.f32 %v9465_v32, %v4319_v0  ;;  %v4336_v35 = vmul.f32 %v9465_v32, %v4320_v5  ;;  %6462 = vmatprep.mubr.msk.bf16.mxu1 %vm1272_vm8, %v4392_v27  ;;  %6475 = vmatpush3.bf16.msra.mxu0 %v6647_v56  ;;  %v6648_v0 = vld [vmem:[%s9315_s5 + $0x120] sm:$0xff]   ;;  %v6650_v5 = vld [vmem:[%s9315_s5 + $0x150] sm:$0xff]   ;;  %v6651_v27 = vld [vmem:[%s9315_s5 + $0x148] sm:$0xff]  }
 0xe08   : > { %9502 = vst [vmem:[#allocation36_spill] sm:$0xff] %v8763_v1  ;;  %v4289_v30 = vpop.permute.xlu1 %4288  ;;  %v8775_v60 = vmul.f32 %v9465_v32, %v8763_v1  ;;  %6476 = vmatprep.subr.bf16.mxu0 %v6648_v0  ;;  %v9516_v56 = vld [vmem:[#allocation16_spill] sm:$0xff] }
 0xe09   : > { %9500 = vst [vmem:[#allocation30_spill] sm:$0xff] %v8760_v39  ;;  %v4393_v45 = vpack.c.bf16 %v8760_v39, %v8755_v17  ;;  %v8771_v41 = vadd.f32 %v4335_v57, %v9503_v36  ;;  %v4321_v53 = vadd.f32 %v4289_v30, %v4241_v58  ;;  %v8782_v48 = vadd.f32 %v4336_v35, %v9507_v12  ;;  %v9514_v35 = vld [vmem:[#allocation14_spill] sm:$0xff]  ;;  %v9534_v17 = vld [vmem:[#allocation15_spill] sm:$0xff] }
 0xe0a   : > { %9505 = vst [vmem:[#allocation42_spill] sm:$0xff] %v8775_v60 }
 0xe0b   : > { %9504 = vst [vmem:[#allocation40_spill] sm:$0xff] %v8771_v41  ;;  %v8779_v43 = vmul.f32 %v9465_v32, %v8771_v41  ;;  %9508 = vst [vmem:[#allocation44_spill] sm:$0xff] %v8782_v48  ;;  %v4337_v9 = vmul.f32 %v9465_v32, %v4321_v53  ;;  %6463 = vmatmul.mubr.msk.bf16.gmra.mxu1 %vm1272_vm8, %v4393_v45  ;;  %v8793_v61 = vmul.f32 %v9465_v32, %v8782_v48  ;;  %v8823_v45 = vld [vmem:[%s9316_s6 + $0x6] ss:$0 sm:$0xff]  ;;  %v9515_v53 = vld [vmem:[#allocation19_spill] sm:$0xff] }
 0xe0c   : > { %6477 = vmatpush3.bf16.msra.mxu0 %v6648_v0 }
 0xe0d   : > { %9506 = vst [vmem:[#allocation38_spill] sm:$0xff] %v8779_v43  ;;  %v8787_v19 = vadd.f32 %v4337_v9, %v9509_v40  ;;  %v4394_v10 = vpack.c.bf16 %v8779_v43, %v8775_v60  ;;  %9511 = vst [vmem:[#allocation48_spill] sm:$0xff] %v8793_v61 }
 0xe0f   : > { %9510 = vst [vmem:[#allocation5_spill] sm:$0xff] %v8787_v19  ;;  %v8797_v2 = vmul.f32 %v9465_v32, %v8787_v19  ;;  %6466 = vmatprep.mubr.msk.bf16.mxu1 %vm1272_vm8, %v4394_v10  ;;  %v6649_v32 = vld [vmem:[%s9315_s5 + $0x158] sm:$0xff]  }
 0xe10   : > { %6494 = vmatprep.subr.bf16.mxu1 %v6649_v32 }
 0xe11   : > { %9512 = vst [vmem:[#allocation45_spill] sm:$0xff] %v8797_v2  ;;  %v4395_v34 = vpack.c.bf16 %v8797_v2, %v8793_v61  ;;  %6495 = vmatpush3.bf16.msra.mxu1 %v6649_v32 }
 0xe12   : > { %6496 = vmatprep.subr.bf16.mxu1 %v6650_v5 }
 0xe13   : > { %6467 = vmatmul.mubr.msk.bf16.gmra.mxu1 %vm1272_vm8, %v4395_v34 }
 0xe15   : > { %6497 = vmatpush3.bf16.msra.mxu1 %v6650_v5 }
 0xe16   : > { %6498 = vmatprep.subr.bf16.mxu1 %v6651_v27 }
 0xe19   : > { %6499 = vmatpush3.bf16.msra.mxu1 %v6651_v27 }
 0xeba   : > { %v6456_v62 = vpop.f32.mrf.mxu1 }
 0xebb   : > { %v4466_v57 = vadd.f32 %v6456_v62, %v9513_v16 }
 0xebc   : > { %v4457_v58 = vpop.f32.mrf.mxu1 }
 0xebd   : > { %v4458_v30 = vadd.f32 %v4457_v58, %v9514_v35  ;;  %v4527_v40 = vadd.f32 %v8823_v45, %v4466_v57  ;;  %v9517_v35 = vld [vmem:[#allocation21_spill] sm:$0xff] }
 0xebe   : > { %v6457_v36 = vpop.f32.mrf.mxu1  ;;  %v9518_v57 = vld [vmem:[#allocation25_spill] sm:$0xff] }
 0xebf   : > { %v4469_v12 = vadd.f32 %v6457_v36, %v9515_v53  ;;  %v4525_v10 = vadd.f32 %v8823_v45, %v4458_v30  ;;  %v4559_v58 = vmul.f32 0.2, %v4527_v40  ;;  %vm4543_vm11 = vcmp.ge.f32.partialorder %v4527_v40, 0.0 }
 0xec0   : > { %v4460_v9 = vpop.f32.mrf.mxu1 }
 0xec1   : > { %v4528_v34 = vadd.f32 %v8823_v45, %v4469_v12  ;;  %v4461_v0 = vadd.f32 %v4460_v9, %v9516_v56  ;;  %v4557_v16 = vmul.f32 0.2, %v4525_v10  ;;  %vm4541_vm9 = vcmp.ge.f32.partialorder %v4525_v10, 0.0  ;;  %v9519_v12 = vld [vmem:[#allocation27_spill] sm:$0xff] }
 0xec2   : > { %v4575_v39 = vsel %vm4543_vm11, %v4527_v40, %v4559_v58 }
 0xec3   : > { %v6460_v32 = vpop.f32.mrf.mxu1  ;;  %v4560_v5 = vmul.f32 0.2, %v4528_v34  ;;  %v4526_v27 = vadd.f32 %v8823_v45, %v4461_v0  ;;  %vm4544_vm3 = vcmp.ge.f32.partialorder %v4528_v34, 0.0  ;;  %v4573_v15 = vsel %vm4541_vm9, %v4525_v10, %v4557_v16  ;;  %v9521_v10 = vld [vmem:[#allocation33_spill] sm:$0xff] }
 0xec4   : > { %v4482_v53 = vadd.f32 %v6460_v32, %v9518_v57 }
 0xec5   : > { %v4473_v62 = vpop.f32.mrf.mxu1  ;;  %vm4542_vm10 = vcmp.ge.f32.partialorder %v4526_v27, 0.0  ;;  %v4558_v36 = vmul.f32 0.2, %v4526_v27  ;;  %v4576_v9 = vsel %vm4544_vm3, %v4528_v34, %v4560_v5 }
 0xec6   : > { %v4474_v2 = vadd.f32 %v4473_v62, %v9517_v35  ;;  %v4531_v62 = vadd.f32 %v8823_v45, %v4482_v53  ;;  %v9520_v35 = vld [vmem:[#allocation23_spill] sm:$0xff]  ;;  %v4599_v32 = vpack.c.bf16 %v4576_v9, %v4575_v39 }
 0xec7   : > { %v6461_v30 = vpop.f32.mrf.mxu1  ;;  %v4574_v56 = vsel %vm4542_vm10, %v4526_v27, %v4558_v36  ;;  %v9523_v39 = vld [vmem:[#allocation35_spill] sm:$0xff] }
 0xec8   : > { %v4485_v19 = vadd.f32 %v6461_v30, %v9519_v12  ;;  %v4529_v0 = vadd.f32 %v8823_v45, %v4474_v2  ;;  %v4598_v61 = vpack.c.bf16 %v4574_v56, %v4573_v15  ;;  %v4563_v27 = vmul.f32 0.2, %v4531_v62  ;;  %v9524_v9 = vld [vmem:[#allocation31_spill] sm:$0xff] }
 0xec9   : > { %v4476_v43 = vpop.f32.mrf.mxu1  ;;  %vm4547_vm0 = vcmp.ge.f32.partialorder %v4531_v62, 0.0 }
 0xeca   : > { %v4532_v41 = vadd.f32 %v8823_v45, %v4485_v19  ;;  %v4477_v55 = vadd.f32 %v4476_v43, %v9520_v35  ;;  %6478 = vmatprep.mubr.msk.bf16.mxu0 %vm1512_vm12, %v4598_v61  ;;  %v4561_v5 = vmul.f32 0.2, %v4529_v0  ;;  %v9522_v19 = vld [vmem:[#allocation29_spill] sm:$0xff]  ;;  %vm4545_vm14 = vcmp.ge.f32.partialorder %v4529_v0, 0.0 }
 0xecb   : > { %v6464_v13 = vpop.f32.mrf.mxu1  ;;  %6479 = vmatmul.mubr.msk.bf16.vlgmr.msra.gmra.mxu0 %vm1512_vm12, %v4599_v32  ;;  %v4579_v12 = vsel %vm4547_vm0, %v4531_v62, %v4563_v27 }
 0xecc   : > { %v4564_v57 = vmul.f32 0.2, %v4532_v41  ;;  %v4530_v48 = vadd.f32 %v8823_v45, %v4477_v55  ;;  %vm4548_vm13 = vcmp.ge.f32.partialorder %v4532_v41, 0.0  ;;  %v4498_v2 = vadd.f32 %v6464_v13, %v9521_v10 }
 0xecd   : > { %v4489_v34 = vpop.f32.mrf.mxu1  ;;  %v4577_v36 = vsel %vm4545_vm14, %v4529_v0, %v4561_v5 }
 0xece   : > { %v4490_v40 = vadd.f32 %v4489_v34, %v9522_v19  ;;  %vm4546_vm15 = vcmp.ge.f32.partialorder %v4530_v48, 0.0  ;;  %v4562_v43 = vmul.f32 0.2, %v4530_v48  ;;  %v4580_v55 = vsel %vm4548_vm13, %v4532_v41, %v4564_v57  ;;  %v9525_v57 = vld [vmem:[#allocation37_spill] sm:$0xff] }
 0xecf   : > { %v6465_v15 = vpop.f32.mrf.mxu1  ;;  %v4535_v53 = vadd.f32 %v8823_v45, %v4498_v2  ;;  %v4601_v34 = vpack.c.bf16 %v4580_v55, %v4579_v12  ;;  %v9526_v2 = vld [vmem:[#allocation41_spill] sm:$0xff] }
 0xed0   : > { %v4501_v58 = vadd.f32 %v6465_v15, %v9523_v39  ;;  %v4578_v16 = vsel %vm4546_vm15, %v4530_v48, %v4562_v43  ;;  %v4533_v13 = vadd.f32 %v8823_v45, %v4490_v40  ;;  %v9527_v43 = vld [vmem:[#allocation43_spill] sm:$0xff] }
 0xed1   : > { %v4492_v61 = vpop.f32.mrf.mxu1  ;;  %v4600_v32 = vpack.c.bf16 %v4578_v16, %v4577_v36  ;;  %v4567_v48 = vmul.f32 0.2, %v4535_v53  ;;  %vm4551_vm6 = vcmp.ge.f32.partialorder %v4535_v53, 0.0 }
 0xed2   : > { %v4536_v30 = vadd.f32 %v8823_v45, %v4501_v58  ;;  %v4493_v56 = vadd.f32 %v4492_v61, %v9524_v9  ;;  %v4565_v0 = vmul.f32 0.2, %v4533_v13  ;;  %vm4549_vm2 = vcmp.ge.f32.partialorder %v4533_v13, 0.0 }
 0xed3   : > { %v6468_v35 = vpop.f32.mrf.mxu1  ;;  %6482 = vmatprep.mubr.msk.bf16.mxu0 %vm1512_vm12, %v4600_v32  ;;  %v4583_v12 = vsel %vm4551_vm6, %v4535_v53, %v4567_v48 }
 0xed4   : > { %v4568_v10 = vmul.f32 0.2, %v4536_v30  ;;  %v4534_v19 = vadd.f32 %v8823_v45, %v4493_v56  ;;  %vm4552_vm1 = vcmp.ge.f32.partialorder %v4536_v30, 0.0  ;;  %6483 = vmatmul.mubr.msk.bf16.gmra.mxu0 %vm1512_vm12, %v4601_v34  ;;  %v4514_v40 = vadd.f32 %v6468_v35, %v9526_v2  ;;  %v9528_v56 = vld [vmem:[#allocation39_spill] sm:$0xff] }
 0xed5   : > { %v4505_v41 = vpop.f32.mrf.mxu1  ;;  %v4581_v61 = vsel %vm4549_vm2, %v4533_v13, %v4565_v0 }
 0xed6   : > { %v4506_v5 = vadd.f32 %v4505_v41, %v9525_v57  ;;  %vm4550_vm4 = vcmp.ge.f32.partialorder %v4534_v19, 0.0  ;;  %v4566_v62 = vmul.f32 0.2, %v4534_v19  ;;  %v4584_v39 = vsel %vm4552_vm1, %v4536_v30, %v4568_v10 }
 0xed7   : > { %v6469_v27 = vpop.f32.mrf.mxu1  ;;  %v4539_v9 = vadd.f32 %v8823_v45, %v4514_v40  ;;  %v4603_v41 = vpack.c.bf16 %v4584_v39, %v4583_v12  ;;  %v6654_v40 = vld [vmem:[%s9315_s5 + $0x170] sm:$0xff]  }
 0xed8   : > { %v4517_v15 = vadd.f32 %v6469_v27, %v9527_v43  ;;  %v4582_v58 = vsel %vm4550_vm4, %v4534_v19, %v4566_v62  ;;  %v4537_v55 = vadd.f32 %v8823_v45, %v4506_v5  ;;  %v6653_v62 = vld [vmem:[%s9315_s5 + $0x178] sm:$0xff]   ;;  %v6655_v27 = vld [vmem:[%s9315_s5 + $0x168] sm:$0xff]  }
 0xed9   : > { %v4508_v16 = vpop.f32.mrf.mxu1  ;;  %v4602_v34 = vpack.c.bf16 %v4582_v58, %v4581_v61  ;;  %v4571_v13 = vmul.f32 0.2, %v4539_v9  ;;  %vm4555_vm9 = vcmp.ge.f32.partialorder %v4539_v9, 0.0  ;;  %6518 = vmatprep.subr.bf16.mxu0 %v6653_v62 }
 0xeda   : > { %v4540_v36 = vadd.f32 %v8823_v45, %v4517_v15  ;;  %v4509_v32 = vadd.f32 %v4508_v16, %v9528_v56  ;;  %v4569_v35 = vmul.f32 0.2, %v4537_v55  ;;  %vm4553_vm7 = vcmp.ge.f32.partialorder %v4537_v55, 0.0  ;;  %6519 = vmatpush3.bf16.msra.mxu0 %v6653_v62  ;;  %v8878_v15 = vld [vmem:[%s9316_s6 + $0xa] ss:$0 sm:$0xff] }
 0xedb   : > { %6486 = vmatprep.mubr.msk.bf16.mxu0 %vm1512_vm12, %v4602_v34  ;;  %v4587_v0 = vsel %vm4555_vm9, %v4539_v9, %v4571_v13  ;;  %6520 = vmatprep.subr.bf16.mxu0 %v6654_v40 }
 0xedc   : > { %v4572_v57 = vmul.f32 0.2, %v4540_v36  ;;  %v4538_v2 = vadd.f32 %v8823_v45, %v4509_v32  ;;  %vm4556_vm5 = vcmp.ge.f32.partialorder %v4540_v36, 0.0  ;;  %6487 = vmatmul.mubr.msk.bf16.gmra.mxu0 %vm1512_vm12, %v4603_v41  ;;  %v4585_v53 = vsel %vm4553_vm7, %v4537_v55, %v4569_v35  ;;  %v6652_v45 = vld [vmem:[%s9315_s5 + $0x140] sm:$0xff]  }
 0xedd   : > { %6500 = vmatprep.subr.bf16.mxu1 %v6652_v45 }
 0xede   : > { %vm4554_vm3 = vcmp.ge.f32.partialorder %v4538_v2, 0.0  ;;  %v4570_v30 = vmul.f32 0.2, %v4538_v2  ;;  %v4588_v10 = vsel %vm4556_vm5, %v4540_v36, %v4572_v57  ;;  %6501 = vmatpush3.bf16.msra.mxu1 %v6652_v45  ;;  %6521 = vmatpush3.bf16.msra.mxu0 %v6654_v40 }
 0xedf   : > { %v4605_v5 = vpack.c.bf16 %v4588_v10, %v4587_v0  ;;  %6522 = vmatprep.subr.bf16.mxu0 %v6655_v27 }
 0xee0   : > { %v4586_v19 = vsel %vm4554_vm3, %v4538_v2, %v4570_v30 }
 0xee1   : > { %v4604_v48 = vpack.c.bf16 %v4586_v19, %v4585_v53 }
 0xee2   : > { %6523 = vmatpush3.bf16.msra.mxu0 %v6655_v27 }
 0xee3   : > { %6490 = vmatprep.mubr.msk.bf16.mxu0 %vm1512_vm12, %v4604_v48 }
 0xee4   : > { %6491 = vmatmul.mubr.msk.bf16.gmra.mxu0 %vm1512_vm12, %v4605_v5 }
 0xf8b   : > { %v6480_v43 = vpop.f32.mrf.mxu0 }
 0xf8c   : > { %v4702_v55 = vadd.f32 %v6480_v43, %v8878_v15 }
 0xf8d   : > { %v4693_v39 = vpop.f32.mrf.mxu0 }
 0xf8e   : > { %v4694_v58 = vadd.f32 %v8878_v15, %v4693_v39  ;;  %v4774_v32 = vmul.f32 0.2, %v4702_v55  ;;  %vm4758_vm13 = vcmp.ge.f32.partialorder %v4702_v55, 0.0 }
 0xf8f   : > { %v6481_v16 = vpop.f32.mrf.mxu0 }
 0xf90   : > { %v4705_v61 = vadd.f32 %v6481_v16, %v8878_v15  ;;  %v4772_v12 = vmul.f32 0.2, %v4694_v58  ;;  %vm4756_vm11 = vcmp.ge.f32.partialorder %v4694_v58, 0.0  ;;  %v4790_v53 = vsel %vm4758_vm13, %v4702_v55, %v4774_v32 }
 0xf91   : > { %v4696_v36 = vpop.f32.mrf.mxu0 }
 0xf92   : > { %vm4759_vm10 = vcmp.ge.f32.partialorder %v4705_v61, 0.0  ;;  %v4775_v9 = vmul.f32 0.2, %v4705_v61  ;;  %v4697_v56 = vadd.f32 %v8878_v15, %v4696_v36  ;;  %v4788_v2 = vsel %vm4756_vm11, %v4694_v58, %v4772_v12 }
 0xf94   : > { %v6484_v34 = vpop.f32.mrf.mxu0  ;;  %vm4757_vm14 = vcmp.ge.f32.partialorder %v4697_v56, 0.0  ;;  %v4773_v41 = vmul.f32 0.2, %v4697_v56  ;;  %v4791_v35 = vsel %vm4759_vm10, %v4705_v61, %v4775_v9 }
 0xf95   : > { %v4718_v19 = vadd.f32 %v6484_v34, %v8878_v15  ;;  %v4813_v0 = vpack.c.bf16 %v4791_v35, %v4790_v53 }
 0xf96   : > { %v4709_v57 = vpop.f32.mrf.mxu0  ;;  %v4789_v13 = vsel %vm4757_vm14, %v4697_v56, %v4773_v41 }
 0xf97   : > { %v4710_v30 = vadd.f32 %v8878_v15, %v4709_v57  ;;  %v4812_v10 = vpack.c.bf16 %v4789_v13, %v4788_v2  ;;  %v4778_v43 = vmul.f32 0.2, %v4718_v19  ;;  %vm4762_vm1 = vcmp.ge.f32.partialorder %v4718_v19, 0.0 }
 0xf98   : > { %v6485_v48 = vpop.f32.mrf.mxu0 }
 0xf99   : > { %v4721_v5 = vadd.f32 %v6485_v48, %v8878_v15  ;;  %6502 = vmatprep.mubr.msk.bf16.mxu1 %vm1512_vm12, %v4812_v10  ;;  %v4776_v62 = vmul.f32 0.2, %v4710_v30  ;;  %vm4760_vm0 = vcmp.ge.f32.partialorder %v4710_v30, 0.0  ;;  %v4794_v9 = vsel %vm4762_vm1, %v4718_v19, %v4778_v43 }
 0xf9a   : > { %v4712_v45 = vpop.f32.mrf.mxu0  ;;  %6503 = vmatmul.mubr.msk.bf16.vlgmr.msra.gmra.mxu1 %vm1512_vm12, %v4813_v0 }
 0xf9b   : > { %vm4763_vm15 = vcmp.ge.f32.partialorder %v4721_v5, 0.0  ;;  %v4779_v40 = vmul.f32 0.2, %v4721_v5  ;;  %v4713_v27 = vadd.f32 %v8878_v15, %v4712_v45  ;;  %v4792_v61 = vsel %vm4760_vm0, %v4710_v30, %v4776_v62 }
 0xf9c   : > { %v6488_v39 = vpop.f32.mrf.mxu0 }
 0xf9d   : > { %vm4761_vm2 = vcmp.ge.f32.partialorder %v4713_v27, 0.0  ;;  %v4777_v58 = vmul.f32 0.2, %v4713_v27  ;;  %v4795_v55 = vsel %vm4763_vm15, %v4721_v5, %v4779_v40  ;;  %v4734_v32 = vadd.f32 %v6488_v39, %v8878_v15 }
 0xf9e   : > { %v4725_v16 = vpop.f32.mrf.mxu0  ;;  %v4815_v41 = vpack.c.bf16 %v4795_v55, %v4794_v9 }
 0xf9f   : > { %v4793_v36 = vsel %vm4761_vm2, %v4713_v27, %v4777_v58  ;;  %v4726_v12 = vadd.f32 %v8878_v15, %v4725_v16  ;;  %v4782_v30 = vmul.f32 0.2, %v4734_v32  ;;  %vm4766_vm7 = vcmp.ge.f32.partialorder %v4734_v32, 0.0 }
 0xfa0   : > { %v4814_v56 = vpack.c.bf16 %v4793_v36, %v4792_v61  ;;  %v6489_v34 = vpop.f32.mrf.mxu0 }
 0xfa1   : > { %v4737_v35 = vadd.f32 %v6489_v34, %v8878_v15  ;;  %v4780_v2 = vmul.f32 0.2, %v4726_v12  ;;  %vm4764_vm6 = vcmp.ge.f32.partialorder %v4726_v12, 0.0  ;;  %v4798_v40 = vsel %vm4766_vm7, %v4734_v32, %v4782_v30 }
 0xfa2   : > { %v4728_v57 = vpop.f32.mrf.mxu0  ;;  %6506 = vmatprep.mubr.msk.bf16.mxu1 %vm1512_vm12, %v4814_v56 }
 0xfa3   : > { %vm4767_vm4 = vcmp.ge.f32.partialorder %v4737_v35, 0.0  ;;  %v4783_v13 = vmul.f32 0.2, %v4737_v35  ;;  %v4729_v53 = vadd.f32 %v8878_v15, %v4728_v57  ;;  %6507 = vmatmul.mubr.msk.bf16.gmra.mxu1 %vm1512_vm12, %v4815_v41  ;;  %v4796_v5 = vsel %vm4764_vm6, %v4726_v12, %v4780_v2 }
 0xfa4   : > { %v6492_v10 = vpop.f32.mrf.mxu0 }
 0xfa5   : > { %vm4765_vm5 = vcmp.ge.f32.partialorder %v4729_v53, 0.0  ;;  %v4781_v19 = vmul.f32 0.2, %v4729_v53  ;;  %v4799_v48 = vsel %vm4767_vm4, %v4737_v35, %v4783_v13  ;;  %v4750_v43 = vadd.f32 %v6492_v10, %v8878_v15 }
 0xfa6   : > { %v4741_v0 = vpop.f32.mrf.mxu0  ;;  %v4817_v58 = vpack.c.bf16 %v4799_v48, %v4798_v40 }
 0xfa7   : > { %v4797_v45 = vsel %vm4765_vm5, %v4729_v53, %v4781_v19  ;;  %v4742_v62 = vadd.f32 %v8878_v15, %v4741_v0  ;;  %v4786_v12 = vmul.f32 0.2, %v4750_v43  ;;  %vm4770_vm10 = vcmp.ge.f32.partialorder %v4750_v43, 0.0  ;;  %v8910_v53 = vld [vmem:[%s9316_s6 + $0xe] ss:$0 sm:$0xff] }
 0xfa8   : > { %v4816_v27 = vpack.c.bf16 %v4797_v45, %v4796_v5  ;;  %v6493_v39 = vpop.f32.mrf.mxu0 }
 0xfa9   : > { %v4753_v55 = vadd.f32 %v6493_v39, %v8878_v15  ;;  %v4784_v61 = vmul.f32 0.2, %v4742_v62  ;;  %vm4768_vm9 = vcmp.ge.f32.partialorder %v4742_v62, 0.0  ;;  %v4802_v35 = vsel %vm4770_vm10, %v4750_v43, %v4786_v12 }
 0xfaa   : > { %v4744_v16 = vpop.f32.mrf.mxu0  ;;  %6510 = vmatprep.mubr.msk.bf16.mxu1 %vm1512_vm12, %v4816_v27 }
 0xfab   : > { %vm4771_vm3 = vcmp.ge.f32.partialorder %v4753_v55, 0.0  ;;  %v4787_v36 = vmul.f32 0.2, %v4753_v55  ;;  %v4745_v9 = vadd.f32 %v8878_v15, %v4744_v16  ;;  %6511 = vmatmul.mubr.msk.bf16.gmra.mxu1 %vm1512_vm12, %v4817_v58  ;;  %v4800_v34 = vsel %vm4768_vm9, %v4742_v62, %v4784_v61  ;;  %v6656_v15 = vld [vmem:[%s9315_s5 + $0x160] sm:$0xff]  }
 0xfac   : > { %6524 = vmatprep.subr.bf16.mxu0 %v6656_v15 }
 0xfad   : > { %vm4769_vm11 = vcmp.ge.f32.partialorder %v4745_v9, 0.0  ;;  %v4785_v56 = vmul.f32 0.2, %v4745_v9  ;;  %v4803_v32 = vsel %vm4771_vm3, %v4753_v55, %v4787_v36  ;;  %6525 = vmatpush3.bf16.msra.mxu0 %v6656_v15 }
 0xfae   : > { %v4819_v2 = vpack.c.bf16 %v4803_v32, %v4802_v35 }
 0xfaf   : > { %v4801_v41 = vsel %vm4769_vm11, %v4745_v9, %v4785_v56 }
 0xfb0   : > { %v4818_v57 = vpack.c.bf16 %v4801_v41, %v4800_v34 }
 0xfb2   : > { %6514 = vmatprep.mubr.msk.bf16.mxu1 %vm1512_vm12, %v4818_v57 }
 0xfb3   : > { %6515 = vmatmul.mubr.msk.bf16.gmra.mxu1 %vm1512_vm12, %v4819_v2 }
0x105a   : > { %v6504_v13 = vpop.f32.mrf.mxu1 }
0x105b   : > { %v4916_v19 = vadd.f32 %v6504_v13, %v8910_v53 }
0x105c   : > { %v4907_v30 = vpop.f32.mrf.mxu1 }
0x105d   : > { %v4908_v10 = vadd.f32 %v8910_v53, %v4907_v30  ;;  %v4988_v27 = vmul.f32 0.2, %v4916_v19  ;;  %vm4972_vm15 = vcmp.ge.f32.partialorder %v4916_v19, 0.0 }
0x105e   : > { %v6505_v48 = vpop.f32.mrf.mxu1 }
0x105f   : > { %v4919_v0 = vadd.f32 %v6505_v48, %v8910_v53  ;;  %v4986_v45 = vmul.f32 0.2, %v4908_v10  ;;  %vm4970_vm14 = vcmp.ge.f32.partialorder %v4908_v10, 0.0  ;;  %v5004_v9 = vsel %vm4972_vm15, %v4916_v19, %v4988_v27 }
0x1060   : > { %v4910_v5 = vpop.f32.mrf.mxu1 }
0x1061   : > { %vm4973_vm13 = vcmp.ge.f32.partialorder %v4919_v0, 0.0  ;;  %v4989_v62 = vmul.f32 0.2, %v4919_v0  ;;  %v4911_v40 = vadd.f32 %v8910_v53, %v4910_v5  ;;  %v5002_v16 = vsel %vm4970_vm14, %v4908_v10, %v4986_v45 }
0x1063   : > { %v6508_v43 = vpop.f32.mrf.mxu1  ;;  %vm4971_vm0 = vcmp.ge.f32.partialorder %v4911_v40, 0.0  ;;  %v4987_v39 = vmul.f32 0.2, %v4911_v40  ;;  %v5005_v58 = vsel %vm4973_vm13, %v4919_v0, %v4989_v62 }
0x1064   : > { %v4932_v56 = vadd.f32 %v6508_v43, %v8910_v53  ;;  %v5027_v34 = vpack.c.bf16 %v5005_v58, %v5004_v9 }
0x1065   : > { %v4923_v55 = vpop.f32.mrf.mxu1  ;;  %v5003_v61 = vsel %vm4971_vm0, %v4911_v40, %v4987_v39 }
0x1066   : > { %v4924_v36 = vadd.f32 %v8910_v53, %v4923_v55  ;;  %v5026_v12 = vpack.c.bf16 %v5003_v61, %v5002_v16  ;;  %v4992_v13 = vmul.f32 0.2, %v4932_v56  ;;  %vm4976_vm4 = vcmp.ge.f32.partialorder %v4932_v56, 0.0 }
0x1067   : > { %v6509_v32 = vpop.f32.mrf.mxu1 }
0x1068   : > { %v4935_v41 = vadd.f32 %v6509_v32, %v8910_v53  ;;  %6526 = vmatprep.mubr.msk.bf16.mxu0 %vm1512_vm12, %v5026_v12  ;;  %v4990_v57 = vmul.f32 0.2, %v4924_v36  ;;  %vm4974_vm2 = vcmp.ge.f32.partialorder %v4924_v36, 0.0  ;;  %v5008_v62 = vsel %vm4976_vm4, %v4932_v56, %v4992_v13 }
0x1069   : > { %v4926_v35 = vpop.f32.mrf.mxu1  ;;  %6527 = vmatmul.mubr.msk.bf16.vlgmr.msra.gmra.mxu0 %vm1512_vm12, %v5027_v34 }
0x106a   : > { %vm4977_vm1 = vcmp.ge.f32.partialorder %v4935_v41, 0.0  ;;  %v4993_v2 = vmul.f32 0.2, %v4935_v41  ;;  %v4927_v15 = vadd.f32 %v8910_v53, %v4926_v35  ;;  %v5006_v0 = vsel %vm4974_vm2, %v4924_v36, %v4990_v57 }
0x106b   : > { %v6512_v30 = vpop.f32.mrf.mxu1 }
0x106c   : > { %vm4975_vm6 = vcmp.ge.f32.partialorder %v4927_v15, 0.0  ;;  %v4991_v10 = vmul.f32 0.2, %v4927_v15  ;;  %v5009_v19 = vsel %vm4977_vm1, %v4935_v41, %v4993_v2  ;;  %v4948_v27 = vadd.f32 %v6512_v30, %v8910_v53 }
0x106d   : > { %v4939_v48 = vpop.f32.mrf.mxu1  ;;  %v5029_v39 = vpack.c.bf16 %v5009_v19, %v5008_v62 }
0x106e   : > { %v5007_v5 = vsel %vm4975_vm6, %v4927_v15, %v4991_v10  ;;  %v4940_v45 = vadd.f32 %v8910_v53, %v4939_v48  ;;  %v4996_v36 = vmul.f32 0.2, %v4948_v27  ;;  %vm4980_vm3 = vcmp.ge.f32.partialorder %v4948_v27, 0.0 }
0x106f   : > { %v5028_v40 = vpack.c.bf16 %v5007_v5, %v5006_v0  ;;  %v6513_v43 = vpop.f32.mrf.mxu1 }
0x1070   : > { %v4951_v58 = vadd.f32 %v6513_v43, %v8910_v53  ;;  %v4994_v16 = vmul.f32 0.2, %v4940_v45  ;;  %vm4978_vm5 = vcmp.ge.f32.partialorder %v4940_v45, 0.0  ;;  %v5012_v2 = vsel %vm4980_vm3, %v4948_v27, %v4996_v36 }
0x1071   : > { %v4942_v55 = vpop.f32.mrf.mxu1  ;;  %6530 = vmatprep.mubr.msk.bf16.mxu0 %vm1512_vm12, %v5028_v40 }
0x1072   : > { %vm4981_vm7 = vcmp.ge.f32.partialorder %v4951_v58, 0.0  ;;  %v4997_v61 = vmul.f32 0.2, %v4951_v58  ;;  %v4943_v9 = vadd.f32 %v8910_v53, %v4942_v55  ;;  %6531 = vmatmul.mubr.msk.bf16.gmra.mxu0 %vm1512_vm12, %v5029_v39  ;;  %v5010_v41 = vsel %vm4978_vm5, %v4940_v45, %v4994_v16 }
0x1073   : > { %v6516_v12 = vpop.f32.mrf.mxu1 }
0x1074   : > { %vm4979_vm9 = vcmp.ge.f32.partialorder %v4943_v9, 0.0  ;;  %v4995_v56 = vmul.f32 0.2, %v4943_v9  ;;  %v5013_v32 = vsel %vm4981_vm7, %v4951_v58, %v4997_v61  ;;  %v4964_v13 = vadd.f32 %v6516_v12, %v8910_v53  ;;  %v9529_v12 = vld [vmem:[#allocation7_spill] sm:$0xff] }
0x1075   : > { %v4955_v34 = vpop.f32.mrf.mxu1  ;;  %v5031_v10 = vpack.c.bf16 %v5013_v32, %v5012_v2 }
0x1076   : > { %v5011_v35 = vsel %vm4979_vm9, %v4943_v9, %v4995_v56  ;;  %v4956_v57 = vadd.f32 %v8910_v53, %v4955_v34  ;;  %v5000_v45 = vmul.f32 0.2, %v4964_v13  ;;  %vm4984_vm13 = vcmp.ge.f32.partialorder %v4964_v13, 0.0 }
0x1077   : > { %v5030_v15 = vpack.c.bf16 %v5011_v35, %v5010_v41  ;;  %v6517_v30 = vpop.f32.mrf.mxu1 }
0x1078   : > { %v4967_v19 = vadd.f32 %v6517_v30, %v8910_v53  ;;  %v4998_v0 = vmul.f32 0.2, %v4956_v57  ;;  %vm4982_vm11 = vcmp.ge.f32.partialorder %v4956_v57, 0.0  ;;  %v5016_v58 = vsel %vm4984_vm13, %v4964_v13, %v5000_v45 }
0x1079   : > { %v4958_v48 = vpop.f32.mrf.mxu1  ;;  %6534 = vmatprep.mubr.msk.bf16.mxu0 %vm1512_vm12, %v5030_v15 }
0x107a   : > { %vm4985_vm10 = vcmp.ge.f32.partialorder %v4967_v19, 0.0  ;;  %v5001_v5 = vmul.f32 0.2, %v4967_v19  ;;  %v4959_v62 = vadd.f32 %v8910_v53, %v4958_v48  ;;  %6535 = vmatmul.mubr.msk.bf16.gmra.mxu0 %vm1512_vm12, %v5031_v10  ;;  %v5014_v43 = vsel %vm4982_vm11, %v4956_v57, %v4998_v0  ;;  %v8939_v53 = vld [vmem:[%s9316_s6 + $0x12] ss:$0 sm:$0xff] }
0x107c   : > { %vm4983_vm14 = vcmp.ge.f32.partialorder %v4959_v62, 0.0  ;;  %v4999_v40 = vmul.f32 0.2, %v4959_v62  ;;  %v5017_v27 = vsel %vm4985_vm10, %v4967_v19, %v5001_v5 }
0x107d   : > { %v5033_v16 = vpack.c.bf16 %v5017_v27, %v5016_v58 }
0x107e   : > { %v5015_v39 = vsel %vm4983_vm14, %v4959_v62, %v4999_v40 }
0x107f   : > { %v5032_v55 = vpack.c.bf16 %v5015_v39, %v5014_v43 }
0x1081   : > { %6538 = vmatprep.mubr.msk.bf16.mxu0 %vm1512_vm12, %v5032_v55 }
0x1082   : > { %6539 = vmatmul.mubr.msk.bf16.gmra.mxu0 %vm1512_vm12, %v5033_v16 }
0x1129   : > { %v6528_v61 = vpop.f32.mrf.mxu0 }
0x112a   : > { %v5130_v9 = vadd.f32 %v6528_v61, %v8939_v53 }
0x112b   : > { %v5121_v36 = vpop.f32.mrf.mxu0 }
0x112c   : > { %v5218_v56 = vmul.f32 %v5130_v9, %v9529_v12  ;;  %v8944_v32 = vadd.f32 %v8939_v53, %v5121_v36 }
0x112d   : > { %v6529_v34 = vpop.f32.mrf.mxu0 }
0x112e   : > { %v5133_v41 = vadd.f32 %v6529_v34, %v8939_v53  ;;  %5300 = vrot.lane.b32.xlu0 %v5218_v56, %s6994_s9  ;;  %v5216_v57 = vmul.f32 %v8944_v32, %v9529_v12 }
0x112f   : > { %v5124_v35 = vpop.f32.mrf.mxu0 }
0x1130   : > { %6849 = vtanh.f32 %v5133_v41  ;;  %v5125_v2 = vadd.f32 %v8939_v53, %v5124_v35  ;;  %v5219_v19 = vmul.f32 %v5133_v41, %v9529_v12  ;;  %v9530_v35 = vld [vmem:[#allocation6_spill] sm:$0xff] }
0x1132   : > { %v6532_v15 = vpop.f32.mrf.mxu0  ;;  %6851 = vtanh.f32 %v5125_v2  ;;  %v5217_v13 = vmul.f32 %v5125_v2, %v9529_v12  ;;  %5296 = vrot.lane.b32.xlu0 %v5216_v57, %s6994_s9 }
0x1133   : > { %v5146_v30 = vadd.f32 %v6532_v15, %v8939_v53 }
0x1134   : > { %v5137_v10 = vpop.f32.mrf.mxu0  ;;  %5298 = vrot.lane.b32.xlu1 %v5217_v13, %s6994_s9 }
0x1135   : > { %6853 = vtanh.f32 %v5146_v30  ;;  %v5138_v48 = vadd.f32 %v8939_v53, %v5137_v10  ;;  %v5222_v40 = vmul.f32 %v5146_v30, %v9529_v12 }
0x1136   : > { %v6533_v0 = vpop.f32.mrf.mxu0  ;;  %5302 = vrot.lane.b32.xlu0 %v5219_v19, %s6994_s9 }
0x1137   : > { %6855 = vtanh.f32 %v5138_v48  ;;  %v5220_v5 = vmul.f32 %v5138_v48, %v9529_v12  ;;  %v5149_v62 = vadd.f32 %v6533_v0, %v8939_v53 }
0x1138   : > { %v5140_v45 = vpop.f32.mrf.mxu0 }
0x1139   : > { %6857 = vtanh.f32 %v5149_v62  ;;  %v5141_v27 = vadd.f32 %v8939_v53, %v5140_v45  ;;  %5304 = vrot.lane.b32.xlu1 %v5220_v5, %s6994_s9  ;;  %v5223_v39 = vmul.f32 %v5149_v62, %v9529_v12 }
0x113a   : > { %v6536_v43 = vpop.f32.mrf.mxu0  ;;  %5308 = vrot.lane.b32.xlu0 %v5222_v40, %s6994_s9 }
0x113b   : > { %6859 = vtanh.f32 %v5141_v27  ;;  %v5162_v58 = vadd.f32 %v6536_v43, %v8939_v53  ;;  %v5221_v34 = vmul.f32 %v5141_v27, %v9529_v12 }
0x113c   : > { %v5153_v55 = vpop.f32.mrf.mxu0 }
0x113d   : > { %6861 = vtanh.f32 %v5162_v58  ;;  %v5226_v16 = vmul.f32 %v5162_v58, %v9529_v12  ;;  %v8968_v61 = vadd.f32 %v8939_v53, %v5153_v55  ;;  %5310 = vrot.lane.b32.xlu1 %v5223_v39, %s6994_s9  ;;  %v6850_v36 = vpop.eup %6849 }
0x113e   : > { %v6537_v56 = vpop.f32.mrf.mxu0  ;;  %v8978_v57 = vmul.f32 %v6850_v36, %v9530_v35 }
0x113f   : > { %6863 = vtanh.f32 %v8968_v61  ;;  %v8974_v41 = vadd.f32 %v6537_v56, %v8939_v53  ;;  %5316 = vrot.lane.b32.xlu0 %v5226_v16, %s6994_s9  ;;  %v6852_v2 = vpop.eup %6851 }
0x1140   : > { %v5156_v15 = vpop.f32.mrf.mxu0  ;;  %v8986_v30 = vmul.f32 %v6852_v2, %v9530_v35  ;;  %v8990_v48 = vadd.f32 %v8978_v57, %v8527_v20 }
0x1141   : > { %6865 = vtanh.f32 %v8974_v41  ;;  %v8982_v13 = vadd.f32 %v8939_v53, %v5156_v15  ;;  %5306 = vrot.lane.b32.xlu1 %v5221_v34, %s6994_s9 }
0x1142   : > { %v6854_v10 = vpop.eup %6853  ;;  %v6540_v19 = vpop.f32.mrf.mxu0  ;;  %v5393_v45 = vadd.f32 %v8986_v30, %v8535_v29 }
0x1143   : > { %6867 = vtanh.f32 %v8982_v13  ;;  %v8994_v0 = vadd.f32 %v6540_v19, %v8939_v53  ;;  %v8999_v40 = vmul.f32 %v6854_v10, %v9530_v35 }
0x1144   : > { %v6856_v5 = vpop.eup %6855  ;;  %6869 = vtanh.f32 %v5130_v9  ;;  %v5169_v62 = vpop.f32.mrf.mxu0 }
0x1145   : > { %v5204_v27 = vmul.f32 %v6856_v5, %v9530_v35  ;;  %6871 = vtanh.f32 %v8994_v0  ;;  %v9004_v20 = vadd.f32 %v8939_v53, %v5169_v62  ;;  %v5398_v58 = vadd.f32 %v8999_v40, %v8547_v21 }
0x1146   : > { %v6858_v43 = vpop.eup %6857  ;;  %v6541_v39 = vpop.f32.mrf.mxu0 }
0x1147   : > { %v5207_v9 = vmul.f32 %v6858_v43, %v9530_v35  ;;  %6873 = vtanh.f32 %v9004_v20  ;;  %v9011_v29 = vadd.f32 %v6541_v39, %v8939_v53  ;;  %v9014_v36 = vadd.f32 %v5204_v27, %v8557_v7 }
0x1148   : > { %v6860_v55 = vpop.eup %6859  ;;  %v5172_v16 = vpop.f32.mrf.mxu0 }
0x1149   : > { %v5205_v56 = vmul.f32 %v6860_v55, %v9530_v35  ;;  %6875 = vtanh.f32 %v9011_v29  ;;  %v9019_v34 = vadd.f32 %v8939_v53, %v5172_v16  ;;  %v9022_v2 = vadd.f32 %v5207_v9, %v8566_v4 }
0x114a   : > { %v6862_v21 = vpop.eup %6861 }
0x114b   : > { %v5210_v15 = vmul.f32 %v6862_v21, %v9530_v35  ;;  %6877 = vtanh.f32 %v9019_v34  ;;  %v9028_v7 = vadd.f32 %v5205_v56, %v8575_v26 }
0x114c   : > { %v6864_v10 = vpop.eup %6863  ;;  %6879 = vtanh.f32 %v8944_v32 }
0x114d   : > { %v9031_v19 = vadd.f32 %v5210_v15, %v8580_v47  ;;  %v9034_v53 = vmul.f32 %v6864_v10, %v9530_v35  ;;  %v9532_v10 = vld [vmem:[#allocation20_spill] sm:$0xff] }
0x114e   : > { %v6866_v5 = vpop.eup %6865 }
0x114f   : > { %v9037_v4 = vmul.f32 %v6866_v5, %v9530_v35  ;;  %v9041_v43 = vadd.f32 %v9034_v53, %v8592_v18 }
0x1150   : > { %v6868_v62 = vpop.eup %6867 }
0x1151   : > { %v6870_v39 = vpop.eup %6869  ;;  %v9045_v26 = vadd.f32 %v9037_v4, %v8598_v52  ;;  %v9048_v47 = vmul.f32 %v6868_v62, %v9530_v35 }
0x1152   : > { %v6872_v32 = vpop.eup %6871  ;;  %v9058_v18 = vmul.f32 %v6870_v39, %v9530_v35 }
0x1153   : > { %9531 = vst [vmem:[#allocation46_spill] sm:$0xff] %v9048_v47  ;;  %v9051_v55 = vmul.f32 %v6872_v32, %v9530_v35  ;;  %v9055_v21 = vadd.f32 %v9048_v47, %v8605_v33  ;;  %v9533_v47 = vld [vmem:[#allocation18_spill] sm:$0xff] }
0x1154   : > { %v6874_v16 = vpop.eup %6873  ;;  %v5394_v39 = vadd.f32 %v9058_v18, %v9533_v47 }
0x1155   : > { %v9062_v5 = vadd.f32 %v9051_v55, %v9532_v10  ;;  %v9065_v52 = vmul.f32 %v6874_v16, %v9530_v35 }
0x1156   : > { %v6876_v62 = vpop.eup %6875 }
0x1157   : > { %v9069_v32 = vadd.f32 %v9065_v52, %v8615_v42  ;;  %v9072_v23 = vmul.f32 %v6876_v62, %v9530_v35  ;;  %v5414_v62 = vsel %vm1272_vm8, %v5394_v39, 0.0  ;;  %v5240_v39 = vmul.f32 1.442695, %v5204_v27 }
0x1158   : > { %v6878_v60 = vpop.eup %6877 }
0x1159   : > { %v6880_v33 = vpop.eup %6879  ;;  %v9077_v1 = vmul.f32 %v6878_v60, %v9530_v35  ;;  %v9081_v16 = vadd.f32 %v9072_v23, %v8621_v63  ;;  %v5224_v60 = vmul.f32 %v8968_v61, %v9529_v12  ;;  %v5227_v63 = vmul.f32 %v8974_v41, %v9529_v12 }
0x115a   : > { %v5200_v42 = vmul.f32 %v6880_v33, %v9530_v35  ;;  %v5238_v33 = vmul.f32 1.442695, %v8978_v57  ;;  %v5246_v61 = vmul.f32 1.442695, %v5207_v9  ;;  %v5252_v41 = vmul.f32 1.442695, %v5210_v15 }
0x115b   : > { %v9085_v10 = vadd.f32 %v9077_v1, %v8625_v37  ;;  %v5411_v37 = vsel %vm1272_vm8, %v5393_v45, 0.0 }
0x115c   : > { %v5392_v14 = vadd.f32 %v5200_v42, %v9534_v17  ;;  %v5426_v17 = vsel %vm1272_vm8, %v5398_v58, 0.0  ;;  %6881 = vpow2.f32 %v5238_v33  ;;  %v5225_v58 = vmul.f32 %v8982_v13, %v9529_v12 }
0x115d   : > { %6883 = vpow2.f32 %v5240_v39 }
0x115e   : > { %5415 = vadd.xlane.f32.xlu0 %v5414_v62  ;;  %v5408_v47 = vsel %vm1272_vm8, %v5392_v14, 0.0  ;;  %v5417_v14 = vsel %vm1272_vm8, %v8990_v48, 0.0  ;;  %6885 = vpow2.f32 %v5246_v61  ;;  %v5242_v62 = vmul.f32 1.442695, %v5205_v56 }
0x115f   : > { %6887 = vpow2.f32 %v5252_v41  ;;  %v5228_v56 = vmul.f32 %v9004_v20, %v9529_v12 }
0x1160   : > { %6889 = vpow2.f32 %v5242_v62 }
0x1165   : > { %5409 = vadd.xlane.f32.xlu1 %v5408_v47 }
0x1169   : > { %v6882_v45 = vpop.eup %6881 }
0x116a   : > { %v6884_v57 = vpop.eup %6883  ;;  %v5267_v27 = vmul.f32 %v6882_v45, %v8665_v44 }
0x116b   : > { %v5268_v9 = vmul.f32 %v6884_v57, %v8679_v54  ;;  %v6886_v15 = vpop.eup %6885 }
0x116c   : > { %v6888_v39 = vpop.eup %6887  ;;  %v5271_v13 = vmul.f32 %v6886_v15, %v8707_v51  ;;  %v5429_v51 = vsel %vm1272_vm8, %v9022_v2, 0.0  ;;  %v5444_v2 = vsel %vm1272_vm8, %v9069_v32, 0.0  ;;  %v5229_v15 = vmul.f32 %v9019_v34, %v9529_v12 }
0x116d   : > { %v5274_v54 = vmul.f32 %v6888_v39, %v8733_v8  ;;  %v5438_v8 = vsel %vm1272_vm8, %v9031_v19, 0.0  ;;  %v5254_v19 = vmul.f32 1.442695, %v9037_v4 }
0x1174   : > { %5312 = vrot.lane.b32.xlu0 %v5224_v60, %s6994_s9 }
0x1176   : > { %5318 = vrot.lane.b32.xlu1 %v5227_v63, %s6994_s9 }
0x1193   : > { %5412 = vadd.xlane.f32.xlu0 %v5411_v37 }
0x1197   : > { %5427 = vadd.xlane.f32.xlu0 %v5426_v17 }
0x119a   : > { %5418 = vadd.xlane.f32.xlu1 %v5417_v14  ;;  %v6890_v14 = vpop.eup %6889 }
0x119b   : > { %v5269_v45 = vmul.f32 %v6890_v14, %v8688_v6  ;;  %v5432_v6 = vsel %vm1272_vm8, %v9041_v43, 0.0 }
0x11a0   : > { %v5301_v47 = vpop.permute.xlu0 %5300 }
0x11a4   : > { %v5297_v60 = vpop.permute.xlu0 %5296 }
0x11a6   : > { %v9102_v63 = vpop.permute.xlu1 %5298 }
0x11a8   : > { %v5303_v48 = vpop.permute.xlu0 %5302 }
0x11a9   : > { %v9107_v37 = vadd.f32 %v5303_v48, %v5267_v27  ;;  %v5420_v48 = vsel %vm1272_vm8, %v9014_v36, 0.0  ;;  %v5450_v36 = vsel %vm1272_vm8, %v9062_v5, 0.0 }
0x11ab   : > { %v5305_v33 = vpop.permute.xlu1 %5304  ;;  %5314 = vrot.lane.b32.xlu1 %v5225_v58, %s6994_s9  ;;  %v5236_v58 = vmul.f32 1.442695, %v9058_v18 }
0x11ac   : > { %v9113_v17 = vadd.f32 %v5305_v33, %v5268_v9  ;;  %v9116_v44 = vpop.permute.xlu0 %5308  ;;  %v5232_v9 = vmul.f32 1.442695, %v5200_v42 }
0x11ad   : > { %5320 = vrot.lane.b32.xlu0 %v5228_v56, %s6994_s9  ;;  %6891 = vpow2.f32 %v5236_v58 }
0x11ae   : > { %6893 = vpow2.f32 %v5232_v9 }
0x11af   : > { %v5311_v61 = vpop.permute.xlu1 %5310  ;;  %6895 = vpow2.f32 %v5254_v19 }
0x11b0   : > { %v9119_v41 = vadd.f32 %v5311_v61, %v5271_v13 }
0x11b1   : > { %v5317_v62 = vpop.permute.xlu0 %5316 }
0x11b2   : > { %v9122_v20 = vadd.f32 %v5317_v62, %v5274_v54  ;;  %v5234_v62 = vmul.f32 1.442695, %v8986_v30  ;;  %v5453_v30 = vsel %vm1272_vm8, %v9081_v16, 0.0 }
0x11b3   : > { %v5307_v57 = vpop.permute.xlu1 %5306 }
0x11b4   : > { %v9125_v27 = vadd.f32 %v5307_v57, %v5269_v45  ;;  %6897 = vpow2.f32 %v5234_v62  ;;  %v5423_v45 = vsel %vm1272_vm8, %v9028_v7, 0.0 }
0x11ba   : > { %v6892_v18 = vpop.eup %6891 }
0x11bb   : > { %v5266_v42 = vmul.f32 %v6892_v18, %v8650_v31  ;;  %v6894_v43 = vpop.eup %6893 }
0x11bc   : > { %v5264_v33 = vmul.f32 %v6894_v43, %v8643_v38  ;;  %v6896_v13 = vpop.eup %6895 }
0x11bd   : > { %v5346_v56 = vadd.f32 %v5301_v47, %v5266_v42 }
0x11be   : > { %v5344_v32 = vadd.f32 %v5297_v60, %v5264_v33  ;;  %v5230_v60 = vmul.f32 %v8994_v0, %v9529_v12  ;;  %v5441_v0 = vsel %vm1272_vm8, %v9045_v26, 0.0 }
0x11bf   : > { %v5362_v5 = vmul.f32 %v5346_v56, %v9530_v35 }
0x11c0   : > { %v5360_v34 = vmul.f32 %v5344_v32, %v9530_v35  ;;  %v9535_v32 = vld [vmem:[#allocation26_spill] sm:$0xff] }
0x11c1   : > { %v5378_v31 = vadd.f32 %v5362_v5, %v8669_v24  ;;  %v5275_v24 = vmul.f32 %v6896_v13, %v8749_v50  ;;  %v5435_v50 = vsel %vm1272_vm8, %v9055_v21, 0.0  ;;  %v6898_v57 = vpop.eup %6897  ;;  %v9538_v13 = vld [vmem:[#allocation32_spill] sm:$0xff] }
0x11c2   : > { %v5376_v47 = vadd.f32 %v5360_v34, %v8662_v49  ;;  %v5244_v49 = vmul.f32 1.442695, %v8999_v40  ;;  %v5265_v40 = vmul.f32 %v6898_v57, %v8646_v59 }
0x11c4   : > { %6899 = vpow2.f32 %v5244_v49  ;;  %v5345_v7 = vadd.f32 %v9102_v63, %v5265_v40  ;;  %v9539_v49 = vld [vmem:[#allocation42_spill] sm:$0xff] }
0x11c6   : > { %v5361_v21 = vmul.f32 %v5345_v7, %v9530_v35 }
0x11c8   : > { %v5377_v9 = vadd.f32 %v5361_v21, %v8656_v28  ;;  %v5231_v28 = vmul.f32 %v9011_v29, %v9529_v12  ;;  %v5367_v29 = vmul.f32 %v9119_v41, %v9530_v35  ;;  %v9536_v41 = vld [vmem:[#allocation34_spill] sm:$0xff] }
0x11cc   : > { %5421 = vadd.xlane.f32.xlu0 %v5420_v48  ;;  %v5447_v48 = vsel %vm1272_vm8, %v9085_v10, 0.0  ;;  %v5363_v10 = vmul.f32 %v9107_v37, %v9530_v35  ;;  %v5248_v37 = vmul.f32 1.442695, %v9034_v53  ;;  %v5370_v53 = vmul.f32 %v9122_v20, %v9530_v35 }
0x11ce   : > { %6901 = vpow2.f32 %v5248_v37 }
0x11cf   : > { %5430 = vadd.xlane.f32.xlu1 %v5429_v51 }
0x11d0   : > { %5439 = vadd.xlane.f32.xlu0 %v5438_v8 }
0x11d1   : > { %v6900_v58 = vpop.eup %6899 }
0x11d2   : > { %v5270_v26 = vmul.f32 %v6900_v58, %v8691_v25 }
0x11d4   : > { %5433 = vadd.xlane.f32.xlu0 %v5432_v6  ;;  %v5350_v51 = vadd.f32 %v9116_v44, %v5270_v26  ;;  %v5379_v44 = vadd.f32 %v5363_v10, %v8676_v46  ;;  %v5364_v46 = vmul.f32 %v9113_v17, %v9530_v35  ;;  %v9541_v26 = vld [vmem:[#allocation48_spill] sm:$0xff] }
0x11d6   : > { %v5366_v59 = vmul.f32 %v5350_v51, %v9530_v35 }
0x11d8   : > { %5451 = vadd.xlane.f32.xlu0 %v5450_v36  ;;  %v5382_v6 = vadd.f32 %v5366_v59, %v8713_v22  ;;  %v5256_v22 = vmul.f32 1.442695, %v9065_v52  ;;  %v5260_v52 = vmul.f32 1.442695, %v9051_v55  ;;  %v5258_v59 = vmul.f32 1.442695, %v9077_v1 }
0x11da   : > { %6903 = vpow2.f32 %v5256_v22 }
0x11db   : > { %v6902_v42 = vpop.eup %6901  ;;  %6905 = vpow2.f32 %v5260_v52 }
0x11dc   : > { %5445 = vadd.xlane.f32.xlu0 %v5444_v2  ;;  %v5272_v12 = vmul.f32 %v6902_v42, %v8721_v3  ;;  %v5383_v3 = vadd.f32 %v5367_v29, %v9535_v32  ;;  %v9545_v42 = vld [vmem:[#allocation30_spill] sm:$0xff] }
0x11e0   : > { %5322 = vrot.lane.b32.xlu1 %v5229_v15, %s6994_s9  ;;  %v5380_v15 = vadd.f32 %v5364_v46, %v8696_v11 }
0x11e7   : > { %v5416_v39 = vpop.xlane.xlu0 %5415  ;;  %v6904_v33 = vpop.eup %6903 }
0x11e8   : > { %v5458_v4 = vsel %vm1272_vm8, %v5378_v31, %v5416_v39  ;;  %v5386_v31 = vadd.f32 %v5370_v53, %v9536_v41 }
0x11e9   : > { %5474 = vst [vmem:[%s9153_s20 + $0x10] sm:$0xff] %v5458_v4  ;;  %v9537_v4 = vld [vmem:[#allocation36_spill] sm:$0xff] }
0x11ea   : > { %v5276_v34 = vmul.f32 %v6904_v33, %v9537_v4  ;;  %v9550_v4 = vld [vmem:[#allocation45_spill] sm:$0xff] }
0x11eb   : > { %v5313_v16 = vpop.permute.xlu0 %5312 }
0x11ec   : > { %v5352_v56 = vadd.f32 %v5313_v16, %v5272_v12  ;;  %v9542_v16 = vld [vmem:[#allocation46_spill] sm:$0xff]  ;;  %v9546_v12 = vld [vmem:[#allocation40_spill] sm:$0xff] }
0x11ee   : > { %v5410_v14 = vpop.xlane.xlu1 %5409  ;;  %v5368_v11 = vmul.f32 %v5352_v56, %v9530_v35 }
0x11ef   : > { %v5456_v38 = vsel %vm1272_vm8, %v5376_v47, %v5410_v14 }
0x11f0   : > { %5472 = vst [vmem:[%s9153_s20] sm:$0xff] %v5456_v38  ;;  %v5384_v14 = vadd.f32 %v5368_v11, %v9538_v13 }
0x11f2   : > { %5324 = vrot.lane.b32.xlu0 %v5230_v60, %s6994_s9  ;;  %v5319_v61 = vpop.permute.xlu1 %5318 }
0x11f3   : > { %v9163_v54 = vadd.f32 %v5319_v61, %v5275_v24 }
0x1204   : > { %5424 = vadd.xlane.f32.xlu1 %v5423_v45 }
0x1208   : > { %5442 = vadd.xlane.f32.xlu1 %v5441_v0  ;;  %v6906_v0 = vpop.eup %6905 }
0x120c   : > { %5436 = vadd.xlane.f32.xlu1 %v5435_v50 }
0x1210   : > { %5454 = vadd.xlane.f32.xlu1 %v5453_v30  ;;  %v9540_v30 = vld [vmem:[#allocation44_spill] sm:$0xff] }
0x1211   : > { %v5278_v40 = vmul.f32 %v6906_v0, %v9540_v30 }
0x1214   : > { %5448 = vadd.xlane.f32.xlu1 %v5447_v48 }
0x121c   : > { %v5413_v8 = vpop.xlane.xlu0 %5412 }
0x121d   : > { %v5457_v63 = vsel %vm1272_vm8, %v5377_v9, %v5413_v8  ;;  %v5250_v9 = vmul.f32 1.442695, %v9542_v16 }
0x121e   : > { %5473 = vst [vmem:[%s9153_s20 + $0x8] sm:$0xff] %v5457_v63  ;;  %v5365_v63 = vmul.f32 %v9125_v27, %v9530_v35 }
0x121f   : > { %6907 = vpow2.f32 %v5250_v9 }
0x1220   : > { %v5428_v25 = vpop.xlane.xlu0 %5427  ;;  %6909 = vpow2.f32 %v5258_v59 }
0x1221   : > { %v5462_v36 = vsel %vm1272_vm8, %v5382_v6, %v5428_v25  ;;  %v9543_v6 = vld [vmem:[#allocation22_spill] sm:$0xff] }
0x1222   : > { %5478 = vst [vmem:[%s9153_s20 + $0x30] sm:$0xff] %v5462_v36  ;;  %v9544_v36 = vld [vmem:[#allocation24_spill] sm:$0xff] }
0x1223   : > { %v5419_v18 = vpop.xlane.xlu1 %5418 }
0x1224   : > { %v5459_v2 = vsel %vm1272_vm8, %v5379_v44, %v5419_v18  ;;  %v5321_v19 = vpop.permute.xlu0 %5320  ;;  %v5381_v44 = vadd.f32 %v5365_v63, %v9544_v36  ;;  %v5262_v18 = vmul.f32 1.442695, %v9072_v23  ;;  %v9547_v23 = vld [vmem:[#allocation28_spill] sm:$0xff] }
0x1225   : > { %5475 = vst [vmem:[%s9153_s20 + $0x18] sm:$0xff] %v5459_v2  ;;  %5326 = vrot.lane.b32.xlu1 %v5231_v28, %s6994_s9  ;;  %v5356_v38 = vadd.f32 %v5321_v19, %v5276_v34  ;;  %v5371_v28 = vmul.f32 %v9163_v54, %v9530_v35  ;;  %s5914_s9 = sshll.u32 %s7058_s28, 11  ;;  %s9269_s28 = scalar_lea.sflag [#allocation3], %s286_s17 }
0x1226   : > { %6911 = vpow2.f32 %v5262_v18  ;;  %s9261_s29 = scalar_lea.hbm %s9317_s7, %s5914_s9 }
0x1227   : > { %v5315_v43 = vpop.permute.xlu1 %5314  ;;  %v5372_v61 = vmul.f32 %v5356_v38, %v9530_v35  ;;  %v5387_v27 = vadd.f32 %v5371_v28, %v9545_v42 }
0x1229   : > { %v5388_v45 = vadd.f32 %v5372_v61, %v9539_v49 }
0x122c   : > { %v6908_v8 = vpop.eup %6907 }
0x122d   : > { %v5273_v25 = vmul.f32 %v6908_v8, %v9543_v6  ;;  %v6910_v22 = vpop.eup %6909 }
0x122e   : > { %v5277_v29 = vmul.f32 %v6910_v22, %v9546_v12 }
0x122f   : > { %v5353_v2 = vadd.f32 %v5315_v43, %v5273_v25 }
0x1231   : > { %v5369_v46 = vmul.f32 %v5353_v2, %v9530_v35 }
0x1233   : > { %v6912_v32 = vpop.eup %6911 }
0x1255   : > { %v5422_v5 = vpop.xlane.xlu0 %5421 }
0x1256   : > { %v5460_v17 = vsel %vm1272_vm8, %v5380_v15, %v5422_v5  ;;  %v5385_v15 = vadd.f32 %v5369_v46, %v9547_v23 }
0x1257   : > { %5476 = vst [vmem:[%s9153_s20 + $0x20] sm:$0xff] %v5460_v17  ;;  %v9548_v17 = vld [vmem:[#allocation38_spill] sm:$0xff] }
0x1258   : > { %v5431_v20 = vpop.xlane.xlu1 %5430 }
0x1259   : > { %v5463_v39 = vsel %vm1272_vm8, %v5383_v3, %v5431_v20  ;;  %v5440_v55 = vpop.xlane.xlu0 %5439 }
0x125a   : > { %5479 = vst [vmem:[%s9153_s20 + $0x38] sm:$0xff] %v5463_v39  ;;  %v5466_v47 = vsel %vm1272_vm8, %v5386_v31, %v5440_v55  ;;  %v9549_v31 = vld [vmem:[#allocation5_spill] sm:$0xff] }
0x125b   : > { %5482 = vst [vmem:[%s9153_s20 + $0x50] sm:$0xff] %v5466_v47  ;;  %v5279_v11 = vmul.f32 %v6912_v32, %v9549_v31 }
0x125c   : > { %v5323_v10 = vpop.permute.xlu1 %5322 }
0x125d   : > { %v5434_v60 = vpop.xlane.xlu0 %5433  ;;  %v5357_v53 = vadd.f32 %v5323_v10, %v5277_v29 }
0x125e   : > { %v5464_v24 = vsel %vm1272_vm8, %v5384_v14, %v5434_v60 }
0x125f   : > { %5480 = vst [vmem:[%s9153_s20 + $0x40] sm:$0xff] %v5464_v24  ;;  %v5373_v43 = vmul.f32 %v5357_v53, %v9530_v35 }
0x1261   : > { %v5452_v62 = vpop.xlane.xlu0 %5451  ;;  %v5389_v33 = vadd.f32 %v5373_v43, %v9548_v17 }
0x1265   : > { %v5446_v50 = vpop.xlane.xlu0 %5445 }
0x1266   : > { %v5468_v57 = vsel %vm1272_vm8, %v5388_v45, %v5446_v50 }
0x1267   : > { %5484 = vst [vmem:[%s9153_s20 + $0x60] sm:$0xff] %v5468_v57 }
0x1269   : > { %v5325_v58 = vpop.permute.xlu0 %5324 }
0x126a   : > { %v5358_v7 = vadd.f32 %v5325_v58, %v5278_v40 }
0x126c   : > { %v5374_v48 = vmul.f32 %v5358_v7, %v9530_v35 }
0x126e   : > { %v5390_v21 = vadd.f32 %v5374_v48, %v9541_v26 }
0x1270   : > { %v5470_v51 = vsel %vm1272_vm8, %v5390_v21, %v5452_v62 }
0x1271   : > { %5486 = vst [vmem:[%s9153_s20 + $0x70] sm:$0xff] %v5470_v51 }
0x128d   : > { %v5425_v37 = vpop.xlane.xlu1 %5424 }
0x128e   : > { %v5461_v1 = vsel %vm1272_vm8, %v5381_v44, %v5425_v37 }
0x128f   : > { %5477 = vst [vmem:[%s9153_s20 + $0x28] sm:$0xff] %v5461_v1 }
0x1291   : > { %v5443_v19 = vpop.xlane.xlu1 %5442 }
0x1292   : > { %v5467_v54 = vsel %vm1272_vm8, %v5387_v27, %v5443_v19 }
0x1293   : > { %5483 = vst [vmem:[%s9153_s20 + $0x58] sm:$0xff] %v5467_v54 }
0x1295   : > { %v5437_v52 = vpop.xlane.xlu1 %5436 }
0x1296   : > { %v5465_v56 = vsel %vm1272_vm8, %v5385_v15, %v5437_v52 }
0x1297   : > { %5481 = vst [vmem:[%s9153_s20 + $0x48] sm:$0xff] %v5465_v56 }
0x1299   : > { %v5455_v5 = vpop.xlane.xlu1 %5454 }
0x129d   : > { %v5449_v3 = vpop.xlane.xlu1 %5448 }
0x129e   : > { %v5469_v41 = vsel %vm1272_vm8, %v5389_v33, %v5449_v3 }
0x129f   : > { %5485 = vst [vmem:[%s9153_s20 + $0x68] sm:$0xff] %v5469_v41 }
0x12a1   : > { %v5327_v20 = vpop.permute.xlu1 %5326 }
0x12a2   : > { %v5359_v39 = vadd.f32 %v5327_v20, %v5279_v11 }
0x12a4   : > { %v5375_v55 = vmul.f32 %v5359_v39, %v9530_v35 }
0x12a6   : > { %v5391_v34 = vadd.f32 %v5375_v55, %v9550_v4 }
0x12a8   : > { %v5471_v47 = vsel %vm1272_vm8, %v5391_v34, %v5455_v5 }
0x12a9   : > { %5487 = vst [vmem:[%s9153_s20 + $0x78] sm:$0xff] %v5471_v47 }
0x12aa   : > { %6942 = shalt.err (!%p6939_p3)
}
0x12ab   : > { %s6943_s15 = scalar_lea.hbm %s9261_s29, 2048  ;;  %s6947_s20 = scalar_lea.hbm %s9317_s7, 4096 }
0x12ac   : > { %p6944_p4 = scmp.ne.s32.totalorder %s9261_s29, %s6943_s15  ;;  %p6948_p9 = scmp.lt.s32.totalorder %s9261_s29, %s9317_s7 }
0x12ad   : > { %p6949_p10 = scmp.lt.s32.totalorder %s6947_s20, %s6943_s15 }
0x12ae   : > { %p6945_p7 = pnand %p6944_p4, %p7075_p5 }
0x12af   : > { %p6950_p11 = por %p6949_p10, %p6948_p9 }
0x12b0   : > { %p6946_p8 = pneg %p6945_p7 }
0x12b2   : > { %p6951_p12 = pnand %p6950_p11, %p6946_p8 }
0x12b4   : > { %6954 = shalt.err (!%p6951_p12)
}
0x12b5   : > { %s6996_s23 = smov 128  }
0x12b6   : > { %6548 = dma.vmem_to_hbm [thread:$0]  (%p7075_p5), %s9263_s21, 2048, %s9261_s29, %s9269_s28, %s6996_s23, %s6996_s23, %s6993_s19  }
0x12b7 PF: > { %p6554_p13 = scmp.ge.s32.totalorder %s6989_s27, 2  ;;  %s5517_s8 = sand.u32 1, %s6977_s24  }
0x12b8   : > { %s5518_s13 = scalar_lea.sflag [#allocation3], %s5517_s8 }
0x12b9   : > { %p6551_p0 = pnand %p6554_p13, %p7079_p6 }
0x12bb   : > { %p6552_p1 = pneg %p6551_p0 }
0x12bd   : > { %6972 = dma.done.wait (%p6552_p1), %s5518_s13, 2048  }
0x12be   : > { %6974 = vsyncadd (%p6552_p1), %s5518_s13, 4294965248  ;;  %p17_p2 = scmp.ge.s32.totalorder %s7062_s30, 4   ;;  %s9551_s24 = smov %s6981_s25 }
0x12bf   : > { %s9552_s25 = smov %s6985_s26  ;;  %s9553_s26 = smov %s7073_s10 }
0x12c0   : > { %s9554_s27 = smov %s7062_s30  ;;  %19 = sbr.rel (!%p17_p2) target bundleno = 3 (0x3), region = 92 }
0x12c5   :  { %5523 = vsyncpa [#allocation3], 1 }
0x12c6   :  { %5525 = vsyncpa [#allocation3 + $0x1], 1 }

</bundles_post_ra>
